<compile_context>
chip_gen: v5e
topology: v5e:2x2
jax: 0.10.0
libtpu: 0.0.40
codegen_flags: <defaults>
</compile_context>

<pallas_src>
import jax
import jax.numpy as jnp
from jax.experimental import pallas as pl
from jax.experimental.pallas import tpu as pltpu


def _round_up(x, m):
    return (x + m - 1) // m * m


def _cdiv(a, b):
    return (a + b - 1) // b


def _physical_vmem_bytes():
    try:
        return int(pltpu.get_tpu_info().vmem_capacity_bytes)
    except Exception:
        return 64 * 1024 * 1024  # conservative: v7x per-TC VMEM


# ---------------------------------------------------------------------------
# Kernels
# ---------------------------------------------------------------------------

def _accumulate_layer1(x_ref, w1_ref, acc_ref):
    """acc += x_k @ w1_k  (bf16 operands, f32 accumulation on the MXU)."""

    @pl.when(pl.program_id(1) == 0)
    def _():
        acc_ref[...] = jnp.zeros_like(acc_ref)

    acc_ref[...] += jnp.dot(x_ref[...].astype(jnp.bfloat16), w1_ref[...],
                            preferred_element_type=jnp.float32)


def _mlp_tail(acc_ref, b1_ref, w2_ref, b2_ref, w3_ref, b3_ref):
    """Layer-1 bias+ReLU, then layers 2 and 3 of feat_net (f32 bias/ReLU)."""
    h = jnp.maximum(acc_ref[...] + b1_ref[...], 0.0)
    h = jnp.dot(h.astype(jnp.bfloat16), w2_ref[...],
                preferred_element_type=jnp.float32)
    h = jnp.maximum(h + b2_ref[...], 0.0)
    h = jnp.dot(h.astype(jnp.bfloat16), w3_ref[...],
                preferred_element_type=jnp.float32)
    h = jnp.maximum(h + b3_ref[...], 0.0)
    return h


def _feat_kernel(x_ref, w1_ref, b1_ref, w2_ref, b2_ref, w3_ref, b3_ref,
                 out_ref, acc_ref):
    _accumulate_layer1(x_ref, w1_ref, acc_ref)

    @pl.when(pl.program_id(1) == pl.num_programs(1) - 1)
    def _():
        out_ref[...] = _mlp_tail(acc_ref, b1_ref, w2_ref, b2_ref,
                                 w3_ref, b3_ref).astype(out_ref.dtype)


def _head_kernel(x_ref, w1_ref, b1_ref, w2_ref, b2_ref, w3_ref, b3_ref,
                 wh_ref, bh_ref, out_ref, acc_ref):
    _accumulate_layer1(x_ref, w1_ref, acc_ref)

    @pl.when(pl.program_id(1) == pl.num_programs(1) - 1)
    def _():
        h = _mlp_tail(acc_ref, b1_ref, w2_ref, b2_ref, w3_ref, b3_ref)
        out_ref[...] = (jnp.dot(h.astype(jnp.bfloat16), wh_ref[...],
                                preferred_element_type=jnp.float32)
                        + bh_ref[...]).astype(out_ref.dtype)


# ---------------------------------------------------------------------------
# Wrapper
# ---------------------------------------------------------------------------

class FeatureDiscriminatorPallas:
    """Pallas re-implementation of feature_Discriminator (spectral_norm=False)."""

    H1, H2, H3 = 400, 200, 100

    def __init__(self, input_size, key):
        self.input_size = input_size

        # Lane-align the flattened input; for large inputs stream w1 in
        # 1024-wide K slabs (pad in_p up to a multiple of the K tile).
        in_p = _round_up(input_size, 128)
        if in_p <= 2048:
            self.default_k_tile = in_p
        else:
            self.default_k_tile = 1024
            in_p = _round_up(in_p, self.default_k_tile)
        self.in_p = in_p
        self.h1_p = _round_up(self.H1, 128)   # 512
        self.h2_p = _round_up(self.H2, 128)   # 256
        self.h3_p = _round_up(self.H3, 128)   # 128
        self.out_p = 128                      # packed heads: col0=critic, col1=disc

        keys = jax.random.split(key, 10)

        def linear_params(kw, kb, fan_in, fan_out):
            # torch.nn.Linear default init: U(-1/sqrt(fan_in), 1/sqrt(fan_in))
            bound = 1.0 / float(fan_in) ** 0.5
            w = jax.random.uniform(kw, (fan_in, fan_out), jnp.float32, -bound, bound)
            b = jax.random.uniform(kb, (fan_out,), jnp.float32, -bound, bound)
            return w, b

        w1, b1 = linear_params(keys[0], keys[1], input_size, self.H1)
        w2, b2 = linear_params(keys[2], keys[3], self.H1, self.H2)
        w3, b3 = linear_params(keys[4], keys[5], self.H2, self.H3)
        wc, bc = linear_params(keys[6], keys[7], self.H3, 1)   # critic head
        wd, bd = linear_params(keys[8], keys[9], self.H3, 1)   # discriminator head

        # Keep f32 copies for reference checks.
        self.w1_f32, self.b1_f32 = w1, b1
        self.w2_f32, self.b2_f32 = w2, b2
        self.w3_f32, self.b3_f32 = w3, b3
        self.wc_f32, self.bc_f32 = wc, bc
        self.wd_f32, self.bd_f32 = wd, bd

        def pad_w_bf16(w, pad_in, pad_out):
            fi, fo = w.shape
            return jnp.pad(w, ((0, pad_in - fi), (0, pad_out - fo))).astype(jnp.bfloat16)

        def pad_b_f32(b, pad_out):
            return jnp.pad(b, (0, pad_out - b.shape[0])).reshape(1, pad_out)

        self.w1, self.b1 = pad_w_bf16(w1, self.in_p, self.h1_p), pad_b_f32(b1, self.h1_p)
        self.w2, self.b2 = pad_w_bf16(w2, self.h1_p, self.h2_p), pad_b_f32(b2, self.h2_p)
        self.w3, self.b3 = pad_w_bf16(w3, self.h2_p, self.h3_p), pad_b_f32(b3, self.h3_p)

        # Pack both 1-wide heads into one 128-wide matrix (free on the MXU
        # since the head output pads to 128 lanes anyway).
        wh = jnp.zeros((self.h3_p, self.out_p), jnp.float32)
        wh = wh.at[:self.H3, 0].set(wc[:, 0]).at[:self.H3, 1].set(wd[:, 0])
        bh = jnp.zeros((1, self.out_p), jnp.float32)
        bh = bh.at[0, 0].set(bc[0]).at[0, 1].set(bd[0])
        self.wh = wh.astype(jnp.bfloat16)
        self.bh = bh

    # -- batch tile selection ------------------------------------------------
    @staticmethod
    def _pick_batch_tile(B):
        if B >= 2048:
            return 1024                         # big tiles, many grid steps
        if B >= 64:
            return _round_up(_cdiv(B, 2), 16)   # >= 2 steps so v7x TC#2 has work
        return _round_up(max(B, 16), 16)        # one small 16-row-aligned tile

    # -- forward ---------------------------------------------------------------
    def __call__(self, X, require="critic", k_tile=None):
        if require not in ("critic", "discriminator", "feat"):
            raise ValueError(require)

        # Flatten NCHW -> (B, C*H*W), same as X.view(X.size(0), -1)
        if X.ndim == 4:
            X = X.reshape(X.shape[0], -1)
        B, F = X.shape
        assert F == self.input_size

        TB = self._pick_batch_tile(B)
        B_p = _round_up(B, TB)

        TK = self.default_k_tile if k_tile is None else int(k_tile)
        if TK % 128 != 0 or self.in_p % TK != 0:
            raise ValueError(f"k_tile={TK} must be a multiple of 128 dividing {self.in_p}")
        nk = self.in_p // TK

        # Single pad op; x stays f32 (cast to bf16 inside the kernel).
        x_p = jnp.pad(X, ((0, B_p - B), (0, self.in_p - F)))

        feat_only = (require == "feat")
        out_cols = self.h3_p if feat_only else self.out_p
        out_dtype = jnp.float32 if feat_only else jnp.bfloat16
        out_itemsize = jnp.dtype(out_dtype).itemsize

        # ---- VMEM limit (pessimistic: double-buffered weights) & cost -------
        w1_bytes = 2 * TK * self.h1_p * 2
        rest_w_bytes = 2 * ((self.h1_p * self.h2_p + self.h2_p * self.h3_p
                             + self.h3_p * self.out_p) * 2
                            + (self.h1_p + self.h2_p + self.h3_p + self.out_p) * 4)
        x_bytes = 2 * TB * TK * 4
        out_bytes = 2 * TB * out_cols * out_itemsize
        acc_bytes = TB * self.h1_p * 4
        act_bytes = TB * (self.h1_p + self.h2_p + self.h3_p) * 6  # f32 + bf16 temps
        need = w1_bytes + rest_w_bytes + x_bytes + out_bytes + acc_bytes + act_bytes
        need = int(need * 1.25) + (4 << 20)
        cap = (_physical_vmem_bytes() * 3) // 4
        vmem_limit = int(min(max(need, 32 << 20), cap))

        flops_per_row = 2 * (self.in_p * self.h1_p + self.h1_p * self.h2_p
                             + self.h2_p * self.h3_p)
        weight_bytes = ((self.in_p * self.h1_p + self.h1_p * self.h2_p
                         + self.h2_p * self.h3_p) * 2
                        + (self.h1_p + self.h2_p + self.h3_p) * 4)
        if not feat_only:
            flops_per_row += 2 * self.h3_p * self.out_p
            weight_bytes += self.h3_p * self.out_p * 2 + self.out_p * 4
        cost = pl.CostEstimate(
            flops=int(B_p) * int(flops_per_row),
            transcendentals=0,
            bytes_accessed=int(B_p * self.in_p * 4 + weight_bytes
                               + B_p * out_cols * out_itemsize))

        def run(single_buffer_weights):
            def resident(arr):
                # Whole array, constant index map -> loaded once, reused for
                # every batch tile; single-buffered to halve weight VMEM.
                if single_buffer_weights:
                    return pl.BlockSpec(arr.shape, lambda i, k: (0, 0),
                                        pipeline_mode=pl.Buffered(1))
                return pl.BlockSpec(arr.shape, lambda i, k: (0, 0))

            # w1 is K-tiled; keep default double buffering while it streams.
            if nk == 1 and single_buffer_weights:
                w1_spec = pl.BlockSpec((TK, self.h1_p), lambda i, k: (k, 0),
                                       pipeline_mode=pl.Buffered(1))
            else:
                w1_spec = pl.BlockSpec((TK, self.h1_p), lambda i, k: (k, 0))

            x_spec = pl.BlockSpec((TB, TK), lambda i, k: (i, k))
            out_spec = pl.BlockSpec((TB, out_cols), lambda i, k: (i, 0))

            if feat_only:
                kernel = _feat_kernel
                args = (x_p, self.w1, self.b1, self.w2, self.b2, self.w3, self.b3)
                in_specs = [x_spec, w1_spec, resident(self.b1),
                            resident(self.w2), resident(self.b2),
                            resident(self.w3), resident(self.b3)]
            else:
                kernel = _head_kernel
                args = (x_p, self.w1, self.b1, self.w2, self.b2, self.w3, self.b3,
                        self.wh, self.bh)
                in_specs = [x_spec, w1_spec, resident(self.b1),
                            resident(self.w2), resident(self.b2),
                            resident(self.w3), resident(self.b3),
                            resident(self.wh), resident(self.bh)]

            return pl.pallas_call(
                kernel,
                out_shape=jax.ShapeDtypeStruct((B_p, out_cols), out_dtype),
                grid=(B_p // TB, nk),
                in_specs=in_specs,
                out_specs=out_spec,
                scratch_shapes=[pltpu.VMEM((TB, self.h1_p), jnp.float32)],
                compiler_params=pltpu.CompilerParams(
                    dimension_semantics=("parallel", "arbitrary"),
                    vmem_limit_bytes=vmem_limit),
                cost_estimate=cost,
            )(*args)

        try:
            out = run(True)
        except Exception:
            # Fallback: same kernel without pipeline_mode hints.
            out = run(False)

        if feat_only:
            return out[:B, :self.H3]
        if require == "critic":
            # .view(-1) on a (B, 1) tensor -> shape (B,)
            return out[:B, 0].astype(jnp.float32)
        # discriminator: sigmoid applied in the wrapper on the tiny (B,) slice
        return jax.nn.sigmoid(out[:B, 1].astype(jnp.float32))


if __name__ == "__main__":
    key = jax.random.PRNGKey(0)
    k_params, k_input = jax.random.split(key)

    # Small conv-feature-shaped input: (B=2, C=4, H=16, W=16) -> flattened 1024.
    B, C, H, W = 2, 4, 16, 16
    input_size = C * H * W
    X = jax.random.normal(k_input, (B, C, H, W), jnp.float32)

    model = FeatureDiscriminatorPallas(input_size, k_params)

    critic_out = jax.block_until_ready(model(X, require="critic"))
    disc_out = jax.block_until_ready(model(X, require="discriminator"))
    feat_out = jax.block_until_ready(model(X, require="feat"))
    # Also exercise the K-tiled (streamed-w1) path at small scale.
    critic_kt = jax.block_until_ready(model(X, require="critic", k_tile=256))

    # Pure f32 reference of the same MLP (kernel uses bf16 => loose tolerance).
    x2d = X.reshape(B, -1)
    h = jax.nn.relu(x2d @ model.w1_f32 + model.b1_f32)
    h = jax.nn.relu(h @ model.w2_f32 + model.b2_f32)
    h = jax.nn.relu(h @ model.w3_f32 + model.b3_f32)
    critic_ref = (h @ model.wc_f32 + model.bc_f32)[:, 0]
    disc_ref = jax.nn.sigmoid((h @ model.wd_f32 + model.bd_f32)[:, 0])

    assert critic_out.shape == (B,)
    assert disc_out.shape == (B,)
    assert feat_out.shape == (B, 100)
    assert bool(jnp.all((disc_out >= 0.0) & (disc_out <= 1.0)))
    assert bool(jnp.all(feat_out >= 0.0))  # post-ReLU features
    assert bool(jnp.allclose(critic_out, critic_ref, atol=0.1, rtol=0.1))
    assert bool(jnp.allclose(critic_kt, critic_ref, atol=0.1, rtol=0.1))
    assert bool(jnp.allclose(disc_out, disc_ref, atol=0.1, rtol=0.1))
    assert bool(jnp.allclose(feat_out, h, atol=0.1, rtol=0.1))

    print("KERNEL_OK")
</pallas_src>

<mosaic_0001>
module attributes {stable_mosaic.version = 11 : i64} {
  func.func @_head_kernel(%arg0: i32, %arg1: i32, %arg2: memref<16x1024xf32, #tpu.memory_space<vmem>>, %arg3: memref<1024x512xbf16, #tpu.memory_space<vmem>>, %arg4: memref<1x512xf32, #tpu.memory_space<vmem>>, %arg5: memref<512x256xbf16, #tpu.memory_space<vmem>>, %arg6: memref<1x256xf32, #tpu.memory_space<vmem>>, %arg7: memref<256x128xbf16, #tpu.memory_space<vmem>>, %arg8: memref<1x128xf32, #tpu.memory_space<vmem>>, %arg9: memref<128x128xbf16, #tpu.memory_space<vmem>>, %arg10: memref<1x128xf32, #tpu.memory_space<vmem>>, %arg11: memref<16x128xbf16, #tpu.memory_space<vmem>>, %arg12: memref<16x512xf32, #tpu.memory_space<vmem>>) attributes {dimension_semantics = [#tpu.dimension_semantics<parallel>, #tpu.dimension_semantics<arbitrary>], iteration_bounds = array<i64: 1, 1>, scalar_prefetch = 0 : i64, scratch_operands = 1 : i64, tpu.core_type = #tpu.core_type<tc>, window_params = [{transform_indices = @transform_0, window_bounds = array<i64: 16, 1024>}, {pipeline_mode = #tpu.pipeline_mode<synchronous>, transform_indices = @transform_1, window_bounds = array<i64: 1024, 512>}, {pipeline_mode = #tpu.pipeline_mode<synchronous>, transform_indices = @transform_2, window_bounds = array<i64: 1, 512>}, {pipeline_mode = #tpu.pipeline_mode<synchronous>, transform_indices = @transform_3, window_bounds = array<i64: 512, 256>}, {pipeline_mode = #tpu.pipeline_mode<synchronous>, transform_indices = @transform_4, window_bounds = array<i64: 1, 256>}, {pipeline_mode = #tpu.pipeline_mode<synchronous>, transform_indices = @transform_5, window_bounds = array<i64: 256, 128>}, {pipeline_mode = #tpu.pipeline_mode<synchronous>, transform_indices = @transform_6, window_bounds = array<i64: 1, 128>}, {pipeline_mode = #tpu.pipeline_mode<synchronous>, transform_indices = @transform_7, window_bounds = array<i64: 128, 128>}, {pipeline_mode = #tpu.pipeline_mode<synchronous>, transform_indices = @transform_8, window_bounds = array<i64: 1, 128>}, {transform_indices = @transform_9, window_bounds = array<i64: 16, 128>}]} {
    %c0_i32 = arith.constant 0 : i32
    %0 = arith.cmpi eq, %arg1, %c0_i32 : i32
    %1 = arith.extui %0 : i1 to i32
    %c0_i32_0 = arith.constant 0 : i32
    %2 = arith.cmpi ne, %1, %c0_i32_0 : i32
    scf.if %2 {
      %cst_10 = arith.constant 0.000000e+00 : f32
      %13 = vector.broadcast %cst_10 : f32 to vector<16x512xf32>
      %c0_11 = arith.constant 0 : index
      %c0_12 = arith.constant 0 : index
      %14 = vector.load %arg12[%c0_11, %c0_12] : memref<16x512xf32, #tpu.memory_space<vmem>>, vector<16x512xf32>
      tpu.vector_store %arg12[%c0_11, %c0_12], %13 {strides = array<i32>} : memref<16x512xf32, #tpu.memory_space<vmem>>, vector<16x512xf32>,
    } else {
    }
    %c0 = arith.constant 0 : index
    %c0_1 = arith.constant 0 : index
    %3 = vector.load %arg12[%c0, %c0_1] : memref<16x512xf32, #tpu.memory_space<vmem>>, vector<16x512xf32>
    %c0_2 = arith.constant 0 : index
    %c0_3 = arith.constant 0 : index
    %4 = vector.load %arg2[%c0_2, %c0_3] : memref<16x1024xf32, #tpu.memory_space<vmem>>, vector<16x1024xf32>
    %5 = arith.truncf %4 : vector<16x1024xf32> to vector<16x1024xbf16>
    %c0_4 = arith.constant 0 : index
    %c0_5 = arith.constant 0 : index
    %6 = vector.load %arg3[%c0_4, %c0_5] : memref<1024x512xbf16, #tpu.memory_space<vmem>>, vector<1024x512xbf16>
    %cst = arith.constant dense<0.000000e+00> : vector<16x512xf32>
    %7 = tpu.matmul %5, %6, %cst {dimension_numbers = #tpu.dot_dimension_numbers<[1], [0], [0], [1], [0, 0, 1, 1], [], []>} : vector<16x1024xbf16>, vector<1024x512xbf16>, vector<16x512xf32> -> vector<16x512xf32>
    %8 = arith.addf %3, %7 : vector<16x512xf32>
    %c0_6 = arith.constant 0 : index
    %c0_7 = arith.constant 0 : index
    %9 = vector.load %arg12[%c0_6, %c0_7] : memref<16x512xf32, #tpu.memory_space<vmem>>, vector<16x512xf32>
    tpu.vector_store %arg12[%c0_6, %c0_7], %8 {strides = array<i32>} : memref<16x512xf32, #tpu.memory_space<vmem>>, vector<16x512xf32>,
    %c0_i32_8 = arith.constant 0 : i32
    %10 = arith.cmpi eq, %arg1, %c0_i32_8 : i32
    %11 = arith.extui %10 : i1 to i32
    %c0_i32_9 = arith.constant 0 : i32
    %12 = arith.cmpi ne, %11, %c0_i32_9 : i32
    scf.if %12 {
      %c0_10 = arith.constant 0 : index
      %c0_11 = arith.constant 0 : index
      %13 = vector.load %arg12[%c0_10, %c0_11] : memref<16x512xf32, #tpu.memory_space<vmem>>, vector<16x512xf32>
      %c0_12 = arith.constant 0 : index
      %c0_13 = arith.constant 0 : index
      %14 = vector.load %arg4[%c0_12, %c0_13] : memref<1x512xf32, #tpu.memory_space<vmem>>, vector<1x512xf32>
      %15 = vector.broadcast %14 : vector<1x512xf32> to vector<16x512xf32>
      %16 = arith.addf %13, %15 : vector<16x512xf32>
      %cst_14 = arith.constant 0.000000e+00 : f32
      %17 = vector.broadcast %cst_14 : f32 to vector<16x512xf32>
      %18 = arith.maximumf %16, %17 : vector<16x512xf32>
      %19 = arith.truncf %18 : vector<16x512xf32> to vector<16x512xbf16>
      %c0_15 = arith.constant 0 : index
      %c0_16 = arith.constant 0 : index
      %20 = vector.load %arg5[%c0_15, %c0_16] : memref<512x256xbf16, #tpu.memory_space<vmem>>, vector<512x256xbf16>
      %cst_17 = arith.constant dense<0.000000e+00> : vector<16x256xf32>
      %21 = tpu.matmul %19, %20, %cst_17 {dimension_numbers = #tpu.dot_dimension_numbers<[1], [0], [0], [1], [0, 0, 1, 1], [], []>} : vector<16x512xbf16>, vector<512x256xbf16>, vector<16x256xf32> -> vector<16x256xf32>
      %c0_18 = arith.constant 0 : index
      %c0_19 = arith.constant 0 : index
      %22 = vector.load %arg6[%c0_18, %c0_19] : memref<1x256xf32, #tpu.memory_space<vmem>>, vector<1x256xf32>
      %23 = vector.broadcast %22 : vector<1x256xf32> to vector<16x256xf32>
      %24 = arith.addf %21, %23 : vector<16x256xf32>
      %cst_20 = arith.constant 0.000000e+00 : f32
      %25 = vector.broadcast %cst_20 : f32 to vector<16x256xf32>
      %26 = arith.maximumf %24, %25 : vector<16x256xf32>
      %27 = arith.truncf %26 : vector<16x256xf32> to vector<16x256xbf16>
      %c0_21 = arith.constant 0 : index
      %c0_22 = arith.constant 0 : index
      %28 = vector.load %arg7[%c0_21, %c0_22] : memref<256x128xbf16, #tpu.memory_space<vmem>>, vector<256x128xbf16>
      %cst_23 = arith.constant dense<0.000000e+00> : vector<16x128xf32>
      %29 = tpu.matmul %27, %28, %cst_23 {dimension_numbers = #tpu.dot_dimension_numbers<[1], [0], [0], [1], [0, 0, 1, 1], [], []>} : vector<16x256xbf16>, vector<256x128xbf16>, vector<16x128xf32> -> vector<16x128xf32>
      %c0_24 = arith.constant 0 : index
      %c0_25 = arith.constant 0 : index
      %30 = vector.load %arg8[%c0_24, %c0_25] : memref<1x128xf32, #tpu.memory_space<vmem>>, vector<1x128xf32>
      %31 = vector.broadcast %30 : vector<1x128xf32> to vector<16x128xf32>
      %32 = arith.addf %29, %31 : vector<16x128xf32>
      %cst_26 = arith.constant 0.000000e+00 : f32
      %33 = vector.broadcast %cst_26 : f32 to vector<16x128xf32>
      %34 = arith.maximumf %32, %33 : vector<16x128xf32>
      %35 = arith.truncf %34 : vector<16x128xf32> to vector<16x128xbf16>
      %c0_27 = arith.constant 0 : index
      %c0_28 = arith.constant 0 : index
      %36 = vector.load %arg9[%c0_27, %c0_28] : memref<128x128xbf16, #tpu.memory_space<vmem>>, vector<128x128xbf16>
      %cst_29 = arith.constant dense<0.000000e+00> : vector<16x128xf32>
      %37 = tpu.matmul %35, %36, %cst_29 {dimension_numbers = #tpu.dot_dimension_numbers<[1], [0], [0], [1], [0, 0, 1, 1], [], []>} : vector<16x128xbf16>, vector<128x128xbf16>, vector<16x128xf32> -> vector<16x128xf32>
      %c0_30 = arith.constant 0 : index
      %c0_31 = arith.constant 0 : index
      %38 = vector.load %arg10[%c0_30, %c0_31] : memref<1x128xf32, #tpu.memory_space<vmem>>, vector<1x128xf32>
      %39 = vector.broadcast %38 : vector<1x128xf32> to vector<16x128xf32>
      %40 = arith.addf %37, %39 : vector<16x128xf32>
      %41 = arith.truncf %40 : vector<16x128xf32> to vector<16x128xbf16>
      %c0_32 = arith.constant 0 : index
      %c0_33 = arith.constant 0 : index
      %42 = vector.load %arg11[%c0_32, %c0_33] : memref<16x128xbf16, #tpu.memory_space<vmem>>, vector<16x128xbf16>
      tpu.vector_store %arg11[%c0_32, %c0_33], %41 {strides = array<i32>} : memref<16x128xbf16, #tpu.memory_space<vmem>>, vector<16x128xbf16>,
    } else {
    }
    return
  }
  func.func @transform_0(%arg0: i32, %arg1: i32) -> (i32, i32) {
    %c0_i32 = arith.constant 0 : i32
    return %arg0, %arg1 : i32, i32
  }
  func.func @transform_1(%arg0: i32, %arg1: i32) -> (i32, i32) {
    %c0_i32 = arith.constant 0 : i32
    %c0_i32_0 = arith.constant 0 : i32
    return %arg1, %c0_i32 : i32, i32
  }
  func.func @transform_2(%arg0: i32, %arg1: i32) -> (i32, i32) {
    %c0_i32 = arith.constant 0 : i32
    %c0_i32_0 = arith.constant 0 : i32
    %c0_i32_1 = arith.constant 0 : i32
    return %c0_i32, %c0_i32_0 : i32, i32
  }
  func.func @transform_3(%arg0: i32, %arg1: i32) -> (i32, i32) {
    %c0_i32 = arith.constant 0 : i32
    %c0_i32_0 = arith.constant 0 : i32
    %c0_i32_1 = arith.constant 0 : i32
    return %c0_i32, %c0_i32_0 : i32, i32
  }
  func.func @transform_4(%arg0: i32, %arg1: i32) -> (i32, i32) {
    %c0_i32 = arith.constant 0 : i32
    %c0_i32_0 = arith.constant 0 : i32
    %c0_i32_1 = arith.constant 0 : i32
    return %c0_i32, %c0_i32_0 : i32, i32
  }
  func.func @transform_5(%arg0: i32, %arg1: i32) -> (i32, i32) {
    %c0_i32 = arith.constant 0 : i32
    %c0_i32_0 = arith.constant 0 : i32
    %c0_i32_1 = arith.constant 0 : i32
    return %c0_i32, %c0_i32_0 : i32, i32
  }
  func.func @transform_6(%arg0: i32, %arg1: i32) -> (i32, i32) {
    %c0_i32 = arith.constant 0 : i32
    %c0_i32_0 = arith.constant 0 : i32
    %c0_i32_1 = arith.constant 0 : i32
    return %c0_i32, %c0_i32_0 : i32, i32
  }
  func.func @transform_7(%arg0: i32, %arg1: i32) -> (i32, i32) {
    %c0_i32 = arith.constant 0 : i32
    %c0_i32_0 = arith.constant 0 : i32
    %c0_i32_1 = arith.constant 0 : i32
    return %c0_i32, %c0_i32_0 : i32, i32
  }
  func.func @transform_8(%arg0: i32, %arg1: i32) -> (i32, i32) {
    %c0_i32 = arith.constant 0 : i32
    %c0_i32_0 = arith.constant 0 : i32
    %c0_i32_1 = arith.constant 0 : i32
    return %c0_i32, %c0_i32_0 : i32, i32
  }
  func.func @transform_9(%arg0: i32, %arg1: i32) -> (i32, i32) {
    %c0_i32 = arith.constant 0 : i32
    %c0_i32_0 = arith.constant 0 : i32
    return %arg0, %c0_i32 : i32, i32
  }
}

module attributes {stable_mosaic.version = 11 : i64} {
  func.func @_head_kernel(%arg0: i32, %arg1: i32, %arg2: memref<16x1024xf32, #tpu.memory_space<vmem>>, %arg3: memref<1024x512xbf16, #tpu.memory_space<vmem>>, %arg4: memref<1x512xf32, #tpu.memory_space<vmem>>, %arg5: memref<512x256xbf16, #tpu.memory_space<vmem>>, %arg6: memref<1x256xf32, #tpu.memory_space<vmem>>, %arg7: memref<256x128xbf16, #tpu.memory_space<vmem>>, %arg8: memref<1x128xf32, #tpu.memory_space<vmem>>, %arg9: memref<128x128xbf16, #tpu.memory_space<vmem>>, %arg10: memref<1x128xf32, #tpu.memory_space<vmem>>, %arg11: memref<16x128xbf16, #tpu.memory_space<vmem>>, %arg12: memref<16x512xf32, #tpu.memory_space<vmem>>) attributes {dimension_semantics = [#tpu.dimension_semantics<parallel>, #tpu.dimension_semantics<arbitrary>], iteration_bounds = array<i64: 1, 1>, scalar_prefetch = 0 : i64, scratch_operands = 1 : i64, tpu.core_type = #tpu.core_type<tc>, window_params = [{transform_indices = @transform_0, window_bounds = array<i64: 16, 1024>}, {transform_indices = @transform_1, window_bounds = array<i64: 1024, 512>}, {pipeline_mode = #tpu.pipeline_mode<synchronous>, transform_indices = @transform_2, window_bounds = array<i64: 1, 512>}, {pipeline_mode = #tpu.pipeline_mode<synchronous>, transform_indices = @transform_3, window_bounds = array<i64: 512, 256>}, {pipeline_mode = #tpu.pipeline_mode<synchronous>, transform_indices = @transform_4, window_bounds = array<i64: 1, 256>}, {pipeline_mode = #tpu.pipeline_mode<synchronous>, transform_indices = @transform_5, window_bounds = array<i64: 256, 128>}, {pipeline_mode = #tpu.pipeline_mode<synchronous>, transform_indices = @transform_6, window_bounds = array<i64: 1, 128>}, {pipeline_mode = #tpu.pipeline_mode<synchronous>, transform_indices = @transform_7, window_bounds = array<i64: 128, 128>}, {pipeline_mode = #tpu.pipeline_mode<synchronous>, transform_indices = @transform_8, window_bounds = array<i64: 1, 128>}, {transform_indices = @transform_9, window_bounds = array<i64: 16, 128>}]} {
    %c0_i32 = arith.constant 0 : i32
    %0 = arith.cmpi eq, %arg1, %c0_i32 : i32
    %1 = arith.extui %0 : i1 to i32
    %c0_i32_0 = arith.constant 0 : i32
    %2 = arith.cmpi ne, %1, %c0_i32_0 : i32
    scf.if %2 {
      %cst_10 = arith.constant 0.000000e+00 : f32
      %13 = vector.broadcast %cst_10 : f32 to vector<16x512xf32>
      %c0_11 = arith.constant 0 : index
      %c0_12 = arith.constant 0 : index
      %14 = vector.load %arg12[%c0_11, %c0_12] : memref<16x512xf32, #tpu.memory_space<vmem>>, vector<16x512xf32>
      tpu.vector_store %arg12[%c0_11, %c0_12], %13 {strides = array<i32>} : memref<16x512xf32, #tpu.memory_space<vmem>>, vector<16x512xf32>,
    } else {
    }
    %c0 = arith.constant 0 : index
    %c0_1 = arith.constant 0 : index
    %3 = vector.load %arg12[%c0, %c0_1] : memref<16x512xf32, #tpu.memory_space<vmem>>, vector<16x512xf32>
    %c0_2 = arith.constant 0 : index
    %c0_3 = arith.constant 0 : index
    %4 = vector.load %arg2[%c0_2, %c0_3] : memref<16x1024xf32, #tpu.memory_space<vmem>>, vector<16x1024xf32>
    %5 = arith.truncf %4 : vector<16x1024xf32> to vector<16x1024xbf16>
    %c0_4 = arith.constant 0 : index
    %c0_5 = arith.constant 0 : index
    %6 = vector.load %arg3[%c0_4, %c0_5] : memref<1024x512xbf16, #tpu.memory_space<vmem>>, vector<1024x512xbf16>
    %cst = arith.constant dense<0.000000e+00> : vector<16x512xf32>
    %7 = tpu.matmul %5, %6, %cst {dimension_numbers = #tpu.dot_dimension_numbers<[1], [0], [0], [1], [0, 0, 1, 1], [], []>} : vector<16x1024xbf16>, vector<1024x512xbf16>, vector<16x512xf32> -> vector<16x512xf32>
    %8 = arith.addf %3, %7 : vector<16x512xf32>
    %c0_6 = arith.constant 0 : index
    %c0_7 = arith.constant 0 : index
    %9 = vector.load %arg12[%c0_6, %c0_7] : memref<16x512xf32, #tpu.memory_space<vmem>>, vector<16x512xf32>
    tpu.vector_store %arg12[%c0_6, %c0_7], %8 {strides = array<i32>} : memref<16x512xf32, #tpu.memory_space<vmem>>, vector<16x512xf32>,
    %c0_i32_8 = arith.constant 0 : i32
    %10 = arith.cmpi eq, %arg1, %c0_i32_8 : i32
    %11 = arith.extui %10 : i1 to i32
    %c0_i32_9 = arith.constant 0 : i32
    %12 = arith.cmpi ne, %11, %c0_i32_9 : i32
    scf.if %12 {
      %c0_10 = arith.constant 0 : index
      %c0_11 = arith.constant 0 : index
      %13 = vector.load %arg12[%c0_10, %c0_11] : memref<16x512xf32, #tpu.memory_space<vmem>>, vector<16x512xf32>
      %c0_12 = arith.constant 0 : index
      %c0_13 = arith.constant 0 : index
      %14 = vector.load %arg4[%c0_12, %c0_13] : memref<1x512xf32, #tpu.memory_space<vmem>>, vector<1x512xf32>
      %15 = vector.broadcast %14 : vector<1x512xf32> to vector<16x512xf32>
      %16 = arith.addf %13, %15 : vector<16x512xf32>
      %cst_14 = arith.constant 0.000000e+00 : f32
      %17 = vector.broadcast %cst_14 : f32 to vector<16x512xf32>
      %18 = arith.maximumf %16, %17 : vector<16x512xf32>
      %19 = arith.truncf %18 : vector<16x512xf32> to vector<16x512xbf16>
      %c0_15 = arith.constant 0 : index
      %c0_16 = arith.constant 0 : index
      %20 = vector.load %arg5[%c0_15, %c0_16] : memref<512x256xbf16, #tpu.memory_space<vmem>>, vector<512x256xbf16>
      %cst_17 = arith.constant dense<0.000000e+00> : vector<16x256xf32>
      %21 = tpu.matmul %19, %20, %cst_17 {dimension_numbers = #tpu.dot_dimension_numbers<[1], [0], [0], [1], [0, 0, 1, 1], [], []>} : vector<16x512xbf16>, vector<512x256xbf16>, vector<16x256xf32> -> vector<16x256xf32>
      %c0_18 = arith.constant 0 : index
      %c0_19 = arith.constant 0 : index
      %22 = vector.load %arg6[%c0_18, %c0_19] : memref<1x256xf32, #tpu.memory_space<vmem>>, vector<1x256xf32>
      %23 = vector.broadcast %22 : vector<1x256xf32> to vector<16x256xf32>
      %24 = arith.addf %21, %23 : vector<16x256xf32>
      %cst_20 = arith.constant 0.000000e+00 : f32
      %25 = vector.broadcast %cst_20 : f32 to vector<16x256xf32>
      %26 = arith.maximumf %24, %25 : vector<16x256xf32>
      %27 = arith.truncf %26 : vector<16x256xf32> to vector<16x256xbf16>
      %c0_21 = arith.constant 0 : index
      %c0_22 = arith.constant 0 : index
      %28 = vector.load %arg7[%c0_21, %c0_22] : memref<256x128xbf16, #tpu.memory_space<vmem>>, vector<256x128xbf16>
      %cst_23 = arith.constant dense<0.000000e+00> : vector<16x128xf32>
      %29 = tpu.matmul %27, %28, %cst_23 {dimension_numbers = #tpu.dot_dimension_numbers<[1], [0], [0], [1], [0, 0, 1, 1], [], []>} : vector<16x256xbf16>, vector<256x128xbf16>, vector<16x128xf32> -> vector<16x128xf32>
      %c0_24 = arith.constant 0 : index
      %c0_25 = arith.constant 0 : index
      %30 = vector.load %arg8[%c0_24, %c0_25] : memref<1x128xf32, #tpu.memory_space<vmem>>, vector<1x128xf32>
      %31 = vector.broadcast %30 : vector<1x128xf32> to vector<16x128xf32>
      %32 = arith.addf %29, %31 : vector<16x128xf32>
      %cst_26 = arith.constant 0.000000e+00 : f32
      %33 = vector.broadcast %cst_26 : f32 to vector<16x128xf32>
      %34 = arith.maximumf %32, %33 : vector<16x128xf32>
      %35 = arith.truncf %34 : vector<16x128xf32> to vector<16x128xbf16>
      %c0_27 = arith.constant 0 : index
      %c0_28 = arith.constant 0 : index
      %36 = vector.load %arg9[%c0_27, %c0_28] : memref<128x128xbf16, #tpu.memory_space<vmem>>, vector<128x128xbf16>
      %cst_29 = arith.constant dense<0.000000e+00> : vector<16x128xf32>
      %37 = tpu.matmul %35, %36, %cst_29 {dimension_numbers = #tpu.dot_dimension_numbers<[1], [0], [0], [1], [0, 0, 1, 1], [], []>} : vector<16x128xbf16>, vector<128x128xbf16>, vector<16x128xf32> -> vector<16x128xf32>
      %c0_30 = arith.constant 0 : index
      %c0_31 = arith.constant 0 : index
      %38 = vector.load %arg10[%c0_30, %c0_31] : memref<1x128xf32, #tpu.memory_space<vmem>>, vector<1x128xf32>
      %39 = vector.broadcast %38 : vector<1x128xf32> to vector<16x128xf32>
      %40 = arith.addf %37, %39 : vector<16x128xf32>
      %41 = arith.truncf %40 : vector<16x128xf32> to vector<16x128xbf16>
      %c0_32 = arith.constant 0 : index
      %c0_33 = arith.constant 0 : index
      %42 = vector.load %arg11[%c0_32, %c0_33] : memref<16x128xbf16, #tpu.memory_space<vmem>>, vector<16x128xbf16>
      tpu.vector_store %arg11[%c0_32, %c0_33], %41 {strides = array<i32>} : memref<16x128xbf16, #tpu.memory_space<vmem>>, vector<16x128xbf16>,
    } else {
    }
    return
  }
  func.func @transform_0(%arg0: i32, %arg1: i32) -> (i32, i32) {
    %c0_i32 = arith.constant 0 : i32
    return %arg0, %arg1 : i32, i32
  }
  func.func @transform_1(%arg0: i32, %arg1: i32) -> (i32, i32) {
    %c0_i32 = arith.constant 0 : i32
    %c0_i32_0 = arith.constant 0 : i32
    return %arg1, %c0_i32 : i32, i32
  }
  func.func @transform_2(%arg0: i32, %arg1: i32) -> (i32, i32) {
    %c0_i32 = arith.constant 0 : i32
    %c0_i32_0 = arith.constant 0 : i32
    %c0_i32_1 = arith.constant 0 : i32
    return %c0_i32, %c0_i32_0 : i32, i32
  }
  func.func @transform_3(%arg0: i32, %arg1: i32) -> (i32, i32) {
    %c0_i32 = arith.constant 0 : i32
    %c0_i32_0 = arith.constant 0 : i32
    %c0_i32_1 = arith.constant 0 : i32
    return %c0_i32, %c0_i32_0 : i32, i32
  }
  func.func @transform_4(%arg0: i32, %arg1: i32) -> (i32, i32) {
    %c0_i32 = arith.constant 0 : i32
    %c0_i32_0 = arith.constant 0 : i32
    %c0_i32_1 = arith.constant 0 : i32
    return %c0_i32, %c0_i32_0 : i32, i32
  }
  func.func @transform_5(%arg0: i32, %arg1: i32) -> (i32, i32) {
    %c0_i32 = arith.constant 0 : i32
    %c0_i32_0 = arith.constant 0 : i32
    %c0_i32_1 = arith.constant 0 : i32
    return %c0_i32, %c0_i32_0 : i32, i32
  }
  func.func @transform_6(%arg0: i32, %arg1: i32) -> (i32, i32) {
    %c0_i32 = arith.constant 0 : i32
    %c0_i32_0 = arith.constant 0 : i32
    %c0_i32_1 = arith.constant 0 : i32
    return %c0_i32, %c0_i32_0 : i32, i32
  }
  func.func @transform_7(%arg0: i32, %arg1: i32) -> (i32, i32) {
    %c0_i32 = arith.constant 0 : i32
    %c0_i32_0 = arith.constant 0 : i32
    %c0_i32_1 = arith.constant 0 : i32
    return %c0_i32, %c0_i32_0 : i32, i32
  }
  func.func @transform_8(%arg0: i32, %arg1: i32) -> (i32, i32) {
    %c0_i32 = arith.constant 0 : i32
    %c0_i32_0 = arith.constant 0 : i32
    %c0_i32_1 = arith.constant 0 : i32
    return %c0_i32, %c0_i32_0 : i32, i32
  }
  func.func @transform_9(%arg0: i32, %arg1: i32) -> (i32, i32) {
    %c0_i32 = arith.constant 0 : i32
    %c0_i32_0 = arith.constant 0 : i32
    return %arg0, %c0_i32 : i32, i32
  }
}

</mosaic_0001>

<bundles_post_ra>
// kernel: tpu_custom_call.1
= control target key start
LH: loop header
LB: loop body
LE: loop exit
PB: predicated region body
PF: predicated region fallthrough
CT: control target
= control target key end

     0   :  { %14 = vsyncpa [#allocation4], 0  ;;  %s5122_s0 = inlined_call_operand.hbm [shape: f32[16,1024], index: 0, kind: input, shape index: {}]   ;;  %s5123_s1 = inlined_call_operand.hbm [shape: bf16[1024,512], index: 1, kind: input, shape index: {}]   ;;  %s5124_s2 = inlined_call_operand.hbm [shape: f32[1,512], index: 2, kind: input, shape index: {}]   ;;  %s5125_s3 = inlined_call_operand.hbm [shape: bf16[512,256], index: 3, kind: input, shape index: {}]   ;;  %s5126_s4 = inlined_call_operand.vmem [shape: f32[1,256], index: 4, kind: input, shape index: {}]   ;;  %s5127_s5 = inlined_call_operand.hbm [shape: bf16[256,128], index: 5, kind: input, shape index: {}]   ;;  %s5128_s6 = inlined_call_operand.vmem [shape: f32[1,128], index: 6, kind: input, shape index: {}]   ;;  %s5129_s7 = inlined_call_operand.hbm [shape: bf16[128,128], index: 7, kind: input, shape index: {}]   ;;  %s5130_s8 = inlined_call_operand.vmem [shape: f32[1,128], index: 8, kind: input, shape index: {}]   ;;  %s5131_s9 = inlined_call_operand.hbm [shape: bf16[16,128], index: 9, kind: output, shape index: {}]  }
   0x1   :  { %15 = vsyncpa [#allocation7], 0 }
   0x2   :  { %16 = vsyncpa [#allocation10], 0 }
   0x3   :  { %17 = vsyncpa [#allocation13], 0  ;;  %s36_s11 = sshll.u32 %s5123_s1, 4  ;;  %s37_s11 = int_to_ptr.hbm [resolvable:$true] %s36_s11 }
   0x4   :  { %18 = vsyncpa [#allocation5], 0  ;;  %s4908_s12 = smov [#allocation6]   ;;  %s60_s16 = sshll.u32 %s5125_s3, 4  ;;  %s61_s16 = int_to_ptr.hbm [resolvable:$true] %s60_s16 }
   0x5   :  { %s38_s13 = sshll.u32 %s4908_s12, 4  ;;  %s4909_s17 = smov 256   ;;  %s39_s13 = int_to_ptr.vmem [resolvable:$true] %s38_s13 }
   0x6   :  { %s4910_s18 = smov 16   ;;  %s4911_s19 = smov [#allocation9]  }
   0x7   :  { %44 = dma.hbm_to_vmem [thread:$0]  %s37_s11, 32768, %s39_s13, [#allocation7], %s4909_s17, %s4909_s17, %s4910_s18  }
   0x8   :  { %s62_s20 = sshll.u32 %s4911_s19, 4  ;;  %s4912_s21 = smov 128   ;;  %s63_s20 = int_to_ptr.vmem [resolvable:$true] %s62_s20 }
   0x9   :  { %s4913_s22 = smov 8   ;;  %s23_s24 = sshll.u32 %s5122_s0, 4  ;;  %s24_s24 = int_to_ptr.hbm [resolvable:$true] %s23_s24 }
   0xa   :  { %68 = dma.hbm_to_vmem [thread:$0]  %s61_s16, 8192, %s63_s20, [#allocation10], %s4912_s21, %s4912_s21, %s4913_s22  }
   0xb   :  { %s4914_s25 = smov [#allocation3]   ;;  %s50_s28 = sshll.u32 %s5124_s2, 4  ;;  %s51_s28 = int_to_ptr.hbm [resolvable:$true] %s50_s28 }
   0xc   :  { %s25_s26 = sshll.u32 %s4914_s25, 4  ;;  %s4915_s29 = smov 1024   ;;  %s26_s26 = int_to_ptr.vmem [resolvable:$true] %s25_s26 }
   0xd   :  { %s4916_s30 = smov 64   ;;  %s4917_s10 = smov [#allocation8]  }
   0xe   :  { %31 = dma.hbm_to_vmem [thread:$0]  %s24_s24, 2048, %s26_s26, [#allocation4], %s4915_s29, %s4915_s29, %s4916_s30  }
   0xf   :  { %s52_s11 = sshll.u32 %s4917_s10, 4  ;;  %s75_s14 = sshll.u32 %s5127_s5, 4  ;;  %s53_s11 = int_to_ptr.vmem [resolvable:$true] %s52_s11  ;;  %s76_s14 = int_to_ptr.hbm [resolvable:$true] %s75_s14 }
  0x10   :  { %55 = dma.hbm_to_vmem [thread:$0]  %s51_s28, 64, %s53_s11, [#allocation7]  }
  0x11   :  { %s4918_s0 = smov [#allocation11]   ;;  %s90_s2 = sshll.u32 %s5129_s7, 4  ;;  %s91_s2 = int_to_ptr.hbm [resolvable:$true] %s90_s2 }
  0x12   :  { %s77_s15 = sshll.u32 %s4918_s0, 4  ;;  %s4919_s18 = smov 4   ;;  %s78_s15 = int_to_ptr.vmem [resolvable:$true] %s77_s15 }
  0x13   :  { %83 = dma.hbm_to_vmem [thread:$0]  %s76_s14, 2048, %s78_s15, [#allocation10], %s4916_s30, %s4916_s30, %s4919_s18  }
  0x14   :  { %s4920_s19 = smov [#allocation12]  }
  0x15   :  { %s92_s20 = sshll.u32 %s4920_s19, 4  ;;  %s93_s20 = int_to_ptr.vmem [resolvable:$true] %s92_s20 }
  0x16   :  { %98 = dma.hbm_to_vmem [thread:$0]  %s91_s2, 1024, %s93_s20, [#allocation13], %s4916_s30, %s4916_s30, %s4919_s18  }
  0x17   :  { %4898 = dma.done.wait [#allocation4], 2048  }
  0x18   :  { %4899 = vsyncadd [#allocation4], 4294965248 }
  0x19   :  { %4900 = dma.done.wait [#allocation7], 32832  }
  0x1a   :  { %4901 = vsyncadd [#allocation7], 4294934464 }
  0x1b   :  { %4902 = dma.done.wait [#allocation10], 10240  }
  0x1c   :  { %4903 = vsyncadd [#allocation10], 4294957056 }
  0x1d   :  { %4904 = dma.done.wait [#allocation13], 1024  }
  0x1e   :  { %4905 = vsyncadd [#allocation13], 4294966272  ;;  %v3103_v0 = vld [vmem:[#allocation6 + $0xe0] sm:$0xf]  ;;  %v4395_v1 = vld [vmem:[#allocation6 + $0xec] sm:$0xf0] }
  0x1f   :  { %v3231_v2 = vld [vmem:[#allocation6 + $0x1e0] sm:$0xf]  ;;  %v3104_v3 = vor.u32 %v4395_v1, %v3103_v0  ;;  %v4427_v4 = vld [vmem:[#allocation6 + $0x1ec] sm:$0xf0]  ;;  %s4921_s23 = smov [#allocation14]   ;;  %s2973_s26 = sshll.u32 %s5131_s9, 4  ;;  %s2974_s26 = int_to_ptr.hbm [resolvable:$true] %s2973_s26 }
  0x20   :  { %v3359_v5 = vld [vmem:[#allocation6 + $0x2e0] sm:$0xf]  ;;  %v4459_v6 = vld [vmem:[#allocation6 + $0x2ec] sm:$0xf0]  ;;  %v3232_v7 = vor.u32 %v4427_v4, %v3231_v2  ;;  %s2971_s24 = sshll.u32 %s4921_s23, 4  ;;  %s2972_s24 = int_to_ptr.vmem [resolvable:$true] %s2971_s24 }
  0x21   :  { %v3360_v8 = vor.u32 %v4459_v6, %v3359_v5  ;;  %v3487_v9 = vld [vmem:[#allocation6 + $0x3e0] sm:$0xf]  ;;  %v4491_v10 = vld [vmem:[#allocation6 + $0x3ec] sm:$0xf0]  ;;  %1705 = vmatpush.bf16.msra.mxu0 %v3104_v3 }
  0x22   :  { %v3087_v11 = vld [vmem:[#allocation6 + $0xc0] sm:$0xf]  ;;  %v3488_v12 = vor.u32 %v4491_v10, %v3487_v9  ;;  %v4391_v13 = vld [vmem:[#allocation6 + $0xcc] sm:$0xf0]  ;;  %1719 = vmatpush.bf16.msra.mxu1 %v3232_v7 }
  0x23   :  { %v3215_v14 = vld [vmem:[#allocation6 + $0x1c0] sm:$0xf]  ;;  %v4423_v15 = vld [vmem:[#allocation6 + $0x1cc] sm:$0xf0]  ;;  %1733 = vmatpush.bf16.msra.mxu2 %v3360_v8  ;;  %v3088_v16 = vor.u32 %v4391_v13, %v3087_v11 }
  0x24   :  { %v3216_v17 = vor.u32 %v4423_v15, %v3215_v14  ;;  %v3343_v18 = vld [vmem:[#allocation6 + $0x2c0] sm:$0xf]  ;;  %v4455_v19 = vld [vmem:[#allocation6 + $0x2cc] sm:$0xf0]  ;;  %1747 = vmatpush.bf16.msra.mxu3 %v3488_v12 }
  0x25   :  { %v3471_v20 = vld [vmem:[#allocation6 + $0x3c0] sm:$0xf]  ;;  %v3344_v21 = vor.u32 %v4455_v19, %v3343_v18  ;;  %v4487_v22 = vld [vmem:[#allocation6 + $0x3cc] sm:$0xf0]  ;;  %1706 = vmatpush.bf16.msra.mxu0 %v3088_v16 }
  0x26   :  { %v3071_v23 = vld [vmem:[#allocation6 + $0xa0] sm:$0xf]  ;;  %v4387_v24 = vld [vmem:[#allocation6 + $0xac] sm:$0xf0]  ;;  %v3472_v25 = vor.u32 %v4487_v22, %v3471_v20  ;;  %1720 = vmatpush.bf16.msra.mxu1 %v3216_v17 }
  0x27   :  { %v3199_v26 = vld [vmem:[#allocation6 + $0x1a0] sm:$0xf]  ;;  %v4419_v27 = vld [vmem:[#allocation6 + $0x1ac] sm:$0xf0]  ;;  %v3072_v29 = vor.u32 %v4387_v24, %v3071_v23  ;;  %1734 = vmatpush.bf16.msra.mxu2 %v3344_v21 }
  0x28   :  { %v3327_v28 = vld [vmem:[#allocation6 + $0x2a0] sm:$0xf]  ;;  %v4451_v30 = vld [vmem:[#allocation6 + $0x2ac] sm:$0xf0]  ;;  %v3200_v33 = vor.u32 %v4419_v27, %v3199_v26  ;;  %1748 = vmatpush.bf16.msra.mxu3 %v3472_v25 }
  0x29   :  { %v3455_v31 = vld [vmem:[#allocation6 + $0x3a0] sm:$0xf]  ;;  %v4483_v32 = vld [vmem:[#allocation6 + $0x3ac] sm:$0xf0]  ;;  %v3328_v34 = vor.u32 %v4451_v30, %v3327_v28  ;;  %1707 = vmatpush.bf16.msra.mxu0 %v3072_v29 }
  0x2a   :  { %v3055_v35 = vld [vmem:[#allocation6 + $0x80] sm:$0xf]  ;;  %v4383_v36 = vld [vmem:[#allocation6 + $0x8c] sm:$0xf0]  ;;  %v3456_v38 = vor.u32 %v4483_v32, %v3455_v31  ;;  %1721 = vmatpush.bf16.msra.mxu1 %v3200_v33 }
  0x2b   :  { %v3183_v37 = vld [vmem:[#allocation6 + $0x180] sm:$0xf]  ;;  %v4415_v39 = vld [vmem:[#allocation6 + $0x18c] sm:$0xf0]  ;;  %v3056_v44 = vor.u32 %v4383_v36, %v3055_v35  ;;  %1735 = vmatpush.bf16.msra.mxu2 %v3328_v34 }
  0x2c   :  { %v3311_v40 = vld [vmem:[#allocation6 + $0x280] sm:$0xf]  ;;  %v4447_v41 = vld [vmem:[#allocation6 + $0x28c] sm:$0xf0]  ;;  %v3184_v45 = vor.u32 %v4415_v39, %v3183_v37  ;;  %1749 = vmatpush.bf16.msra.mxu3 %v3456_v38 }
  0x2d   :  { %v3439_v42 = vld [vmem:[#allocation6 + $0x380] sm:$0xf]  ;;  %v4479_v43 = vld [vmem:[#allocation6 + $0x38c] sm:$0xf0]  ;;  %v3312_v46 = vor.u32 %v4447_v41, %v3311_v40  ;;  %1708 = vmatpush.bf16.msra.mxu0 %v3056_v44 }
  0x2e   :  { %v3039_v47 = vld [vmem:[#allocation6 + $0x60] sm:$0xf]  ;;  %v4379_v48 = vld [vmem:[#allocation6 + $0x6c] sm:$0xf0]  ;;  %v3440_v50 = vor.u32 %v4479_v43, %v3439_v42  ;;  %1722 = vmatpush.bf16.msra.mxu1 %v3184_v45 }
  0x2f   :  { %v3167_v49 = vld [vmem:[#allocation6 + $0x160] sm:$0xf]  ;;  %v4411_v51 = vld [vmem:[#allocation6 + $0x16c] sm:$0xf0]  ;;  %v3040_v56 = vor.u32 %v4379_v48, %v3039_v47  ;;  %1736 = vmatpush.bf16.msra.mxu2 %v3312_v46 }
  0x30   :  { %v3295_v52 = vld [vmem:[#allocation6 + $0x260] sm:$0xf]  ;;  %v4443_v53 = vld [vmem:[#allocation6 + $0x26c] sm:$0xf0]  ;;  %v3168_v57 = vor.u32 %v4411_v51, %v3167_v49  ;;  %1750 = vmatpush.bf16.msra.mxu3 %v3440_v50 }
  0x31   :  { %v3423_v54 = vld [vmem:[#allocation6 + $0x360] sm:$0xf]  ;;  %v4475_v55 = vld [vmem:[#allocation6 + $0x36c] sm:$0xf0]  ;;  %v3296_v58 = vor.u32 %v4443_v53, %v3295_v52  ;;  %1709 = vmatpush.bf16.msra.mxu0 %v3040_v56 }
  0x32   :  { %v3023_v59 = vld [vmem:[#allocation6 + $0x40] sm:$0xf]  ;;  %v4375_v60 = vld [vmem:[#allocation6 + $0x4c] sm:$0xf0]  ;;  %v3424_v62 = vor.u32 %v4475_v55, %v3423_v54  ;;  %1723 = vmatpush.bf16.msra.mxu1 %v3168_v57 }
  0x33   :  { %v3151_v61 = vld [vmem:[#allocation6 + $0x140] sm:$0xf]  ;;  %v4407_v63 = vld [vmem:[#allocation6 + $0x14c] sm:$0xf0]  ;;  %v3024_v4 = vor.u32 %v4375_v60, %v3023_v59  ;;  %1737 = vmatpush.bf16.msra.mxu2 %v3296_v58 }
  0x34   :  { %v3279_v0 = vld [vmem:[#allocation6 + $0x240] sm:$0xf]  ;;  %v4439_v1 = vld [vmem:[#allocation6 + $0x24c] sm:$0xf0]  ;;  %v3152_v5 = vor.u32 %v4407_v63, %v3151_v61  ;;  %1751 = vmatpush.bf16.msra.mxu3 %v3424_v62 }
  0x35   :  { %v3407_v2 = vld [vmem:[#allocation6 + $0x340] sm:$0xf]  ;;  %v4471_v3 = vld [vmem:[#allocation6 + $0x34c] sm:$0xf0]  ;;  %v3280_v6 = vor.u32 %v4439_v1, %v3279_v0  ;;  %1710 = vmatpush.bf16.msra.mxu0 %v3024_v4 }
  0x36   :  { %v3007_v7 = vld [vmem:[#allocation6 + $0x20] sm:$0xf]  ;;  %v4371_v8 = vld [vmem:[#allocation6 + $0x2c] sm:$0xf0]  ;;  %v3408_v10 = vor.u32 %v4471_v3, %v3407_v2  ;;  %1724 = vmatpush.bf16.msra.mxu1 %v3152_v5 }
  0x37   :  { %v3135_v9 = vld [vmem:[#allocation6 + $0x120] sm:$0xf]  ;;  %v4403_v11 = vld [vmem:[#allocation6 + $0x12c] sm:$0xf0]  ;;  %v3008_v16 = vor.u32 %v4371_v8, %v3007_v7  ;;  %1738 = vmatpush.bf16.msra.mxu2 %v3280_v6  ;;  %v146_v6 = vld [vmem:[#allocation3 + $0x8] sm:$0xff] }
  0x38   :  { %v3263_v12 = vld [vmem:[#allocation6 + $0x220] sm:$0xf]  ;;  %v4435_v13 = vld [vmem:[#allocation6 + $0x22c] sm:$0xf0]  ;;  %v3136_v19 = vor.u32 %v4403_v11, %v3135_v9  ;;  %1752 = vmatpush.bf16.msra.mxu3 %v3408_v10  ;;  %v154_v7 = vld [vmem:[#allocation3 + $0x48] sm:$0xff] }
  0x39   :  { %v3391_v14 = vld [vmem:[#allocation6 + $0x320] sm:$0xf]  ;;  %v4467_v15 = vld [vmem:[#allocation6 + $0x32c] sm:$0xf0]  ;;  %v3264_v20 = vor.u32 %v4435_v13, %v3263_v12  ;;  %1711 = vmatpush.bf16.msra.mxu0 %v3008_v16  ;;  %v148_v8 = vld [vmem:[#allocation3 + $0x18] sm:$0xff]  ;;  %v5003_v10 = vpack.c.bf16 %v154_v7, %v146_v6 }
  0x3a   :  { %v2991_v17 = vld [vmem:[#allocation6] sm:$0xf]  ;;  %v4367_v18 = vld [vmem:[#allocation6 + $0xc] sm:$0xf0]  ;;  %v3392_v24 = vor.u32 %v4467_v15, %v3391_v14  ;;  %1725 = vmatpush.bf16.msra.mxu1 %v3136_v19  ;;  %v156_v11 = vld [vmem:[#allocation3 + $0x58] sm:$0xff] }
  0x3b   :  { %v3119_v21 = vld [vmem:[#allocation6 + $0x100] sm:$0xf]  ;;  %v4399_v22 = vld [vmem:[#allocation6 + $0x10c] sm:$0xf0]  ;;  %v2992_v31 = vor.u32 %v4367_v18, %v2991_v17  ;;  %1739 = vmatpush.bf16.msra.mxu2 %v3264_v20  ;;  %v5005_v17 = vpack.c.bf16 %v156_v11, %v148_v8 }
  0x3c   :  { %v3247_v23 = vld [vmem:[#allocation6 + $0x200] sm:$0xf]  ;;  %v4431_v25 = vld [vmem:[#allocation6 + $0x20c] sm:$0xf0]  ;;  %v3120_v35 = vor.u32 %v4399_v22, %v3119_v21  ;;  %1753 = vmatpush.bf16.msra.mxu3 %v3392_v24 }
  0x3d   :  { %v3375_v26 = vld [vmem:[#allocation6 + $0x300] sm:$0xf]  ;;  %v4463_v27 = vld [vmem:[#allocation6 + $0x30c] sm:$0xf0]  ;;  %v3248_v36 = vor.u32 %v4431_v25, %v3247_v23  ;;  %1712 = vmatpush.bf16.msra.mxu0 %v2992_v31 }
  0x3e   :  { %v3615_v28 = vld [vmem:[#allocation6 + $0x4e0] sm:$0xf]  ;;  %v4523_v29 = vld [vmem:[#allocation6 + $0x4ec] sm:$0xf0]  ;;  %v3376_v39 = vor.u32 %v4463_v27, %v3375_v26  ;;  %1726 = vmatpush.bf16.msra.mxu1 %v3120_v35 }
  0x3f   :  { %v3743_v30 = vld [vmem:[#allocation6 + $0x5e0] sm:$0xf]  ;;  %v4555_v32 = vld [vmem:[#allocation6 + $0x5ec] sm:$0xf0]  ;;  %v3616_v40 = vor.u32 %v4523_v29, %v3615_v28  ;;  %1740 = vmatpush.bf16.msra.mxu2 %v3248_v36 }
  0x40   :  { %v3871_v33 = vld [vmem:[#allocation6 + $0x6e0] sm:$0xf]  ;;  %v4587_v34 = vld [vmem:[#allocation6 + $0x6ec] sm:$0xf0]  ;;  %v3744_v43 = vor.u32 %v4555_v32, %v3743_v30  ;;  %1754 = vmatpush.bf16.msra.mxu3 %v3376_v39 }
  0x41   :  { %v3999_v37 = vld [vmem:[#allocation6 + $0x7e0] sm:$0xf]  ;;  %v4619_v38 = vld [vmem:[#allocation6 + $0x7ec] sm:$0xf0]  ;;  %v3872_v44 = vor.u32 %v4587_v34, %v3871_v33  ;;  %1761 = vmatpush.bf16.msrb.mxu0 %v3616_v40  ;;  %1727 = vmatmul.bf16.vlgmr.msra.gmra.mxu1 %v5003_v10 }
  0x42   :  { %v3599_v41 = vld [vmem:[#allocation6 + $0x4c0] sm:$0xf]  ;;  %v4519_v42 = vld [vmem:[#allocation6 + $0x4cc] sm:$0xf0]  ;;  %v4000_v48 = vor.u32 %v4619_v38, %v3999_v37  ;;  %1775 = vmatpush.bf16.msrb.mxu1 %v3744_v43 }
  0x43   :  { %v3727_v45 = vld [vmem:[#allocation6 + $0x5c0] sm:$0xf]  ;;  %v4551_v46 = vld [vmem:[#allocation6 + $0x5cc] sm:$0xf0]  ;;  %v3600_v55 = vor.u32 %v4519_v42, %v3599_v41  ;;  %1789 = vmatpush.bf16.msrb.mxu2 %v3872_v44  ;;  %1755 = vmatmul.bf16.vlgmr.msra.gmra.mxu3 %v5005_v17 }
  0x44   :  { %v3855_v47 = vld [vmem:[#allocation6 + $0x6c0] sm:$0xf]  ;;  %v4583_v49 = vld [vmem:[#allocation6 + $0x6cc] sm:$0xf0]  ;;  %v3728_v60 = vor.u32 %v4551_v46, %v3727_v45  ;;  %1803 = vmatpush.bf16.msrb.mxu3 %v4000_v48 }
  0x45   :  { %v3983_v50 = vld [vmem:[#allocation6 + $0x7c0] sm:$0xf]  ;;  %v4615_v51 = vld [vmem:[#allocation6 + $0x7cc] sm:$0xf0]  ;;  %v3856_v61 = vor.u32 %v4583_v49, %v3855_v47  ;;  %1762 = vmatpush.bf16.msrb.mxu0 %v3600_v55 }
  0x46   :  { %v145_v52 = vld [vmem:[#allocation3] sm:$0xff]  ;;  %v147_v54 = vld [vmem:[#allocation3 + $0x10] sm:$0xff]  ;;  %v3984_v2 = vor.u32 %v4615_v51, %v3983_v50  ;;  %1776 = vmatpush.bf16.msrb.mxu1 %v3728_v60 }
  0x47   :  { %v153_v53 = vld [vmem:[#allocation3 + $0x40] sm:$0xff]  ;;  %v4515_v57 = vld [vmem:[#allocation6 + $0x4ac] sm:$0xf0]  ;;  %1790 = vmatpush.bf16.msrb.mxu2 %v3856_v61 }
  0x48   :  { %v3583_v56 = vld [vmem:[#allocation6 + $0x4a0] sm:$0xf]  ;;  %v4997_v58 = vpack.c.bf16 %v153_v53, %v145_v52  ;;  %v155_v59 = vld [vmem:[#allocation3 + $0x50] sm:$0xff]  ;;  %1804 = vmatpush.bf16.msrb.mxu3 %v3984_v2 }
  0x49   :  { %v3711_v62 = vld [vmem:[#allocation6 + $0x5a0] sm:$0xf]  ;;  %v4547_v63 = vld [vmem:[#allocation6 + $0x5ac] sm:$0xf0]  ;;  %v4999_v1 = vpack.c.bf16 %v155_v59, %v147_v54  ;;  %v3584_v9 = vor.u32 %v4515_v57, %v3583_v56 }
  0x4a   :  { %v3839_v0 = vld [vmem:[#allocation6 + $0x6a0] sm:$0xf]  ;;  %v4579_v3 = vld [vmem:[#allocation6 + $0x6ac] sm:$0xf0]  ;;  %1713 = vmatmul.bf16.vlgmr.msra.gmra.mxu0 %v4997_v58  ;;  %v3712_v12 = vor.u32 %v4547_v63, %v3711_v62 }
  0x4b   :  { %v3967_v4 = vld [vmem:[#allocation6 + $0x7a0] sm:$0xf]  ;;  %v4611_v5 = vld [vmem:[#allocation6 + $0x7ac] sm:$0xf0]  ;;  %1741 = vmatmul.bf16.vlgmr.msra.gmra.mxu2 %v4999_v1  ;;  %v3840_v13 = vor.u32 %v4579_v3, %v3839_v0  ;;  %1763 = vmatpush.bf16.msrb.mxu0 %v3584_v9  ;;  %v4393_v9 = vld [vmem:[#allocation6 + $0xe4] sm:$0xf] }
  0x4c   :  { %v3567_v14 = vld [vmem:[#allocation6 + $0x480] sm:$0xf]  ;;  %v4511_v15 = vld [vmem:[#allocation6 + $0x48c] sm:$0xf0]  ;;  %v3968_v18 = vor.u32 %v4611_v5, %v3967_v4  ;;  %1777 = vmatpush.bf16.msrb.mxu1 %v3712_v12  ;;  %v3105_v12 = vld [vmem:[#allocation6 + $0xf0] sm:$0xf0] }
  0x4d   :  { %v3695_v16 = vld [vmem:[#allocation6 + $0x580] sm:$0xf]  ;;  %v4543_v19 = vld [vmem:[#allocation6 + $0x58c] sm:$0xf0]  ;;  %v3568_v24 = vor.u32 %v4511_v15, %v3567_v14  ;;  %1791 = vmatpush.bf16.msrb.mxu2 %v3840_v13  ;;  %v4425_v13 = vld [vmem:[#allocation6 + $0x1e4] sm:$0xf] }
  0x4e   :  { %v3823_v20 = vld [vmem:[#allocation6 + $0x680] sm:$0xf]  ;;  %v4575_v21 = vld [vmem:[#allocation6 + $0x68c] sm:$0xf0]  ;;  %v3696_v25 = vor.u32 %v4543_v19, %v3695_v16  ;;  %1805 = vmatpush.bf16.msrb.mxu3 %v3968_v18  ;;  %v3233_v14 = vld [vmem:[#allocation6 + $0x1f0] sm:$0xf0] }
  0x4f   :  { %v3951_v22 = vld [vmem:[#allocation6 + $0x780] sm:$0xf]  ;;  %v4607_v23 = vld [vmem:[#allocation6 + $0x78c] sm:$0xf0]  ;;  %v3824_v26 = vor.u32 %v4575_v21, %v3823_v20  ;;  %1764 = vmatpush.bf16.msrb.mxu0 %v3568_v24  ;;  %v4457_v15 = vld [vmem:[#allocation6 + $0x2e4] sm:$0xf] }
  0x50   :  { %v3551_v27 = vld [vmem:[#allocation6 + $0x460] sm:$0xf]  ;;  %v4507_v28 = vld [vmem:[#allocation6 + $0x46c] sm:$0xf0]  ;;  %v3952_v30 = vor.u32 %v4607_v23, %v3951_v22  ;;  %1778 = vmatpush.bf16.msrb.mxu1 %v3696_v25  ;;  %v3361_v16 = vld [vmem:[#allocation6 + $0x2f0] sm:$0xf0] }
  0x51   :  { %v3679_v29 = vld [vmem:[#allocation6 + $0x560] sm:$0xf]  ;;  %v4539_v31 = vld [vmem:[#allocation6 + $0x56c] sm:$0xf0]  ;;  %v3552_v36 = vor.u32 %v4507_v28, %v3551_v27  ;;  %1792 = vmatpush.bf16.msrb.mxu2 %v3824_v26  ;;  %v4489_v18 = vld [vmem:[#allocation6 + $0x3e4] sm:$0xf] }
  0x52   :  { %v3807_v32 = vld [vmem:[#allocation6 + $0x660] sm:$0xf]  ;;  %v4571_v33 = vld [vmem:[#allocation6 + $0x66c] sm:$0xf0]  ;;  %v3680_v37 = vor.u32 %v4539_v31, %v3679_v29  ;;  %1806 = vmatpush.bf16.msrb.mxu3 %v3952_v30  ;;  %v3489_v20 = vld [vmem:[#allocation6 + $0x3f0] sm:$0xf0]  ;;  %v3108_v29 = vor.u32 %v4393_v9, %v3105_v12 }
  0x53   :  { %v3935_v34 = vld [vmem:[#allocation6 + $0x760] sm:$0xf]  ;;  %v4603_v35 = vld [vmem:[#allocation6 + $0x76c] sm:$0xf0]  ;;  %v3808_v38 = vor.u32 %v4571_v33, %v3807_v32  ;;  %1765 = vmatpush.bf16.msrb.mxu0 %v3552_v36  ;;  %v150_v27 = vld [vmem:[#allocation3 + $0x28] sm:$0xff]  ;;  %v3236_v33 = vor.u32 %v4425_v13, %v3233_v14 }
  0x54   :  { %v3535_v39 = vld [vmem:[#allocation6 + $0x440] sm:$0xf]  ;;  %v4503_v40 = vld [vmem:[#allocation6 + $0x44c] sm:$0xf0]  ;;  %v3936_v42 = vor.u32 %v4603_v35, %v3935_v34  ;;  %1779 = vmatpush.bf16.msrb.mxu1 %v3680_v37  ;;  %v158_v30 = vld [vmem:[#allocation3 + $0x68] sm:$0xff]  ;;  %v3364_v34 = vor.u32 %v4457_v15, %v3361_v16 }
  0x55   :  { %v3663_v41 = vld [vmem:[#allocation6 + $0x540] sm:$0xf]  ;;  %v4535_v43 = vld [vmem:[#allocation6 + $0x54c] sm:$0xf0]  ;;  %v3536_v48 = vor.u32 %v4503_v40, %v3535_v39  ;;  %1793 = vmatpush.bf16.msrb.mxu2 %v3808_v38  ;;  %v152_v31 = vld [vmem:[#allocation3 + $0x38] sm:$0xff]  ;;  %v3492_v38 = vor.u32 %v4489_v18, %v3489_v20 }
  0x56   :  { %v3791_v44 = vld [vmem:[#allocation6 + $0x640] sm:$0xf]  ;;  %v4567_v45 = vld [vmem:[#allocation6 + $0x64c] sm:$0xf0]  ;;  %v3664_v50 = vor.u32 %v4535_v43, %v3663_v41  ;;  %1807 = vmatpush.bf16.msrb.mxu3 %v3936_v42  ;;  %v160_v32 = vld [vmem:[#allocation3 + $0x78] sm:$0xff] }
  0x57   :  { %v3919_v46 = vld [vmem:[#allocation6 + $0x740] sm:$0xf]  ;;  %v4599_v47 = vld [vmem:[#allocation6 + $0x74c] sm:$0xf0]  ;;  %v3792_v51 = vor.u32 %v4567_v45, %v3791_v44  ;;  %1766 = vmatpush.bf16.msrb.mxu0 %v3536_v48  ;;  %v4389_v35 = vld [vmem:[#allocation6 + $0xc4] sm:$0xf]  ;;  %v5013_v44 = vpack.c.bf16 %v158_v30, %v150_v27 }
  0x58   :  { %v3519_v49 = vld [vmem:[#allocation6 + $0x420] sm:$0xf]  ;;  %v4499_v52 = vld [vmem:[#allocation6 + $0x42c] sm:$0xf0]  ;;  %v3920_v55 = vor.u32 %v4599_v47, %v3919_v46  ;;  %1780 = vmatpush.bf16.msrb.mxu1 %v3664_v50  ;;  %v3089_v36 = vld [vmem:[#allocation6 + $0xd0] sm:$0xf0]  ;;  %v5015_v47 = vpack.c.bf16 %v160_v32, %v152_v31 }
  0x59   :  { %v3647_v53 = vld [vmem:[#allocation6 + $0x520] sm:$0xf]  ;;  %v4531_v54 = vld [vmem:[#allocation6 + $0x52c] sm:$0xf0]  ;;  %v3520_v63 = vor.u32 %v4499_v52, %v3519_v49  ;;  %1794 = vmatpush.bf16.msrb.mxu2 %v3792_v51  ;;  %v4421_v37 = vld [vmem:[#allocation6 + $0x1c4] sm:$0xf]  ;;  %v3092_v48 = vor.u32 %v4389_v35, %v3089_v36 }
  0x5a   :  { %v3775_v56 = vld [vmem:[#allocation6 + $0x620] sm:$0xf]  ;;  %v4563_v57 = vld [vmem:[#allocation6 + $0x62c] sm:$0xf0]  ;;  %v3648_v5 = vor.u32 %v4531_v54, %v3647_v53  ;;  %1808 = vmatpush.bf16.msrb.mxu3 %v3920_v55  ;;  %v3217_v40 = vld [vmem:[#allocation6 + $0x1d0] sm:$0xf0] }
  0x5b   :  { %v3903_v59 = vld [vmem:[#allocation6 + $0x720] sm:$0xf]  ;;  %v4595_v60 = vld [vmem:[#allocation6 + $0x72c] sm:$0xf0]  ;;  %v3776_v6 = vor.u32 %v4563_v57, %v3775_v56  ;;  %1767 = vmatpush.bf16.msrb.mxu0 %v3520_v63  ;;  %v4453_v41 = vld [vmem:[#allocation6 + $0x2c4] sm:$0xf]  ;;  %v3220_v49 = vor.u32 %v4421_v37, %v3217_v40 }
  0x5c   :  { %v3503_v61 = vld [vmem:[#allocation6 + $0x400] sm:$0xf]  ;;  %v4495_v62 = vld [vmem:[#allocation6 + $0x40c] sm:$0xf0]  ;;  %v3904_v11 = vor.u32 %v4595_v60, %v3903_v59  ;;  %1781 = vmatpush.bf16.msrb.mxu1 %v3648_v5  ;;  %v3345_v42 = vld [vmem:[#allocation6 + $0x2d0] sm:$0xf0] }
  0x5d   :  { %v3631_v0 = vld [vmem:[#allocation6 + $0x500] sm:$0xf]  ;;  %v4527_v2 = vld [vmem:[#allocation6 + $0x50c] sm:$0xf0]  ;;  %v3504_v19 = vor.u32 %v4495_v62, %v3503_v61  ;;  %1795 = vmatpush.bf16.msrb.mxu2 %v3776_v6  ;;  %v4485_v45 = vld [vmem:[#allocation6 + $0x3c4] sm:$0xf]  ;;  %v3348_v50 = vor.u32 %v4453_v41, %v3345_v42 }
  0x5e   :  { %v3759_v3 = vld [vmem:[#allocation6 + $0x600] sm:$0xf]  ;;  %v4559_v4 = vld [vmem:[#allocation6 + $0x60c] sm:$0xf0]  ;;  %v3632_v23 = vor.u32 %v4527_v2, %v3631_v0  ;;  %1809 = vmatpush.bf16.msrb.mxu3 %v3904_v11  ;;  %v3473_v46 = vld [vmem:[#allocation6 + $0x3d0] sm:$0xf0] }
  0x5f   :  { %v3887_v7 = vld [vmem:[#allocation6 + $0x700] sm:$0xf]  ;;  %v4591_v8 = vld [vmem:[#allocation6 + $0x70c] sm:$0xf0]  ;;  %v3760_v24 = vor.u32 %v4559_v4, %v3759_v3  ;;  %1768 = vmatpush.bf16.msrb.mxu0 %v3504_v19  ;;  %v4385_v51 = vld [vmem:[#allocation6 + $0xa4] sm:$0xf]  ;;  %v3476_v54 = vor.u32 %v4485_v45, %v3473_v46 }
  0x60   :  { %v149_v21 = vld [vmem:[#allocation3 + $0x20] sm:$0xff]  ;;  %v151_v25 = vld [vmem:[#allocation3 + $0x30] sm:$0xff]  ;;  %v3888_v28 = vor.u32 %v4591_v8, %v3887_v7  ;;  %1782 = vmatpush.bf16.msrb.mxu1 %v3632_v23 }
  0x61   :  { %v157_v22 = vld [vmem:[#allocation3 + $0x60] sm:$0xff]  ;;  %v159_v26 = vld [vmem:[#allocation3 + $0x70] sm:$0xff]  ;;  %1796 = vmatpush.bf16.msrb.mxu2 %v3760_v24 }
  0x62   :  { %v5009_v39 = vpack.c.bf16 %v157_v22, %v149_v21  ;;  %v5011_v43 = vpack.c.bf16 %v159_v26, %v151_v25  ;;  %1810 = vmatpush.bf16.msrb.mxu3 %v3888_v28  ;;  %v3073_v52 = vld [vmem:[#allocation6 + $0xb0] sm:$0xf0]  ;;  %v4417_v53 = vld [vmem:[#allocation6 + $0x1a4] sm:$0xf] }
  0x63   :  { %1817 = vmatpush.bf16.msra.mxu0 %v3108_v29  ;;  %v3201_v55 = vld [vmem:[#allocation6 + $0x1b0] sm:$0xf0]  ;;  %v4449_v56 = vld [vmem:[#allocation6 + $0x2a4] sm:$0xf]  ;;  %1783 = vmatmul.bf16.vlgmr.msrb.gmra.mxu1 %v5013_v44  ;;  %v3076_v61 = vor.u32 %v4385_v51, %v3073_v52 }
  0x64   :  { %1831 = vmatpush.bf16.msra.mxu1 %v3236_v33  ;;  %1769 = vmatmul.bf16.vlgmr.msrb.gmra.mxu0 %v5009_v39  ;;  %v3329_v57 = vld [vmem:[#allocation6 + $0x2b0] sm:$0xf0]  ;;  %v4481_v59 = vld [vmem:[#allocation6 + $0x3a4] sm:$0xf]  ;;  %v3204_v62 = vor.u32 %v4417_v53, %v3201_v55 }
  0x65   :  { %1845 = vmatpush.bf16.msra.mxu2 %v3364_v34  ;;  %v3457_v60 = vld [vmem:[#allocation6 + $0x3b0] sm:$0xf0]  ;;  %1811 = vmatmul.bf16.vlgmr.msrb.gmra.mxu3 %v5015_v47  ;;  %v3332_v63 = vor.u32 %v4449_v56, %v3329_v57  ;;  %v4381_v0 = vld [vmem:[#allocation6 + $0x84] sm:$0xf] }
  0x66   :  { %1859 = vmatpush.bf16.msra.mxu3 %v3492_v38  ;;  %1797 = vmatmul.bf16.vlgmr.msrb.gmra.mxu2 %v5011_v43  ;;  %v3057_v2 = vld [vmem:[#allocation6 + $0x90] sm:$0xf0]  ;;  %v4413_v3 = vld [vmem:[#allocation6 + $0x184] sm:$0xf]  ;;  %v3460_v4 = vor.u32 %v4481_v59, %v3457_v60 }
  0x67   :  { %1818 = vmatpush.bf16.msra.mxu0 %v3092_v48  ;;  %v3185_v5 = vld [vmem:[#allocation6 + $0x190] sm:$0xf0]  ;;  %v4445_v6 = vld [vmem:[#allocation6 + $0x284] sm:$0xf]  ;;  %v3060_v11 = vor.u32 %v4381_v0, %v3057_v2 }
  0x68   :  { %1832 = vmatpush.bf16.msra.mxu1 %v3220_v49  ;;  %v3313_v7 = vld [vmem:[#allocation6 + $0x290] sm:$0xf0]  ;;  %v4477_v8 = vld [vmem:[#allocation6 + $0x384] sm:$0xf]  ;;  %v3188_v12 = vor.u32 %v4413_v3, %v3185_v5 }
  0x69   :  { %1846 = vmatpush.bf16.msra.mxu2 %v3348_v50  ;;  %v3441_v9 = vld [vmem:[#allocation6 + $0x390] sm:$0xf0]  ;;  %v3316_v13 = vor.u32 %v4445_v6, %v3313_v7  ;;  %v4377_v14 = vld [vmem:[#allocation6 + $0x64] sm:$0xf] }
  0x6a   :  { %1860 = vmatpush.bf16.msra.mxu3 %v3476_v54  ;;  %v3041_v15 = vld [vmem:[#allocation6 + $0x70] sm:$0xf0]  ;;  %v4409_v16 = vld [vmem:[#allocation6 + $0x164] sm:$0xf]  ;;  %v3444_v18 = vor.u32 %v4477_v8, %v3441_v9 }
  0x6b   :  { %1819 = vmatpush.bf16.msra.mxu0 %v3076_v61  ;;  %v3169_v19 = vld [vmem:[#allocation6 + $0x170] sm:$0xf0]  ;;  %v4441_v20 = vld [vmem:[#allocation6 + $0x264] sm:$0xf]  ;;  %v3044_v24 = vor.u32 %v4377_v14, %v3041_v15 }
  0x6c   :  { %1833 = vmatpush.bf16.msra.mxu1 %v3204_v62  ;;  %v3297_v21 = vld [vmem:[#allocation6 + $0x270] sm:$0xf0]  ;;  %v4473_v22 = vld [vmem:[#allocation6 + $0x364] sm:$0xf]  ;;  %v3172_v25 = vor.u32 %v4409_v16, %v3169_v19 }
  0x6d   :  { %1847 = vmatpush.bf16.msra.mxu2 %v3332_v63  ;;  %v3425_v23 = vld [vmem:[#allocation6 + $0x370] sm:$0xf0]  ;;  %v3300_v26 = vor.u32 %v4441_v20, %v3297_v21  ;;  %v4373_v27 = vld [vmem:[#allocation6 + $0x44] sm:$0xf] }
  0x6e   :  { %1861 = vmatpush.bf16.msra.mxu3 %v3460_v4  ;;  %v3025_v28 = vld [vmem:[#allocation6 + $0x50] sm:$0xf0]  ;;  %v4405_v29 = vld [vmem:[#allocation6 + $0x144] sm:$0xf]  ;;  %v3428_v30 = vor.u32 %v4473_v22, %v3425_v23 }
  0x6f   :  { %1820 = vmatpush.bf16.msra.mxu0 %v3060_v11  ;;  %v3153_v31 = vld [vmem:[#allocation6 + $0x150] sm:$0xf0]  ;;  %v4437_v32 = vld [vmem:[#allocation6 + $0x244] sm:$0xf]  ;;  %v3028_v36 = vor.u32 %v4373_v27, %v3025_v28 }
  0x70   :  { %1834 = vmatpush.bf16.msra.mxu1 %v3188_v12  ;;  %v3281_v33 = vld [vmem:[#allocation6 + $0x250] sm:$0xf0]  ;;  %v4469_v34 = vld [vmem:[#allocation6 + $0x344] sm:$0xf]  ;;  %v3156_v37 = vor.u32 %v4405_v29, %v3153_v31 }
  0x71   :  { %1848 = vmatpush.bf16.msra.mxu2 %v3316_v13  ;;  %v3409_v35 = vld [vmem:[#allocation6 + $0x350] sm:$0xf0]  ;;  %v3284_v38 = vor.u32 %v4437_v32, %v3281_v33  ;;  %v4369_v40 = vld [vmem:[#allocation6 + $0x24] sm:$0xf] }
  0x72   :  { %1862 = vmatpush.bf16.msra.mxu3 %v3444_v18  ;;  %v3009_v41 = vld [vmem:[#allocation6 + $0x30] sm:$0xf0]  ;;  %v4401_v42 = vld [vmem:[#allocation6 + $0x124] sm:$0xf]  ;;  %v3412_v45 = vor.u32 %v4469_v34, %v3409_v35 }
  0x73   :  { %1821 = vmatpush.bf16.msra.mxu0 %v3044_v24  ;;  %v3137_v46 = vld [vmem:[#allocation6 + $0x130] sm:$0xf0]  ;;  %v4433_v48 = vld [vmem:[#allocation6 + $0x224] sm:$0xf]  ;;  %v3012_v52 = vor.u32 %v4369_v40, %v3009_v41 }
  0x74   :  { %1835 = vmatpush.bf16.msra.mxu1 %v3172_v25  ;;  %v3265_v49 = vld [vmem:[#allocation6 + $0x230] sm:$0xf0]  ;;  %v4465_v50 = vld [vmem:[#allocation6 + $0x324] sm:$0xf]  ;;  %v3140_v55 = vor.u32 %v4401_v42, %v3137_v46 }
  0x75   :  { %1849 = vmatpush.bf16.msra.mxu2 %v3300_v26  ;;  %v3393_v51 = vld [vmem:[#allocation6 + $0x330] sm:$0xf0]  ;;  %v4365_v53 = vld [vmem:[#allocation6 + $0x4] sm:$0xf]  ;;  %v3268_v56 = vor.u32 %v4433_v48, %v3265_v49 }
  0x76   :  { %1863 = vmatpush.bf16.msra.mxu3 %v3428_v30  ;;  %v2993_v54 = vld [vmem:[#allocation6 + $0x10] sm:$0xf0]  ;;  %v4397_v57 = vld [vmem:[#allocation6 + $0x104] sm:$0xf]  ;;  %v3396_v61 = vor.u32 %v4465_v50, %v3393_v51 }
  0x77   :  { %1822 = vmatpush.bf16.msra.mxu0 %v3028_v36  ;;  %v3121_v59 = vld [vmem:[#allocation6 + $0x110] sm:$0xf0]  ;;  %v4429_v60 = vld [vmem:[#allocation6 + $0x204] sm:$0xf]  ;;  %v2996_v5 = vor.u32 %v4365_v53, %v2993_v54 }
  0x78   :  { %1836 = vmatpush.bf16.msra.mxu1 %v3156_v37  ;;  %v3249_v62 = vld [vmem:[#allocation6 + $0x210] sm:$0xf0]  ;;  %v4461_v63 = vld [vmem:[#allocation6 + $0x304] sm:$0xf]  ;;  %v3124_v9 = vor.u32 %v4397_v57, %v3121_v59 }
  0x79   :  { %1850 = vmatpush.bf16.msra.mxu2 %v3284_v38  ;;  %v3377_v0 = vld [vmem:[#allocation6 + $0x310] sm:$0xf0]  ;;  %v4521_v2 = vld [vmem:[#allocation6 + $0x4e4] sm:$0xf]  ;;  %v3252_v11 = vor.u32 %v4429_v60, %v3249_v62 }
  0x7a   :  { %1864 = vmatpush.bf16.msra.mxu3 %v3412_v45  ;;  %v3617_v3 = vld [vmem:[#allocation6 + $0x4f0] sm:$0xf0]  ;;  %v4553_v4 = vld [vmem:[#allocation6 + $0x5e4] sm:$0xf]  ;;  %v3380_v14 = vor.u32 %v4461_v63, %v3377_v0 }
  0x7b   :  { %1823 = vmatpush.bf16.msra.mxu0 %v3012_v52  ;;  %v3745_v6 = vld [vmem:[#allocation6 + $0x5f0] sm:$0xf0]  ;;  %v4585_v7 = vld [vmem:[#allocation6 + $0x6e4] sm:$0xf]  ;;  %v3620_v15 = vor.u32 %v4521_v2, %v3617_v3 }
  0x7c   :  { %v3873_v8 = vld [vmem:[#allocation6 + $0x6f0] sm:$0xf0]  ;;  %1837 = vmatpush.bf16.msra.mxu1 %v3140_v55  ;;  %v4617_v12 = vld [vmem:[#allocation6 + $0x7e4] sm:$0xf]  ;;  %v3748_v16 = vor.u32 %v4553_v4, %v3745_v6 }
  0x7d   :  { %1851 = vmatpush.bf16.msra.mxu2 %v3268_v56  ;;  %v4001_v13 = vld [vmem:[#allocation6 + $0x7f0] sm:$0xf0]  ;;  %v3876_v18 = vor.u32 %v4585_v7, %v3873_v8  ;;  %v4517_v19 = vld [vmem:[#allocation6 + $0x4c4] sm:$0xf] }
  0x7e   :  { %1865 = vmatpush.bf16.msra.mxu3 %v3396_v61  ;;  %v3601_v20 = vld [vmem:[#allocation6 + $0x4d0] sm:$0xf0]  ;;  %v4549_v21 = vld [vmem:[#allocation6 + $0x5c4] sm:$0xf]  ;;  %v4004_v22 = vor.u32 %v4617_v12, %v4001_v13 }
  0x7f   :  { %1824 = vmatpush.bf16.msra.mxu0 %v2996_v5  ;;  %v3729_v23 = vld [vmem:[#allocation6 + $0x5d0] sm:$0xf0]  ;;  %v4581_v24 = vld [vmem:[#allocation6 + $0x6c4] sm:$0xf]  ;;  %v3604_v28 = vor.u32 %v4517_v19, %v3601_v20 }
  0x80   :  { %v3857_v25 = vld [vmem:[#allocation6 + $0x6d0] sm:$0xf0]  ;;  %1838 = vmatpush.bf16.msra.mxu1 %v3124_v9  ;;  %v4613_v26 = vld [vmem:[#allocation6 + $0x7c4] sm:$0xf]  ;;  %v3732_v29 = vor.u32 %v4549_v21, %v3729_v23 }
  0x81   :  { %1852 = vmatpush.bf16.msra.mxu2 %v3252_v11  ;;  %v3985_v27 = vld [vmem:[#allocation6 + $0x7d0] sm:$0xf0]  ;;  %v3860_v30 = vor.u32 %v4581_v24, %v3857_v25  ;;  %v4513_v31 = vld [vmem:[#allocation6 + $0x4a4] sm:$0xf] }
  0x82   :  { %1866 = vmatpush.bf16.msra.mxu3 %v3380_v14  ;;  %v3585_v32 = vld [vmem:[#allocation6 + $0x4b0] sm:$0xf0]  ;;  %v4545_v33 = vld [vmem:[#allocation6 + $0x5a4] sm:$0xf]  ;;  %v3988_v34 = vor.u32 %v4613_v26, %v3985_v27  ;;  %1825 = vmatmul.bf16.vlgmr.msra.gmra.mxu0 %v4997_v58 }
  0x83   :  { %1873 = vmatpush.bf16.msrb.mxu0 %v3620_v15  ;;  %v3713_v35 = vld [vmem:[#allocation6 + $0x5b0] sm:$0xf0]  ;;  %v4577_v36 = vld [vmem:[#allocation6 + $0x6a4] sm:$0xf]  ;;  %1839 = vmatmul.bf16.vlgmr.msra.gmra.mxu1 %v5003_v10  ;;  %v3588_v41 = vor.u32 %v4513_v31, %v3585_v32 }
  0x84   :  { %1887 = vmatpush.bf16.msrb.mxu1 %v3748_v16  ;;  %v3841_v37 = vld [vmem:[#allocation6 + $0x6b0] sm:$0xf0]  ;;  %v4609_v38 = vld [vmem:[#allocation6 + $0x7a4] sm:$0xf]  ;;  %1853 = vmatmul.bf16.vlgmr.msra.gmra.mxu2 %v4999_v1  ;;  %v3716_v42 = vor.u32 %v4545_v33, %v3713_v35 }
  0x85   :  { %1901 = vmatpush.bf16.msrb.mxu2 %v3876_v18  ;;  %v3969_v40 = vld [vmem:[#allocation6 + $0x7b0] sm:$0xf0]  ;;  %1867 = vmatmul.bf16.vlgmr.msra.gmra.mxu3 %v5005_v17  ;;  %v3844_v45 = vor.u32 %v4577_v36, %v3841_v37  ;;  %v4509_v46 = vld [vmem:[#allocation6 + $0x484] sm:$0xf] }
  0x86   :  { %1915 = vmatpush.bf16.msrb.mxu3 %v4004_v22  ;;  %v3569_v48 = vld [vmem:[#allocation6 + $0x490] sm:$0xf0]  ;;  %v4541_v49 = vld [vmem:[#allocation6 + $0x584] sm:$0xf]  ;;  %v3972_v50 = vor.u32 %v4609_v38, %v3969_v40 }
  0x87   :  { %1874 = vmatpush.bf16.msrb.mxu0 %v3604_v28  ;;  %v3697_v51 = vld [vmem:[#allocation6 + $0x590] sm:$0xf0]  ;;  %v4573_v52 = vld [vmem:[#allocation6 + $0x684] sm:$0xf]  ;;  %v3572_v56 = vor.u32 %v4509_v46, %v3569_v48  ;;  %v3111_v48 = vld [vmem:[#allocation6 + $0xe8] sm:$0xf] }
  0x88   :  { %1888 = vmatpush.bf16.msrb.mxu1 %v3732_v29  ;;  %v3825_v53 = vld [vmem:[#allocation6 + $0x690] sm:$0xf0]  ;;  %v4605_v54 = vld [vmem:[#allocation6 + $0x784] sm:$0xf]  ;;  %v3700_v57 = vor.u32 %v4541_v49, %v3697_v51  ;;  %v4396_v49 = vld [vmem:[#allocation6 + $0xf4] sm:$0xf0] }
  0x89   :  { %1902 = vmatpush.bf16.msrb.mxu2 %v3860_v30  ;;  %v3953_v55 = vld [vmem:[#allocation6 + $0x790] sm:$0xf0]  ;;  %v3828_v59 = vor.u32 %v4573_v52, %v3825_v53  ;;  %v4505_v60 = vld [vmem:[#allocation6 + $0x464] sm:$0xf]  ;;  %v4428_v52 = vld [vmem:[#allocation6 + $0x1f4] sm:$0xf0] }
  0x8a   :  { %1916 = vmatpush.bf16.msrb.mxu3 %v3988_v34  ;;  %v3553_v61 = vld [vmem:[#allocation6 + $0x470] sm:$0xf0]  ;;  %v4537_v62 = vld [vmem:[#allocation6 + $0x564] sm:$0xf]  ;;  %v3956_v63 = vor.u32 %v4605_v54, %v3953_v55  ;;  %v3367_v53 = vld [vmem:[#allocation6 + $0x2e8] sm:$0xf] }
  0x8b   :  { %1875 = vmatpush.bf16.msrb.mxu0 %v3588_v41  ;;  %v3681_v0 = vld [vmem:[#allocation6 + $0x570] sm:$0xf0]  ;;  %v4569_v2 = vld [vmem:[#allocation6 + $0x664] sm:$0xf]  ;;  %v3556_v6 = vor.u32 %v4505_v60, %v3553_v61  ;;  %v4460_v54 = vld [vmem:[#allocation6 + $0x2f4] sm:$0xf0]  ;;  %v3112_v61 = vor.u32 %v4396_v49, %v3111_v48 }
  0x8c   :  { %1889 = vmatpush.bf16.msrb.mxu1 %v3716_v42  ;;  %v3809_v3 = vld [vmem:[#allocation6 + $0x670] sm:$0xf0]  ;;  %v4601_v4 = vld [vmem:[#allocation6 + $0x764] sm:$0xf]  ;;  %v3684_v7 = vor.u32 %v4537_v62, %v3681_v0  ;;  %v3095_v0 = vld [vmem:[#allocation6 + $0xc8] sm:$0xf] }
  0x8d   :  { %1903 = vmatpush.bf16.msrb.mxu2 %v3844_v45  ;;  %v3937_v5 = vld [vmem:[#allocation6 + $0x770] sm:$0xf0]  ;;  %v3812_v8 = vor.u32 %v4569_v2, %v3809_v3  ;;  %v4501_v9 = vld [vmem:[#allocation6 + $0x444] sm:$0xf]  ;;  %v4392_v2 = vld [vmem:[#allocation6 + $0xd4] sm:$0xf0] }
  0x8e   :  { %1917 = vmatpush.bf16.msrb.mxu3 %v3972_v50  ;;  %v3537_v11 = vld [vmem:[#allocation6 + $0x450] sm:$0xf0]  ;;  %v4533_v12 = vld [vmem:[#allocation6 + $0x544] sm:$0xf]  ;;  %v3940_v13 = vor.u32 %v4601_v4, %v3937_v5  ;;  %v3239_v50 = vld [vmem:[#allocation6 + $0x1e8] sm:$0xf] }
  0x8f   :  { %1876 = vmatpush.bf16.msrb.mxu0 %v3572_v56  ;;  %v3665_v14 = vld [vmem:[#allocation6 + $0x550] sm:$0xf0]  ;;  %v4565_v15 = vld [vmem:[#allocation6 + $0x644] sm:$0xf]  ;;  %v3540_v20 = vor.u32 %v4501_v9, %v3537_v11  ;;  %v3240_v62 = vor.u32 %v4428_v52, %v3239_v50  ;;  %v3223_v3 = vld [vmem:[#allocation6 + $0x1c8] sm:$0xf]  ;;  %v3096_v11 = vor.u32 %v4392_v2, %v3095_v0 }
  0x90   :  { %1890 = vmatpush.bf16.msrb.mxu1 %v3700_v57  ;;  %v3793_v16 = vld [vmem:[#allocation6 + $0x650] sm:$0xf0]  ;;  %v4597_v18 = vld [vmem:[#allocation6 + $0x744] sm:$0xf]  ;;  %v3668_v21 = vor.u32 %v4533_v12, %v3665_v14  ;;  %v3495_v57 = vld [vmem:[#allocation6 + $0x3e8] sm:$0xf] }
  0x91   :  { %1904 = vmatpush.bf16.msrb.mxu2 %v3828_v59  ;;  %v3921_v19 = vld [vmem:[#allocation6 + $0x750] sm:$0xf0]  ;;  %v3796_v22 = vor.u32 %v4565_v15, %v3793_v16  ;;  %v4497_v23 = vld [vmem:[#allocation6 + $0x424] sm:$0xf]  ;;  %v4492_v59 = vld [vmem:[#allocation6 + $0x3f4] sm:$0xf0] }
  0x92   :  { %1918 = vmatpush.bf16.msrb.mxu3 %v3956_v63  ;;  %v3521_v24 = vld [vmem:[#allocation6 + $0x430] sm:$0xf0]  ;;  %v4529_v25 = vld [vmem:[#allocation6 + $0x524] sm:$0xf]  ;;  %v3924_v26 = vor.u32 %v4597_v18, %v3921_v19  ;;  %v3368_v63 = vor.u32 %v4460_v54, %v3367_v53  ;;  %v3496_v4 = vor.u32 %v4492_v59, %v3495_v57  ;;  %v4424_v5 = vld [vmem:[#allocation6 + $0x1d4] sm:$0xf0] }
  0x93   :  { %1877 = vmatpush.bf16.msrb.mxu0 %v3556_v6  ;;  %v3649_v27 = vld [vmem:[#allocation6 + $0x530] sm:$0xf0]  ;;  %v4561_v28 = vld [vmem:[#allocation6 + $0x624] sm:$0xf]  ;;  %v3524_v32 = vor.u32 %v4497_v23, %v3521_v24  ;;  %v3351_v6 = vld [vmem:[#allocation6 + $0x2c8] sm:$0xf]  ;;  %v3224_v12 = vor.u32 %v4424_v5, %v3223_v3 }
  0x94   :  { %1891 = vmatpush.bf16.msrb.mxu1 %v3684_v7  ;;  %v3777_v29 = vld [vmem:[#allocation6 + $0x630] sm:$0xf0]  ;;  %v4593_v30 = vld [vmem:[#allocation6 + $0x724] sm:$0xf]  ;;  %v3652_v35 = vor.u32 %v4529_v25, %v3649_v27  ;;  %v4456_v7 = vld [vmem:[#allocation6 + $0x2d4] sm:$0xf0] }
  0x95   :  { %1905 = vmatpush.bf16.msrb.mxu2 %v3812_v8  ;;  %v3905_v31 = vld [vmem:[#allocation6 + $0x730] sm:$0xf0]  ;;  %v4493_v33 = vld [vmem:[#allocation6 + $0x404] sm:$0xf]  ;;  %v3780_v36 = vor.u32 %v4561_v28, %v3777_v29  ;;  %v3479_v8 = vld [vmem:[#allocation6 + $0x3c8] sm:$0xf] }
  0x96   :  { %1919 = vmatpush.bf16.msrb.mxu3 %v3940_v13  ;;  %v3505_v34 = vld [vmem:[#allocation6 + $0x410] sm:$0xf0]  ;;  %v4525_v37 = vld [vmem:[#allocation6 + $0x504] sm:$0xf]  ;;  %v3908_v41 = vor.u32 %v4593_v30, %v3905_v31  ;;  %v4488_v9 = vld [vmem:[#allocation6 + $0x3d4] sm:$0xf0]  ;;  %v3352_v13 = vor.u32 %v4456_v7, %v3351_v6 }
  0x97   :  { %1878 = vmatpush.bf16.msrb.mxu0 %v3540_v20  ;;  %v3633_v38 = vld [vmem:[#allocation6 + $0x510] sm:$0xf0]  ;;  %v4557_v40 = vld [vmem:[#allocation6 + $0x604] sm:$0xf]  ;;  %v3508_v51 = vor.u32 %v4493_v33, %v3505_v34  ;;  %v3079_v14 = vld [vmem:[#allocation6 + $0xa8] sm:$0xf]  ;;  %v3480_v18 = vor.u32 %v4488_v9, %v3479_v8 }
  0x98   :  { %1892 = vmatpush.bf16.msrb.mxu1 %v3668_v21  ;;  %v3761_v42 = vld [vmem:[#allocation6 + $0x610] sm:$0xf0]  ;;  %v4589_v45 = vld [vmem:[#allocation6 + $0x704] sm:$0xf]  ;;  %v3636_v55 = vor.u32 %v4525_v37, %v3633_v38  ;;  %v4388_v15 = vld [vmem:[#allocation6 + $0xb4] sm:$0xf0] }
  0x99   :  { %1906 = vmatpush.bf16.msrb.mxu2 %v3796_v22  ;;  %v3889_v46 = vld [vmem:[#allocation6 + $0x710] sm:$0xf0]  ;;  %v3764_v56 = vor.u32 %v4557_v40, %v3761_v42  ;;  %v3207_v16 = vld [vmem:[#allocation6 + $0x1a8] sm:$0xf]  ;;  %v4420_v19 = vld [vmem:[#allocation6 + $0x1b4] sm:$0xf0]  ;;  %v3080_v24 = vor.u32 %v4388_v15, %v3079_v14 }
  0x9a   :  { %1920 = vmatpush.bf16.msrb.mxu3 %v3924_v26  ;;  %v3892_v60 = vor.u32 %v4589_v45, %v3889_v46  ;;  %v3335_v20 = vld [vmem:[#allocation6 + $0x2a8] sm:$0xf]  ;;  %v4452_v21 = vld [vmem:[#allocation6 + $0x2b4] sm:$0xf0]  ;;  %v3208_v25 = vor.u32 %v4420_v19, %v3207_v16 }
  0x9b   :  { %1879 = vmatpush.bf16.msrb.mxu0 %v3524_v32  ;;  %v3463_v22 = vld [vmem:[#allocation6 + $0x3a8] sm:$0xf]  ;;  %v4484_v23 = vld [vmem:[#allocation6 + $0x3b4] sm:$0xf0]  ;;  %v3336_v26 = vor.u32 %v4452_v21, %v3335_v20 }
  0x9c   :  { %1893 = vmatpush.bf16.msrb.mxu1 %v3652_v35  ;;  %v3063_v27 = vld [vmem:[#allocation6 + $0x88] sm:$0xf]  ;;  %v4384_v28 = vld [vmem:[#allocation6 + $0x94] sm:$0xf0]  ;;  %v3464_v30 = vor.u32 %v4484_v23, %v3463_v22 }
  0x9d   :  { %1907 = vmatpush.bf16.msrb.mxu2 %v3780_v36  ;;  %v3191_v29 = vld [vmem:[#allocation6 + $0x188] sm:$0xf]  ;;  %v4416_v31 = vld [vmem:[#allocation6 + $0x194] sm:$0xf0]  ;;  %v3064_v36 = vor.u32 %v4384_v28, %v3063_v27 }
  0x9e   :  { %1921 = vmatpush.bf16.msrb.mxu3 %v3908_v41  ;;  %v3319_v32 = vld [vmem:[#allocation6 + $0x288] sm:$0xf]  ;;  %v4448_v33 = vld [vmem:[#allocation6 + $0x294] sm:$0xf0]  ;;  %v3192_v37 = vor.u32 %v4416_v31, %v3191_v29 }
  0x9f   :  { %1880 = vmatpush.bf16.msrb.mxu0 %v3508_v51  ;;  %v3447_v34 = vld [vmem:[#allocation6 + $0x388] sm:$0xf]  ;;  %v4480_v35 = vld [vmem:[#allocation6 + $0x394] sm:$0xf0]  ;;  %v3320_v38 = vor.u32 %v4448_v33, %v3319_v32 }
  0xa0   :  { %1894 = vmatpush.bf16.msrb.mxu1 %v3636_v55  ;;  %v3047_v40 = vld [vmem:[#allocation6 + $0x68] sm:$0xf]  ;;  %v4380_v41 = vld [vmem:[#allocation6 + $0x74] sm:$0xf0]  ;;  %v3448_v45 = vor.u32 %v4480_v35, %v3447_v34 }
  0xa1   :  { %1908 = vmatpush.bf16.msrb.mxu2 %v3764_v56  ;;  %v3175_v42 = vld [vmem:[#allocation6 + $0x168] sm:$0xf]  ;;  %v4412_v46 = vld [vmem:[#allocation6 + $0x174] sm:$0xf0]  ;;  %v3048_v52 = vor.u32 %v4380_v41, %v3047_v40 }
  0xa2   :  { %1922 = vmatpush.bf16.msrb.mxu3 %v3892_v60  ;;  %1881 = vmatmul.bf16.vlgmr.msrb.gmra.mxu0 %v5009_v39  ;;  %v3303_v48 = vld [vmem:[#allocation6 + $0x268] sm:$0xf]  ;;  %v4444_v49 = vld [vmem:[#allocation6 + $0x274] sm:$0xf0]  ;;  %v3176_v53 = vor.u32 %v4412_v46, %v3175_v42 }
  0xa3   :  { %1929 = vmatpush.bf16.msra.mxu0 %v3112_v61  ;;  %1895 = vmatmul.bf16.vlgmr.msrb.gmra.mxu1 %v5013_v44  ;;  %v3431_v50 = vld [vmem:[#allocation6 + $0x368] sm:$0xf]  ;;  %v4476_v51 = vld [vmem:[#allocation6 + $0x374] sm:$0xf0]  ;;  %v3304_v54 = vor.u32 %v4444_v49, %v3303_v48 }
  0xa4   :  { %1943 = vmatpush.bf16.msra.mxu1 %v3240_v62  ;;  %1909 = vmatmul.bf16.vlgmr.msrb.gmra.mxu2 %v5011_v43  ;;  %v3031_v55 = vld [vmem:[#allocation6 + $0x48] sm:$0xf]  ;;  %v4376_v56 = vld [vmem:[#allocation6 + $0x54] sm:$0xf0]  ;;  %v3432_v59 = vor.u32 %v4476_v51, %v3431_v50 }
  0xa5   :  { %1957 = vmatpush.bf16.msra.mxu2 %v3368_v63  ;;  %1923 = vmatmul.bf16.vlgmr.msrb.gmra.mxu3 %v5015_v47  ;;  %v3159_v57 = vld [vmem:[#allocation6 + $0x148] sm:$0xf]  ;;  %v4408_v60 = vld [vmem:[#allocation6 + $0x154] sm:$0xf0]  ;;  %v3032_v2 = vor.u32 %v4376_v56, %v3031_v55 }
  0xa6   :  { %1971 = vmatpush.bf16.msra.mxu3 %v3496_v4  ;;  %v3287_v61 = vld [vmem:[#allocation6 + $0x248] sm:$0xf]  ;;  %v4440_v62 = vld [vmem:[#allocation6 + $0x254] sm:$0xf0]  ;;  %v3160_v3 = vor.u32 %v4408_v60, %v3159_v57 }
  0xa7   :  { %1930 = vmatpush.bf16.msra.mxu0 %v3096_v11  ;;  %v3415_v63 = vld [vmem:[#allocation6 + $0x348] sm:$0xf]  ;;  %v4472_v0 = vld [vmem:[#allocation6 + $0x354] sm:$0xf0]  ;;  %v3288_v4 = vor.u32 %v4440_v62, %v3287_v61 }
  0xa8   :  { %1944 = vmatpush.bf16.msra.mxu1 %v3224_v12  ;;  %v3015_v5 = vld [vmem:[#allocation6 + $0x28] sm:$0xf]  ;;  %v4372_v6 = vld [vmem:[#allocation6 + $0x34] sm:$0xf0]  ;;  %v3416_v8 = vor.u32 %v4472_v0, %v3415_v63 }
  0xa9   :  { %1958 = vmatpush.bf16.msra.mxu2 %v3352_v13  ;;  %v3143_v7 = vld [vmem:[#allocation6 + $0x128] sm:$0xf]  ;;  %v4404_v9 = vld [vmem:[#allocation6 + $0x134] sm:$0xf0]  ;;  %v3016_v15 = vor.u32 %v4372_v6, %v3015_v5 }
  0xaa   :  { %1972 = vmatpush.bf16.msra.mxu3 %v3480_v18  ;;  %v3271_v11 = vld [vmem:[#allocation6 + $0x228] sm:$0xf]  ;;  %v4436_v12 = vld [vmem:[#allocation6 + $0x234] sm:$0xf0]  ;;  %v3144_v19 = vor.u32 %v4404_v9, %v3143_v7 }
  0xab   :  { %1931 = vmatpush.bf16.msra.mxu0 %v3080_v24  ;;  %v3399_v13 = vld [vmem:[#allocation6 + $0x328] sm:$0xf]  ;;  %v4468_v14 = vld [vmem:[#allocation6 + $0x334] sm:$0xf0]  ;;  %v3272_v20 = vor.u32 %v4436_v12, %v3271_v11 }
  0xac   :  { %1945 = vmatpush.bf16.msra.mxu1 %v3208_v25  ;;  %v2999_v16 = vld [vmem:[#allocation6 + $0x8] sm:$0xf]  ;;  %v4368_v18 = vld [vmem:[#allocation6 + $0x14] sm:$0xf0]  ;;  %v3400_v24 = vor.u32 %v4468_v14, %v3399_v13 }
  0xad   :  { %1959 = vmatpush.bf16.msra.mxu2 %v3336_v26  ;;  %v3127_v21 = vld [vmem:[#allocation6 + $0x108] sm:$0xf]  ;;  %v4400_v22 = vld [vmem:[#allocation6 + $0x114] sm:$0xf0]  ;;  %v3000_v31 = vor.u32 %v4368_v18, %v2999_v16 }
  0xae   :  { %1973 = vmatpush.bf16.msra.mxu3 %v3464_v30  ;;  %v3255_v23 = vld [vmem:[#allocation6 + $0x208] sm:$0xf]  ;;  %v4432_v25 = vld [vmem:[#allocation6 + $0x214] sm:$0xf0]  ;;  %v3128_v35 = vor.u32 %v4400_v22, %v3127_v21 }
  0xaf   :  { %1932 = vmatpush.bf16.msra.mxu0 %v3064_v36  ;;  %v3383_v26 = vld [vmem:[#allocation6 + $0x308] sm:$0xf]  ;;  %v4464_v27 = vld [vmem:[#allocation6 + $0x314] sm:$0xf0]  ;;  %v3256_v36 = vor.u32 %v4432_v25, %v3255_v23 }
  0xb0   :  { %1946 = vmatpush.bf16.msra.mxu1 %v3192_v37  ;;  %v3623_v28 = vld [vmem:[#allocation6 + $0x4e8] sm:$0xf]  ;;  %v4524_v29 = vld [vmem:[#allocation6 + $0x4f4] sm:$0xf0]  ;;  %v3384_v40 = vor.u32 %v4464_v27, %v3383_v26 }
  0xb1   :  { %1960 = vmatpush.bf16.msra.mxu2 %v3320_v38  ;;  %v3751_v30 = vld [vmem:[#allocation6 + $0x5e8] sm:$0xf]  ;;  %v4556_v32 = vld [vmem:[#allocation6 + $0x5f4] sm:$0xf0]  ;;  %v3624_v41 = vor.u32 %v4524_v29, %v3623_v28 }
  0xb2   :  { %1974 = vmatpush.bf16.msra.mxu3 %v3448_v45  ;;  %v3879_v33 = vld [vmem:[#allocation6 + $0x6e8] sm:$0xf]  ;;  %v4588_v34 = vld [vmem:[#allocation6 + $0x6f4] sm:$0xf0]  ;;  %v3752_v42 = vor.u32 %v4556_v32, %v3751_v30 }
  0xb3   :  { %1933 = vmatpush.bf16.msra.mxu0 %v3048_v52  ;;  %v4007_v37 = vld [vmem:[#allocation6 + $0x7e8] sm:$0xf]  ;;  %v4620_v38 = vld [vmem:[#allocation6 + $0x7f4] sm:$0xf0]  ;;  %v3880_v45 = vor.u32 %v4588_v34, %v3879_v33 }
  0xb4   :  { %1947 = vmatpush.bf16.msra.mxu1 %v3176_v53  ;;  %v3607_v46 = vld [vmem:[#allocation6 + $0x4c8] sm:$0xf]  ;;  %v4520_v48 = vld [vmem:[#allocation6 + $0x4d4] sm:$0xf0]  ;;  %v4008_v50 = vor.u32 %v4620_v38, %v4007_v37 }
  0xb5   :  { %1961 = vmatpush.bf16.msra.mxu2 %v3304_v54  ;;  %v3735_v49 = vld [vmem:[#allocation6 + $0x5c8] sm:$0xf]  ;;  %v4552_v51 = vld [vmem:[#allocation6 + $0x5d4] sm:$0xf0]  ;;  %v3608_v56 = vor.u32 %v4520_v48, %v3607_v46 }
  0xb6   :  { %1975 = vmatpush.bf16.msra.mxu3 %v3432_v59  ;;  %v3863_v52 = vld [vmem:[#allocation6 + $0x6c8] sm:$0xf]  ;;  %v4584_v53 = vld [vmem:[#allocation6 + $0x6d4] sm:$0xf0]  ;;  %v3736_v57 = vor.u32 %v4552_v51, %v3735_v49 }
  0xb7   :  { %1934 = vmatpush.bf16.msra.mxu0 %v3032_v2  ;;  %v3991_v54 = vld [vmem:[#allocation6 + $0x7c8] sm:$0xf]  ;;  %v4616_v55 = vld [vmem:[#allocation6 + $0x7d4] sm:$0xf0]  ;;  %v3864_v59 = vor.u32 %v4584_v53, %v3863_v52 }
  0xb8   :  { %1948 = vmatpush.bf16.msra.mxu1 %v3160_v3  ;;  %v3591_v60 = vld [vmem:[#allocation6 + $0x4a8] sm:$0xf]  ;;  %v4516_v61 = vld [vmem:[#allocation6 + $0x4b4] sm:$0xf0]  ;;  %v3992_v63 = vor.u32 %v4616_v55, %v3991_v54 }
  0xb9   :  { %1962 = vmatpush.bf16.msra.mxu2 %v3288_v4  ;;  %v3719_v62 = vld [vmem:[#allocation6 + $0x5a8] sm:$0xf]  ;;  %v4548_v0 = vld [vmem:[#allocation6 + $0x5b4] sm:$0xf0]  ;;  %v3592_v6 = vor.u32 %v4516_v61, %v3591_v60 }
  0xba   :  { %1976 = vmatpush.bf16.msra.mxu3 %v3416_v8  ;;  %v3847_v2 = vld [vmem:[#allocation6 + $0x6a8] sm:$0xf]  ;;  %v4580_v3 = vld [vmem:[#allocation6 + $0x6b4] sm:$0xf0]  ;;  %v3720_v7 = vor.u32 %v4548_v0, %v3719_v62 }
  0xbb   :  { %1935 = vmatpush.bf16.msra.mxu0 %v3016_v15  ;;  %v3975_v4 = vld [vmem:[#allocation6 + $0x7a8] sm:$0xf]  ;;  %v4612_v5 = vld [vmem:[#allocation6 + $0x7b4] sm:$0xf0]  ;;  %v3848_v8 = vor.u32 %v4580_v3, %v3847_v2 }
  0xbc   :  { %1949 = vmatpush.bf16.msra.mxu1 %v3144_v19  ;;  %v3575_v9 = vld [vmem:[#allocation6 + $0x488] sm:$0xf]  ;;  %v4512_v11 = vld [vmem:[#allocation6 + $0x494] sm:$0xf0]  ;;  %v3976_v13 = vor.u32 %v4612_v5, %v3975_v4 }
  0xbd   :  { %1963 = vmatpush.bf16.msra.mxu2 %v3272_v20  ;;  %v3703_v12 = vld [vmem:[#allocation6 + $0x588] sm:$0xf]  ;;  %v4544_v14 = vld [vmem:[#allocation6 + $0x594] sm:$0xf0]  ;;  %v3576_v20 = vor.u32 %v4512_v11, %v3575_v9  ;;  %v4394_v11 = vld [vmem:[#allocation6 + $0xec] sm:$0xf] }
  0xbe   :  { %1977 = vmatpush.bf16.msra.mxu3 %v3400_v24  ;;  %v3831_v15 = vld [vmem:[#allocation6 + $0x688] sm:$0xf]  ;;  %v4576_v16 = vld [vmem:[#allocation6 + $0x694] sm:$0xf0]  ;;  %v3704_v21 = vor.u32 %v4544_v14, %v3703_v12  ;;  %v3113_v12 = vld [vmem:[#allocation6 + $0xf8] sm:$0xf0] }
  0xbf   :  { %1936 = vmatpush.bf16.msra.mxu0 %v3000_v31  ;;  %v3959_v18 = vld [vmem:[#allocation6 + $0x788] sm:$0xf]  ;;  %v4608_v19 = vld [vmem:[#allocation6 + $0x794] sm:$0xf0]  ;;  %v3832_v22 = vor.u32 %v4576_v16, %v3831_v15  ;;  %v3241_v15 = vld [vmem:[#allocation6 + $0x1f8] sm:$0xf0] }
  0xc0   :  { %1950 = vmatpush.bf16.msra.mxu1 %v3128_v35  ;;  %v3559_v23 = vld [vmem:[#allocation6 + $0x468] sm:$0xf]  ;;  %v4508_v24 = vld [vmem:[#allocation6 + $0x474] sm:$0xf0]  ;;  %v3960_v26 = vor.u32 %v4608_v19, %v3959_v18  ;;  %v4458_v16 = vld [vmem:[#allocation6 + $0x2ec] sm:$0xf] }
  0xc1   :  { %1964 = vmatpush.bf16.msra.mxu2 %v3256_v36  ;;  %v3687_v25 = vld [vmem:[#allocation6 + $0x568] sm:$0xf]  ;;  %v4540_v27 = vld [vmem:[#allocation6 + $0x574] sm:$0xf0]  ;;  %v3560_v32 = vor.u32 %v4508_v24, %v3559_v23  ;;  %v3369_v18 = vld [vmem:[#allocation6 + $0x2f8] sm:$0xf0]  ;;  %v3116_v24 = vor.u32 %v4394_v11, %v3113_v12 }
  0xc2   :  { %1978 = vmatpush.bf16.msra.mxu3 %v3384_v40  ;;  %1937 = vmatmul.bf16.vlgmr.msra.gmra.mxu0 %v4997_v58  ;;  %v3815_v28 = vld [vmem:[#allocation6 + $0x668] sm:$0xf]  ;;  %v4572_v29 = vld [vmem:[#allocation6 + $0x674] sm:$0xf0]  ;;  %v3688_v33 = vor.u32 %v4540_v27, %v3687_v25  ;;  %v4390_v27 = vld [vmem:[#allocation6 + $0xcc] sm:$0xf] }
  0xc3   :  { %1985 = vmatpush.bf16.msrb.mxu0 %v3624_v41  ;;  %1951 = vmatmul.bf16.vlgmr.msra.gmra.mxu1 %v5003_v10  ;;  %v3943_v30 = vld [vmem:[#allocation6 + $0x768] sm:$0xf]  ;;  %v4604_v31 = vld [vmem:[#allocation6 + $0x774] sm:$0xf0]  ;;  %v3816_v34 = vor.u32 %v4572_v29, %v3815_v28  ;;  %v3097_v28 = vld [vmem:[#allocation6 + $0xd8] sm:$0xf0] }
  0xc4   :  { %1999 = vmatpush.bf16.msrb.mxu1 %v3752_v42  ;;  %1965 = vmatmul.bf16.vlgmr.msra.gmra.mxu2 %v4999_v1  ;;  %v3543_v35 = vld [vmem:[#allocation6 + $0x448] sm:$0xf]  ;;  %v4504_v36 = vld [vmem:[#allocation6 + $0x454] sm:$0xf0]  ;;  %v3944_v38 = vor.u32 %v4604_v31, %v3943_v30  ;;  %v4422_v29 = vld [vmem:[#allocation6 + $0x1cc] sm:$0xf] }
  0xc5   :  { %2013 = vmatpush.bf16.msrb.mxu2 %v3880_v45  ;;  %1979 = vmatmul.bf16.vlgmr.msra.gmra.mxu3 %v5005_v17  ;;  %v3671_v37 = vld [vmem:[#allocation6 + $0x548] sm:$0xf]  ;;  %v4536_v40 = vld [vmem:[#allocation6 + $0x554] sm:$0xf0]  ;;  %v3544_v48 = vor.u32 %v4504_v36, %v3543_v35  ;;  %v3225_v31 = vld [vmem:[#allocation6 + $0x1d8] sm:$0xf0]  ;;  %v3100_v36 = vor.u32 %v4390_v27, %v3097_v28 }
  0xc6   :  { %2027 = vmatpush.bf16.msrb.mxu3 %v4008_v50  ;;  %v3799_v41 = vld [vmem:[#allocation6 + $0x648] sm:$0xf]  ;;  %v4568_v42 = vld [vmem:[#allocation6 + $0x654] sm:$0xf0]  ;;  %v3672_v49 = vor.u32 %v4536_v40, %v3671_v37  ;;  %v3481_v35 = vld [vmem:[#allocation6 + $0x3d8] sm:$0xf0]  ;;  %v3228_v37 = vor.u32 %v4422_v29, %v3225_v31 }
  0xc7   :  { %1986 = vmatpush.bf16.msrb.mxu0 %v3608_v56  ;;  %v3927_v45 = vld [vmem:[#allocation6 + $0x748] sm:$0xf]  ;;  %v4600_v46 = vld [vmem:[#allocation6 + $0x754] sm:$0xf0]  ;;  %v3800_v50 = vor.u32 %v4568_v42, %v3799_v41  ;;  %v4386_v40 = vld [vmem:[#allocation6 + $0xac] sm:$0xf] }
  0xc8   :  { %2000 = vmatpush.bf16.msrb.mxu1 %v3736_v57  ;;  %v3527_v51 = vld [vmem:[#allocation6 + $0x428] sm:$0xf]  ;;  %v4500_v52 = vld [vmem:[#allocation6 + $0x434] sm:$0xf0]  ;;  %v3928_v54 = vor.u32 %v4600_v46, %v3927_v45  ;;  %v3081_v41 = vld [vmem:[#allocation6 + $0xb8] sm:$0xf0] }
  0xc9   :  { %2014 = vmatpush.bf16.msrb.mxu2 %v3864_v59  ;;  %v3655_v53 = vld [vmem:[#allocation6 + $0x528] sm:$0xf]  ;;  %v4532_v55 = vld [vmem:[#allocation6 + $0x534] sm:$0xf0]  ;;  %v3528_v61 = vor.u32 %v4500_v52, %v3527_v51  ;;  %v4418_v42 = vld [vmem:[#allocation6 + $0x1ac] sm:$0xf]  ;;  %v3084_v52 = vor.u32 %v4386_v40, %v3081_v41 }
  0xca   :  { %2028 = vmatpush.bf16.msrb.mxu3 %v3992_v63  ;;  %v3783_v56 = vld [vmem:[#allocation6 + $0x628] sm:$0xf]  ;;  %v4564_v57 = vld [vmem:[#allocation6 + $0x634] sm:$0xf0]  ;;  %v3656_v0 = vor.u32 %v4532_v55, %v3655_v53  ;;  %v3209_v46 = vld [vmem:[#allocation6 + $0x1b8] sm:$0xf0] }
  0xcb   :  { %1987 = vmatpush.bf16.msrb.mxu0 %v3592_v6  ;;  %v3911_v59 = vld [vmem:[#allocation6 + $0x728] sm:$0xf]  ;;  %v4596_v60 = vld [vmem:[#allocation6 + $0x734] sm:$0xf0]  ;;  %v3784_v2 = vor.u32 %v4564_v57, %v3783_v56  ;;  %v3465_v51 = vld [vmem:[#allocation6 + $0x3b8] sm:$0xf0]  ;;  %v3212_v53 = vor.u32 %v4418_v42, %v3209_v46 }
  0xcc   :  { %2001 = vmatpush.bf16.msrb.mxu1 %v3720_v7  ;;  %v3511_v62 = vld [vmem:[#allocation6 + $0x408] sm:$0xf]  ;;  %v4496_v63 = vld [vmem:[#allocation6 + $0x414] sm:$0xf0]  ;;  %v3912_v6 = vor.u32 %v4596_v60, %v3911_v59  ;;  %v4382_v55 = vld [vmem:[#allocation6 + $0x8c] sm:$0xf] }
  0xcd   :  { %2015 = vmatpush.bf16.msrb.mxu2 %v3848_v8  ;;  %v3639_v3 = vld [vmem:[#allocation6 + $0x508] sm:$0xf]  ;;  %v4528_v4 = vld [vmem:[#allocation6 + $0x514] sm:$0xf0]  ;;  %v3512_v14 = vor.u32 %v4496_v63, %v3511_v62  ;;  %v3065_v56 = vld [vmem:[#allocation6 + $0x98] sm:$0xf0] }
  0xce   :  { %2029 = vmatpush.bf16.msrb.mxu3 %v3976_v13  ;;  %v3767_v5 = vld [vmem:[#allocation6 + $0x608] sm:$0xf]  ;;  %v4560_v7 = vld [vmem:[#allocation6 + $0x614] sm:$0xf0]  ;;  %v4426_v13 = vld [vmem:[#allocation6 + $0x1ec] sm:$0xf]  ;;  %v3640_v19 = vor.u32 %v4528_v4, %v3639_v3  ;;  %v5037_v3 = vpop.f32.mrf.mxu0 }
  0xcf   :  { %1988 = vmatpush.bf16.msrb.mxu0 %v3576_v20  ;;  %v3895_v8 = vld [vmem:[#allocation6 + $0x708] sm:$0xf]  ;;  %v4592_v9 = vld [vmem:[#allocation6 + $0x714] sm:$0xf0]  ;;  %v3768_v20 = vor.u32 %v4560_v7, %v3767_v5  ;;  %v3244_v25 = vor.u32 %v4426_v13, %v3241_v15  ;;  %v4414_v57 = vld [vmem:[#allocation6 + $0x18c] sm:$0xf] }
  0xd0   :  { %2002 = vmatpush.bf16.msrb.mxu1 %v3704_v21  ;;  %v4490_v21 = vld [vmem:[#allocation6 + $0x3ec] sm:$0xf]  ;;  %v3896_v23 = vor.u32 %v4592_v9, %v3895_v8  ;;  %v3193_v60 = vld [vmem:[#allocation6 + $0x198] sm:$0xf0]  ;;  %v5039_v9 = vpop.f32.mrf.mxu1 }
  0xd1   :  { %2016 = vmatpush.bf16.msrb.mxu2 %v3832_v22  ;;  %v3497_v22 = vld [vmem:[#allocation6 + $0x3f8] sm:$0xf0]  ;;  %v4478_v63 = vld [vmem:[#allocation6 + $0x38c] sm:$0xf]  ;;  %v3196_v4 = vor.u32 %v4414_v57, %v3193_v60 }
  0xd2   :  { %2030 = vmatpush.bf16.msrb.mxu3 %v3960_v26  ;;  %v3372_v26 = vor.u32 %v4458_v16, %v3369_v18  ;;  %v3500_v30 = vor.u32 %v4490_v21, %v3497_v22  ;;  %v3321_v62 = vld [vmem:[#allocation6 + $0x298] sm:$0xf0]  ;;  %v4410_v8 = vld [vmem:[#allocation6 + $0x16c] sm:$0xf] }
  0xd3   :  { %1989 = vmatpush.bf16.msrb.mxu0 %v3560_v32  ;;  %v4454_v32 = vld [vmem:[#allocation6 + $0x2cc] sm:$0xf]  ;;  %v3049_v7 = vld [vmem:[#allocation6 + $0x78] sm:$0xf0] }
  0xd4   :  { %2003 = vmatpush.bf16.msrb.mxu1 %v3688_v33  ;;  %v3353_v33 = vld [vmem:[#allocation6 + $0x2d8] sm:$0xf0]  ;;  %v4442_v13 = vld [vmem:[#allocation6 + $0x26c] sm:$0xf] }
  0xd5   :  { %2017 = vmatpush.bf16.msrb.mxu2 %v3816_v34  ;;  %v4486_v34 = vld [vmem:[#allocation6 + $0x3cc] sm:$0xf]  ;;  %v3177_v12 = vld [vmem:[#allocation6 + $0x178] sm:$0xf0] }
  0xd6   :  { %2031 = vmatpush.bf16.msrb.mxu3 %v3944_v38  ;;  %v3356_v38 = vor.u32 %v4454_v32, %v3353_v33  ;;  %v3484_v45 = vor.u32 %v4486_v34, %v3481_v35  ;;  %v4474_v15 = vld [vmem:[#allocation6 + $0x36c] sm:$0xf]  ;;  %v3433_v16 = vld [vmem:[#allocation6 + $0x378] sm:$0xf0]  ;;  %v5043_v32 = vpop.f32.mrf.mxu3 }
  0xd7   :  { %1990 = vmatpush.bf16.msrb.mxu0 %v3544_v48  ;;  %v4450_v48 = vld [vmem:[#allocation6 + $0x2ac] sm:$0xf]  ;;  %v3033_v22 = vld [vmem:[#allocation6 + $0x58] sm:$0xf0] }
  0xd8   :  { %2004 = vmatpush.bf16.msrb.mxu1 %v3672_v49  ;;  %v3337_v49 = vld [vmem:[#allocation6 + $0x2b8] sm:$0xf0]  ;;  %v4374_v21 = vld [vmem:[#allocation6 + $0x4c] sm:$0xf] }
  0xd9   :  { %2018 = vmatpush.bf16.msrb.mxu2 %v3800_v50  ;;  %v4482_v50 = vld [vmem:[#allocation6 + $0x3ac] sm:$0xf]  ;;  %v3289_v27 = vld [vmem:[#allocation6 + $0x258] sm:$0xf0]  ;;  %v3036_v31 = vor.u32 %v4374_v21, %v3033_v22 }
  0xda   :  { %2032 = vmatpush.bf16.msrb.mxu3 %v3928_v54  ;;  %v3340_v54 = vor.u32 %v4450_v48, %v3337_v49  ;;  %v3468_v59 = vor.u32 %v4482_v50, %v3465_v51  ;;  %v4470_v28 = vld [vmem:[#allocation6 + $0x34c] sm:$0xf]  ;;  %v3417_v29 = vld [vmem:[#allocation6 + $0x358] sm:$0xf0]  ;;  %v5047_v49 = vpop.f32.mrf.mxu1 }
  0xdb   :  { %1991 = vmatpush.bf16.msrb.mxu0 %v3528_v61  ;;  %v4446_v61 = vld [vmem:[#allocation6 + $0x28c] sm:$0xf]  ;;  %v3145_v40 = vld [vmem:[#allocation6 + $0x138] sm:$0xf0] }
  0xdc   :  { %2005 = vmatpush.bf16.msrb.mxu1 %v3656_v0  ;;  %v3449_v0 = vld [vmem:[#allocation6 + $0x398] sm:$0xf0]  ;;  %v3324_v5 = vor.u32 %v4446_v61, %v3321_v62  ;;  %v4370_v35 = vld [vmem:[#allocation6 + $0x2c] sm:$0xf] }
  0xdd   :  { %2019 = vmatpush.bf16.msrb.mxu2 %v3784_v2  ;;  %v3068_v2 = vor.u32 %v4382_v55, %v3065_v56  ;;  %v3452_v11 = vor.u32 %v4478_v63, %v3449_v0  ;;  %v4434_v41 = vld [vmem:[#allocation6 + $0x22c] sm:$0xf]  ;;  %v3273_v42 = vld [vmem:[#allocation6 + $0x238] sm:$0xf0] }
  0xde   :  { %2033 = vmatpush.bf16.msrb.mxu3 %v3912_v6  ;;  %v4378_v6 = vld [vmem:[#allocation6 + $0x6c] sm:$0xf]  ;;  %v3401_v48 = vld [vmem:[#allocation6 + $0x338] sm:$0xf0] }
  0xdf   :  { %1992 = vmatpush.bf16.msrb.mxu0 %v3512_v14  ;;  %v3305_v14 = vld [vmem:[#allocation6 + $0x278] sm:$0xf0]  ;;  %v3052_v18 = vor.u32 %v4378_v6, %v3049_v7  ;;  %v4466_v46 = vld [vmem:[#allocation6 + $0x32c] sm:$0xf] }
  0xe0   :  { %2006 = vmatpush.bf16.msrb.mxu1 %v3640_v19  ;;  %v3180_v19 = vor.u32 %v4410_v8, %v3177_v12  ;;  %v4366_v51 = vld [vmem:[#allocation6 + $0xc] sm:$0xf]  ;;  %v3129_v56 = vld [vmem:[#allocation6 + $0x118] sm:$0xf0] }
  0xe1   :  { %2020 = vmatpush.bf16.msrb.mxu2 %v3768_v20  ;;  %v3308_v20 = vor.u32 %v4442_v13, %v3305_v14  ;;  %v4398_v55 = vld [vmem:[#allocation6 + $0x10c] sm:$0xf]  ;;  %v3257_v60 = vld [vmem:[#allocation6 + $0x218] sm:$0xf0] }
  0xe2   :  { %2034 = vmatpush.bf16.msrb.mxu3 %v3896_v23  ;;  %1993 = vmatmul.bf16.vlgmr.msrb.gmra.mxu0 %v5009_v39  ;;  %v4406_v23 = vld [vmem:[#allocation6 + $0x14c] sm:$0xf]  ;;  %v3385_v62 = vld [vmem:[#allocation6 + $0x318] sm:$0xf0]  ;;  %v3132_v8 = vor.u32 %v4398_v55, %v3129_v56 }
  0xe3   :  { %2041 = vmatpush.bf16.msra.mxu0 %v3116_v24  ;;  %2007 = vmatmul.bf16.vlgmr.msrb.gmra.mxu1 %v5013_v44  ;;  %v3436_v24 = vor.u32 %v4474_v15, %v3433_v16  ;;  %v4430_v57 = vld [vmem:[#allocation6 + $0x20c] sm:$0xf]  ;;  %v3625_v0 = vld [vmem:[#allocation6 + $0x4f8] sm:$0xf0] }
  0xe4   :  { %2055 = vmatpush.bf16.msra.mxu1 %v3244_v25  ;;  %2021 = vmatmul.bf16.vlgmr.msrb.gmra.mxu2 %v5011_v43  ;;  %v3161_v25 = vld [vmem:[#allocation6 + $0x158] sm:$0xf0]  ;;  %v4462_v61 = vld [vmem:[#allocation6 + $0x30c] sm:$0xf] }
  0xe5   :  { %2069 = vmatpush.bf16.msra.mxu2 %v3372_v26  ;;  %2035 = vmatmul.bf16.vlgmr.msrb.gmra.mxu3 %v5015_v47  ;;  %v4438_v26 = vld [vmem:[#allocation6 + $0x24c] sm:$0xf]  ;;  %v3164_v33 = vor.u32 %v4406_v23, %v3161_v25  ;;  %v3881_v7 = vld [vmem:[#allocation6 + $0x6f8] sm:$0xf0]  ;;  %v3388_v15 = vor.u32 %v4462_v61, %v3385_v62 }
  0xe6   :  { %2083 = vmatpush.bf16.msra.mxu3 %v3500_v30  ;;  %v5041_v30 = vpop.f32.mrf.mxu2  ;;  %v3292_v34 = vor.u32 %v4438_v26, %v3289_v27  ;;  %v4522_v63 = vld [vmem:[#allocation6 + $0x4ec] sm:$0xf]  ;;  %v4009_v13 = vld [vmem:[#allocation6 + $0x7f8] sm:$0xf0] }
  0xe7   :  { %2042 = vmatpush.bf16.msra.mxu0 %v3100_v36  ;;  %v3017_v36 = vld [vmem:[#allocation6 + $0x38] sm:$0xf0]  ;;  %v4586_v6 = vld [vmem:[#allocation6 + $0x6ec] sm:$0xf]  ;;  %v3628_v16 = vor.u32 %v4522_v63, %v3625_v0 }
  0xe8   :  { %2056 = vmatpush.bf16.msra.mxu1 %v3228_v37  ;;  %v4402_v37 = vld [vmem:[#allocation6 + $0x12c] sm:$0xf]  ;;  %v3020_v50 = vor.u32 %v4370_v35, %v3017_v36  ;;  %v3609_v22 = vld [vmem:[#allocation6 + $0x4d8] sm:$0xf0] }
  0xe9   :  { %2070 = vmatpush.bf16.msra.mxu2 %v3356_v38  ;;  %v3420_v38 = vor.u32 %v4470_v28, %v3417_v29  ;;  %v4618_v12 = vld [vmem:[#allocation6 + $0x7ec] sm:$0xf]  ;;  %v3737_v25 = vld [vmem:[#allocation6 + $0x5d8] sm:$0xf0] }
  0xea   :  { %2084 = vmatpush.bf16.msra.mxu3 %v3484_v45  ;;  %v5045_v45 = vpop.f32.mrf.mxu0  ;;  %v4518_v21 = vld [vmem:[#allocation6 + $0x4cc] sm:$0xf]  ;;  %v3865_v27 = vld [vmem:[#allocation6 + $0x6d8] sm:$0xf0] }
  0xeb   :  { %2043 = vmatpush.bf16.msra.mxu0 %v3084_v52  ;;  %v3001_v52 = vld [vmem:[#allocation6 + $0x18] sm:$0xf0]  ;;  %v4550_v23 = vld [vmem:[#allocation6 + $0x5cc] sm:$0xf] }
  0xec   :  { %2057 = vmatpush.bf16.msra.mxu1 %v3212_v53  ;;  %v3148_v53 = vor.u32 %v4402_v37, %v3145_v40  ;;  %v4582_v26 = vld [vmem:[#allocation6 + $0x6cc] sm:$0xf]  ;;  %v3740_v35 = vor.u32 %v4550_v23, %v3737_v25  ;;  %v3577_v56 = vld [vmem:[#allocation6 + $0x498] sm:$0xf0] }
  0xed   :  { %2071 = vmatpush.bf16.msra.mxu2 %v3340_v54  ;;  %v3276_v54 = vor.u32 %v4434_v41, %v3273_v42  ;;  %v4614_v29 = vld [vmem:[#allocation6 + $0x7cc] sm:$0xf]  ;;  %v3868_v36 = vor.u32 %v4582_v26, %v3865_v27  ;;  %v3721_v42 = vld [vmem:[#allocation6 + $0x5b8] sm:$0xf0] }
  0xee   :  { %2085 = vmatpush.bf16.msra.mxu3 %v3468_v59  ;;  %v3404_v59 = vor.u32 %v4466_v46, %v3401_v48  ;;  %v5049_v14 = vpop.f32.mrf.mxu2  ;;  %v4514_v37 = vld [vmem:[#allocation6 + $0x4ac] sm:$0xf]  ;;  %v3849_v48 = vld [vmem:[#allocation6 + $0x6b8] sm:$0xf0] }
  0xef   :  { %2044 = vmatpush.bf16.msra.mxu0 %v3068_v2  ;;  %v4554_v2 = vld [vmem:[#allocation6 + $0x5ec] sm:$0xf]  ;;  %v3833_v61 = vld [vmem:[#allocation6 + $0x698] sm:$0xf0] }
  0xf0   :  { %2058 = vmatpush.bf16.msra.mxu1 %v3196_v4  ;;  %v3004_v4 = vor.u32 %v4366_v51, %v3001_v52  ;;  %v4546_v40 = vld [vmem:[#allocation6 + $0x5ac] sm:$0xf]  ;;  %v3977_v51 = vld [vmem:[#allocation6 + $0x7b8] sm:$0xf0] }
  0xf1   :  { %2072 = vmatpush.bf16.msra.mxu2 %v3324_v5  ;;  %v3753_v5 = vld [vmem:[#allocation6 + $0x5f8] sm:$0xf0]  ;;  %v4578_v46 = vld [vmem:[#allocation6 + $0x6ac] sm:$0xf] }
  0xf2   :  { %2086 = vmatpush.bf16.msra.mxu3 %v3452_v11  ;;  %v3260_v11 = vor.u32 %v4430_v57, %v3257_v60  ;;  %v5053_v28 = vpop.f32.mrf.mxu0  ;;  %v4510_v55 = vld [vmem:[#allocation6 + $0x48c] sm:$0xf]  ;;  %v3961_v63 = vld [vmem:[#allocation6 + $0x798] sm:$0xf0] }
  0xf3   :  { %2045 = vmatpush.bf16.msra.mxu0 %v3052_v18  ;;  %v5051_v18 = vpop.f32.mrf.mxu3  ;;  %v4574_v60 = vld [vmem:[#allocation6 + $0x68c] sm:$0xf]  ;;  %v3673_v27 = vld [vmem:[#allocation6 + $0x558] sm:$0xf0] }
  0xf4   :  { %2059 = vmatpush.bf16.msra.mxu1 %v3180_v19  ;;  %v3756_v19 = vor.u32 %v4554_v2, %v3753_v5  ;;  %v4506_v5 = vld [vmem:[#allocation6 + $0x46c] sm:$0xf] }
  0xf5   :  { %2073 = vmatpush.bf16.msra.mxu2 %v3308_v20  ;;  %v3884_v20 = vor.u32 %v4586_v6, %v3881_v7  ;;  %v3561_v6 = vld [vmem:[#allocation6 + $0x478] sm:$0xf0]  ;;  %v4538_v7 = vld [vmem:[#allocation6 + $0x56c] sm:$0xf] }
  0xf6   :  { %2087 = vmatpush.bf16.msra.mxu3 %v3436_v24  ;;  %v4012_v24 = vor.u32 %v4618_v12, %v4009_v13  ;;  %v5061_v57 = vpop.f32.mrf.mxu2  ;;  %v3689_v12 = vld [vmem:[#allocation6 + $0x578] sm:$0xf0]  ;;  %v4570_v13 = vld [vmem:[#allocation6 + $0x66c] sm:$0xf] }
  0xf7   :  { %2046 = vmatpush.bf16.msra.mxu0 %v3036_v31  ;;  %v3993_v31 = vld [vmem:[#allocation6 + $0x7d8] sm:$0xf0]  ;;  %v4502_v23 = vld [vmem:[#allocation6 + $0x44c] sm:$0xf] }
  0xf8   :  { %2060 = vmatpush.bf16.msra.mxu1 %v3164_v33  ;;  %v5055_v33 = vpop.f32.mrf.mxu1  ;;  %v3996_v41 = vor.u32 %v4614_v29, %v3993_v31  ;;  %v4534_v25 = vld [vmem:[#allocation6 + $0x54c] sm:$0xf]  ;;  %v3801_v31 = vld [vmem:[#allocation6 + $0x658] sm:$0xf0] }
  0xf9   :  { %2074 = vmatpush.bf16.msra.mxu2 %v3292_v34  ;;  %v3612_v34 = vor.u32 %v4518_v21, %v3609_v22  ;;  %v3692_v21 = vor.u32 %v4538_v7, %v3689_v12  ;;  %v4566_v29 = vld [vmem:[#allocation6 + $0x64c] sm:$0xf]  ;;  %v3897_v7 = vld [vmem:[#allocation6 + $0x718] sm:$0xf0] }
  0xfa   :  { %2088 = vmatpush.bf16.msra.mxu3 %v3420_v38  ;;  %v3593_v38 = vld [vmem:[#allocation6 + $0x4b8] sm:$0xf0]  ;;  %v5065_v0 = vpop.f32.mrf.mxu0 }
  0xfb   :  { %2047 = vmatpush.bf16.msra.mxu0 %v3020_v50  ;;  %v4610_v50 = vld [vmem:[#allocation6 + $0x7ac] sm:$0xf]  ;;  %v3596_v52 = vor.u32 %v4514_v37, %v3593_v38  ;;  %v5063_v62 = vpop.f32.mrf.mxu3  ;;  %v4636_v12 = vld [vmem:[#allocation9 + $0x74] sm:$0xf0] }
  0xfc   :  { %2061 = vmatpush.bf16.msra.mxu1 %v3148_v53  ;;  %v3724_v53 = vor.u32 %v4546_v40, %v3721_v42  ;;  %v3676_v40 = vor.u32 %v4534_v25, %v3673_v27 }
  0xfd   :  { %2075 = vmatpush.bf16.msra.mxu2 %v3276_v54  ;;  %v3852_v54 = vor.u32 %v4578_v46, %v3849_v48  ;;  %v4498_v46 = vld [vmem:[#allocation6 + $0x42c] sm:$0xf]  ;;  %v3529_v48 = vld [vmem:[#allocation6 + $0x438] sm:$0xf0] }
  0xfe   :  { %2089 = vmatpush.bf16.msra.mxu3 %v3404_v59  ;;  %v3980_v59 = vor.u32 %v4610_v50, %v3977_v51  ;;  %v4530_v50 = vld [vmem:[#allocation6 + $0x52c] sm:$0xf] }
  0xff   :  { %2048 = vmatpush.bf16.msra.mxu0 %v3004_v4  ;;  %v3836_v4 = vor.u32 %v4574_v60, %v3833_v61 }
 0x100   :  { %2062 = vmatpush.bf16.msra.mxu1 %v3132_v8  ;;  %v5067_v8 = vpop.f32.mrf.mxu1 }
 0x101   :  { %2076 = vmatpush.bf16.msra.mxu2 %v3260_v11 }
 0x102   :  { %2090 = vmatpush.bf16.msra.mxu3 %v3388_v15  ;;  %2049 = vmatmul.bf16.vlgmr.msra.gmra.mxu0 %v4997_v58  ;;  %v4606_v58 = vld [vmem:[#allocation6 + $0x78c] sm:$0xf]  ;;  %v3817_v15 = vld [vmem:[#allocation6 + $0x678] sm:$0xf0]  ;;  %v1826_v42 = vpop.f32.mrf.mxu0 }
 0x103   :  { %2097 = vmatpush.bf16.msrb.mxu0 %v3628_v16  ;;  %2063 = vmatmul.bf16.vlgmr.msra.gmra.mxu1 %v5003_v10  ;;  %v3580_v10 = vor.u32 %v4510_v55, %v3577_v56  ;;  %v3964_v11 = vor.u32 %v4606_v58, %v3961_v63  ;;  %v4602_v16 = vld [vmem:[#allocation6 + $0x76c] sm:$0xf]  ;;  %v3820_v22 = vor.u32 %v4570_v13, %v3817_v15  ;;  %v5071_v38 = vpop.f32.mrf.mxu3  ;;  %v3513_v58 = vld [vmem:[#allocation6 + $0x418] sm:$0xf0] }
 0x104   :  { %2111 = vmatpush.bf16.msrb.mxu1 %v3756_v19  ;;  %2077 = vmatmul.bf16.vlgmr.msra.gmra.mxu2 %v4999_v1  ;;  %v4542_v1 = vld [vmem:[#allocation6 + $0x58c] sm:$0xf]  ;;  %v3945_v19 = vld [vmem:[#allocation6 + $0x778] sm:$0xf0]  ;;  %v1729_v13 = vadd.f32 %v5039_v9, %v5037_v3  ;;  %v4063_v3 = vld [vmem:[#allocation9 + $0x60] sm:$0xf] }
 0x105   :  { %2125 = vmatpush.bf16.msrb.mxu2 %v3884_v20  ;;  %2091 = vmatmul.bf16.vlgmr.msra.gmra.mxu3 %v5005_v17  ;;  %v3705_v17 = vld [vmem:[#allocation6 + $0x598] sm:$0xf0]  ;;  %v3564_v20 = vor.u32 %v4506_v5, %v3561_v6  ;;  %v3948_v26 = vor.u32 %v4602_v16, %v3945_v19  ;;  %v4594_v56 = vld [vmem:[#allocation6 + $0x72c] sm:$0xf]  ;;  %v4135_v16 = vld [vmem:[#allocation9 + $0xf0] sm:$0xf] }
 0x106   :  { %2139 = vmatpush.bf16.msrb.mxu3 %v4012_v24  ;;  %v3708_v2 = vor.u32 %v4542_v1, %v3705_v17  ;;  %v3545_v24 = vld [vmem:[#allocation6 + $0x458] sm:$0xf0]  ;;  %v4494_v17 = vld [vmem:[#allocation6 + $0x40c] sm:$0xf] }
 0x107   :  { %2098 = vmatpush.bf16.msrb.mxu0 %v3612_v34  ;;  %v4598_v34 = vld [vmem:[#allocation6 + $0x74c] sm:$0xf]  ;;  %v3548_v37 = vor.u32 %v4502_v23, %v3545_v24  ;;  %v3913_v1 = vld [vmem:[#allocation6 + $0x738] sm:$0xf0]  ;;  %v3516_v15 = vor.u32 %v4494_v17, %v3513_v58  ;;  %v1731_v24 = vadd.f32 %v5047_v49, %v5045_v45 }
 0x108   :  { %2112 = vmatpush.bf16.msrb.mxu1 %v3740_v35  ;;  %v3929_v35 = vld [vmem:[#allocation6 + $0x758] sm:$0xf0]  ;;  %v1840_v55 = vpop.f32.mrf.mxu1  ;;  %v4526_v63 = vld [vmem:[#allocation6 + $0x50c] sm:$0xf] }
 0x109   :  { %2126 = vmatpush.bf16.msrb.mxu2 %v3868_v36  ;;  %v5069_v36 = vpop.f32.mrf.mxu2  ;;  %v3932_v51 = vor.u32 %v4598_v34, %v3929_v35  ;;  %v3769_v5 = vld [vmem:[#allocation6 + $0x618] sm:$0xf0]  ;;  %v4590_v6 = vld [vmem:[#allocation6 + $0x70c] sm:$0xf]  ;;  %v1841_v27 = vadd.f32 %v1840_v55, %v1826_v42  ;;  %v1743_v34 = vadd.f32 %v5041_v30, %v1729_v13  ;;  %v4127_v35 = vld [vmem:[#allocation9 + $0xe0] sm:$0xf] }
 0x10a   :  { %2140 = vmatpush.bf16.msrb.mxu3 %v3996_v41  ;;  %v3804_v41 = vor.u32 %v4566_v29, %v3801_v31  ;;  %v4652_v19 = vld [vmem:[#allocation9 + $0xf4] sm:$0xf0]  ;;  %v3900_v25 = vor.u32 %v4590_v6, %v3897_v7  ;;  %v1828_v31 = vpop.f32.mrf.mxu0  ;;  %v4634_v9 = vld [vmem:[#allocation9 + $0x64] sm:$0xf0]  ;;  %v4031_v13 = vld [vmem:[#allocation9 + $0x20] sm:$0xf] }
 0x10b   :  { %2099 = vmatpush.bf16.msrb.mxu0 %v3596_v52  ;;  %v3657_v52 = vld [vmem:[#allocation6 + $0x538] sm:$0xf0]  ;;  %v1868_v23 = vpop.f32.mrf.mxu3  ;;  %v4136_v29 = vor.u32 %v4652_v19, %v4135_v16  ;;  %v4064_v45 = vor.u32 %v4634_v9, %v4063_v3  ;;  %v1757_v30 = vadd.f32 %v5043_v32, %v1743_v34  ;;  %v4023_v3 = vld [vmem:[#allocation9 + $0x10] sm:$0xf] }
 0x10c   :  { %2113 = vmatpush.bf16.msrb.mxu1 %v3724_v53  ;;  %v4562_v53 = vld [vmem:[#allocation6 + $0x62c] sm:$0xf]  ;;  %v3660_v60 = vor.u32 %v4530_v50, %v3657_v52  ;;  %v4119_v50 = vld [vmem:[#allocation9 + $0xd0] sm:$0xf] }
 0x10d   :  { %2127 = vmatpush.bf16.msrb.mxu2 %v3852_v54  ;;  %v3785_v54 = vld [vmem:[#allocation6 + $0x638] sm:$0xf0]  ;;  %v1771_v32 = vadd.f32 %v5053_v28, %v1757_v30 }
 0x10e   :  { %2141 = vmatpush.bf16.msrb.mxu3 %v3980_v59  ;;  %v3532_v59 = vor.u32 %v4498_v46, %v3529_v48  ;;  %v3788_v61 = vor.u32 %v4562_v53, %v3785_v54  ;;  %v4055_v46 = vld [vmem:[#allocation9 + $0x50] sm:$0xf]  ;;  %v4632_v48 = vld [vmem:[#allocation9 + $0x54] sm:$0xf0] }
 0x10f   :  { %2100 = vmatpush.bf16.msrb.mxu0 %v3580_v10  ;;  %v3641_v10 = vld [vmem:[#allocation6 + $0x518] sm:$0xf0]  ;;  %v4056_v52 = vor.u32 %v4632_v48, %v4055_v46  ;;  %v4191_v46 = vld [vmem:[#allocation9 + $0x160] sm:$0xf]  ;;  %v4666_v48 = vld [vmem:[#allocation9 + $0x164] sm:$0xf0] }
 0x110   :  { %2114 = vmatpush.bf16.msrb.mxu1 %v3708_v2  ;;  %v3916_v2 = vor.u32 %v4594_v56, %v3913_v1  ;;  %v4047_v56 = vld [vmem:[#allocation9 + $0x40] sm:$0xf]  ;;  %v4630_v1 = vld [vmem:[#allocation9 + $0x44] sm:$0xf0]  ;;  %v4644_v28 = vld [vmem:[#allocation9 + $0xb4] sm:$0xf0] }
 0x111   :  { %2128 = vmatpush.bf16.msrb.mxu2 %v3836_v4  ;;  %v4558_v4 = vld [vmem:[#allocation6 + $0x60c] sm:$0xf] }
 0x112   :  { %2142 = vmatpush.bf16.msrb.mxu3 %v3964_v11  ;;  %v4071_v11 = vld [vmem:[#allocation9 + $0x70] sm:$0xf] }
 0x113   :  { %2101 = vmatpush.bf16.msrb.mxu0 %v3564_v20  ;;  %v1854_v20 = vpop.f32.mrf.mxu2  ;;  %v1870_v55 = vpop.f32.mrf.mxu3 }
 0x114   :  { %2115 = vmatpush.bf16.msrb.mxu1 %v3692_v21  ;;  %v3644_v21 = vor.u32 %v4526_v63, %v3641_v10  ;;  %v1855_v49 = vadd.f32 %v1854_v20, %v1841_v27  ;;  %v4039_v63 = vld [vmem:[#allocation9 + $0x30] sm:$0xf]  ;;  %v4628_v10 = vld [vmem:[#allocation9 + $0x34] sm:$0xf0]  ;;  %v4095_v20 = vld [vmem:[#allocation9 + $0xa0] sm:$0xf] }
 0x115   :  { %2129 = vmatpush.bf16.msrb.mxu2 %v3820_v22  ;;  %v3772_v22 = vor.u32 %v4558_v4, %v3769_v5  ;;  %v4103_v5 = vld [vmem:[#allocation9 + $0xb0] sm:$0xf]  ;;  %v4040_v7 = vor.u32 %v4628_v10, %v4039_v63 }
 0x116   :  { %2143 = vmatpush.bf16.msrb.mxu3 %v3948_v26  ;;  %v4072_v26 = vor.u32 %v4636_v12, %v4071_v11  ;;  %v1869_v54 = vadd.f32 %v1868_v23, %v1855_v49  ;;  %v4104_v12 = vor.u32 %v4644_v28, %v4103_v5  ;;  %v4633_v5 = vld [vmem:[#allocation9 + $0x64] sm:$0xf]  ;;  %v4065_v28 = vld [vmem:[#allocation9 + $0x68] sm:$0xf0] }
 0x117   :  { %2102 = vmatpush.bf16.msrb.mxu0 %v3548_v37  ;;  %v4650_v37 = vld [vmem:[#allocation9 + $0xe4] sm:$0xf0] }
 0x118   :  { %2116 = vmatpush.bf16.msrb.mxu1 %v3676_v40  ;;  %v1842_v40 = vpop.f32.mrf.mxu1  ;;  %v4128_v42 = vor.u32 %v4650_v37, %v4127_v35 }
 0x119   :  { %2130 = vmatpush.bf16.msrb.mxu2 %v3804_v41  ;;  %v1745_v41 = vadd.f32 %v5049_v14, %v1731_v24  ;;  %v1843_v17 = vadd.f32 %v1842_v40, %v1828_v31  ;;  %v4087_v40 = vld [vmem:[#allocation9 + $0x90] sm:$0xf] }
 0x11a   :  { %2144 = vmatpush.bf16.msrb.mxu3 %v3932_v51  ;;  %v4648_v51 = vld [vmem:[#allocation9 + $0xd4] sm:$0xf0] }
 0x11b   :  { %2103 = vmatpush.bf16.msrb.mxu0 %v3532_v59  ;;  %v1759_v14 = vadd.f32 %v5051_v18, %v1745_v41  ;;  %v1856_v53 = vpop.f32.mrf.mxu2  ;;  %v4646_v59 = vld [vmem:[#allocation9 + $0xc4] sm:$0xf0]  ;;  %v4640_v41 = vld [vmem:[#allocation9 + $0x94] sm:$0xf0] }
 0x11c   :  { %2117 = vmatpush.bf16.msrb.mxu1 %v3660_v60  ;;  %v1857_v6 = vadd.f32 %v1856_v53, %v1843_v17  ;;  %v4192_v53 = vor.u32 %v4666_v48, %v4191_v46  ;;  %v4656_v46 = vld [vmem:[#allocation9 + $0x114] sm:$0xf0]  ;;  %v4643_v48 = vld [vmem:[#allocation9 + $0xb4] sm:$0xf] }
 0x11d   :  { %2131 = vmatpush.bf16.msrb.mxu2 %v3788_v61 }
 0x11e   :  { %2145 = vmatpush.bf16.msrb.mxu3 %v3916_v2  ;;  %v1785_v2 = vadd.f32 %v5055_v33, %v1771_v32  ;;  %v5091_v33 = vld [vmem:[#allocation8] sm:$0xf] }
 0x11f   :  { %2104 = vmatpush.bf16.msrb.mxu0 %v3516_v15  ;;  %v1882_v60 = vpop.f32.mrf.mxu0  ;;  %v4626_v15 = vld [vmem:[#allocation9 + $0x24] sm:$0xf0]  ;;  %v2182_v35 = vperm.slane %v5091_v33, 0 }
 0x120   :  { %2118 = vmatpush.bf16.msrb.mxu1 %v3644_v21  ;;  %v1896_v18 = vpop.f32.mrf.mxu1  ;;  %v1883_v61 = vadd.f32 %v1882_v60, %v1869_v54  ;;  %v1799_v16 = vadd.f32 %v5061_v57, %v1785_v2  ;;  %v4642_v21 = vld [vmem:[#allocation9 + $0xa4] sm:$0xf0]  ;;  %v4624_v57 = vld [vmem:[#allocation9 + $0x14] sm:$0xf0] }
 0x121   :  { %2132 = vmatpush.bf16.msrb.mxu2 %v3772_v22  ;;  %v4096_v31 = vor.u32 %v4642_v21, %v4095_v20  ;;  %v4024_v49 = vor.u32 %v4624_v57, %v4023_v3  ;;  %v4167_v21 = vld [vmem:[#allocation9 + $0x130] sm:$0xf]  ;;  %v4629_v3 = vld [vmem:[#allocation9 + $0x44] sm:$0xf]  ;;  %v4049_v57 = vld [vmem:[#allocation9 + $0x48] sm:$0xf0] }
 0x122   :  { %2146 = vmatpush.bf16.msrb.mxu3 %v3900_v25  ;;  %2105 = vmatmul.bf16.vlgmr.msrb.gmra.mxu0 %v5009_v39  ;;  %v4120_v39 = vor.u32 %v4648_v51, %v4119_v50  ;;  %v1897_v11 = vadd.f32 %v1896_v18, %v1883_v61  ;;  %v4199_v25 = vld [vmem:[#allocation9 + $0x170] sm:$0xf]  ;;  %v1813_v34 = vadd.f32 %v5063_v62, %v1799_v16  ;;  %v4079_v62 = vld [vmem:[#allocation9 + $0x80] sm:$0xf]  ;;  %v4664_v18 = vld [vmem:[#allocation9 + $0x154] sm:$0xf0] }
 0x123   :  { %2600 = vmatpush.bf16.msra.mxu0 %v4072_v26  ;;  %2119 = vmatmul.bf16.vlgmr.msrb.gmra.mxu1 %v5013_v44  ;;  %v1773_v44 = vadd.f32 %v5065_v0, %v1759_v14  ;;  %v4668_v26 = vld [vmem:[#allocation9 + $0x174] sm:$0xf0]  ;;  %v4088_v51 = vor.u32 %v4640_v41, %v4087_v40  ;;  %v4622_v14 = vld [vmem:[#allocation9 + $0x4] sm:$0xf0]  ;;  %v4052_v40 = vor.u32 %v4629_v3, %v4049_v57  ;;  %v4627_v41 = vld [vmem:[#allocation9 + $0x34] sm:$0xf] }
 0x124   :  { %2614 = vmatpush.bf16.msra.mxu1 %v4136_v29  ;;  %2133 = vmatmul.bf16.vlgmr.msrb.gmra.mxu2 %v5011_v43  ;;  %v4111_v43 = vld [vmem:[#allocation9 + $0xc0] sm:$0xf]  ;;  %v4200_v9 = vor.u32 %v4668_v26, %v4199_v25  ;;  %v2190_v54 = vadd.f32 %v2182_v35, %v1813_v34  ;;  %v4647_v25 = vld [vmem:[#allocation9 + $0xd4] sm:$0xf]  ;;  %v4121_v26 = vld [vmem:[#allocation9 + $0xd8] sm:$0xf0] }
 0x125   :  { %2147 = vmatmul.bf16.vlgmr.msrb.gmra.mxu3 %v5015_v47  ;;  %v4048_v47 = vor.u32 %v4630_v1, %v4047_v56  ;;  %v4112_v58 = vor.u32 %v4646_v59, %v4111_v43  ;;  %v1787_v4 = vadd.f32 %v5067_v8, %v1773_v44  ;;  %v1871_v8 = vadd.f32 %v1870_v55, %v1857_v6  ;;  %v4635_v55 = vld [vmem:[#allocation9 + $0x74] sm:$0xf]  ;;  %v4073_v56 = vld [vmem:[#allocation9 + $0x78] sm:$0xf0]  ;;  %v4113_v34 = vld [vmem:[#allocation9 + $0xc8] sm:$0xf0] }
 0x126   :  { %2628 = vmatpush.bf16.msra.mxu2 %v4200_v9  ;;  %v4651_v44 = vld [vmem:[#allocation9 + $0xf4] sm:$0xf]  ;;  %v4137_v43 = vld [vmem:[#allocation9 + $0xf8] sm:$0xf0]  ;;  %v4076_v63 = vor.u32 %v4635_v55, %v4073_v56  ;;  %v2198_v2 = vmax.f32 %v2190_v54, 0.0 }
 0x127   :  { %2601 = vmatpush.bf16.msra.mxu0 %v4064_v45  ;;  %v1801_v0 = vadd.f32 %v5069_v36, %v1787_v4  ;;  %v1910_v19 = vpop.f32.mrf.mxu2  ;;  %v1884_v22 = vpop.f32.mrf.mxu0  ;;  %v4032_v36 = vor.u32 %v4626_v15, %v4031_v13  ;;  %v4140_v4 = vor.u32 %v4651_v44, %v4137_v43  ;;  %v4662_v13 = vld [vmem:[#allocation9 + $0x144] sm:$0xf0]  ;;  %v4645_v9 = vld [vmem:[#allocation9 + $0xc4] sm:$0xf]  ;;  %v4097_v54 = vld [vmem:[#allocation9 + $0xa8] sm:$0xf0] }
 0x128   :  { %2615 = vmatpush.bf16.msra.mxu1 %v4128_v42  ;;  %v1924_v23 = vpop.f32.mrf.mxu3  ;;  %v1911_v27 = vadd.f32 %v1910_v19, %v1897_v11  ;;  %v1885_v29 = vadd.f32 %v1884_v22, %v1871_v8  ;;  %v1898_v37 = vpop.f32.mrf.mxu1  ;;  %v4015_v42 = vld [vmem:[#allocation9] sm:$0xf]  ;;  %v4068_v19 = vor.u32 %v4633_v5, %v4065_v28  ;;  %v4660_v8 = vld [vmem:[#allocation9 + $0x134] sm:$0xf0]  ;;  %v4654_v55 = vld [vmem:[#allocation9 + $0x104] sm:$0xf0] }
 0x129   :  { %v1815_v24 = vadd.f32 %v5071_v38, %v1801_v0  ;;  %v2183_v38 = vperm.slane %v5091_v33, 1  ;;  %v4016_v17 = vor.u32 %v4622_v14, %v4015_v42  ;;  %v4649_v0 = vld [vmem:[#allocation9 + $0xe4] sm:$0xf]  ;;  %v4151_v42 = vld [vmem:[#allocation9 + $0x110] sm:$0xf] }
 0x12a   :  { %v1925_v30 = vadd.f32 %v1924_v23, %v1911_v27  ;;  %v1899_v50 = vadd.f32 %v1898_v37, %v1885_v29  ;;  %2629 = vmatpush.bf16.msra.mxu2 %v4192_v53  ;;  %v4631_v23 = vld [vmem:[#allocation9 + $0x54] sm:$0xf]  ;;  %v4168_v27 = vor.u32 %v4660_v8, %v4167_v21  ;;  %v4658_v37 = vld [vmem:[#allocation9 + $0x124] sm:$0xf0]  ;;  %v4641_v53 = vld [vmem:[#allocation9 + $0xa4] sm:$0xf] }
 0x12b   :  { %2602 = vmatpush.bf16.msra.mxu0 %v4056_v52  ;;  %v2194_v45 = vadd.f32 %v2182_v35, %v1815_v24  ;;  %v4638_v52 = vld [vmem:[#allocation9 + $0x84] sm:$0xf0]  ;;  %v4057_v24 = vld [vmem:[#allocation9 + $0x58] sm:$0xf0]  ;;  %v4159_v35 = vld [vmem:[#allocation9 + $0x120] sm:$0xf]  ;;  %v4100_v43 = vor.u32 %v4641_v53, %v4097_v54 }
 0x12c   :  { %2616 = vmatpush.bf16.msra.mxu1 %v4120_v39  ;;  %v4080_v60 = vor.u32 %v4638_v52, %v4079_v62  ;;  %v2191_v61 = vadd.f32 %v2183_v38, %v1925_v30  ;;  %v4060_v29 = vor.u32 %v4631_v23, %v4057_v24  ;;  %v4105_v30 = vld [vmem:[#allocation9 + $0xb8] sm:$0xf0]  ;;  %v4625_v62 = vld [vmem:[#allocation9 + $0x24] sm:$0xf]  ;;  %v4033_v52 = vld [vmem:[#allocation9 + $0x28] sm:$0xf0] }
 0x12d   :  { %v2202_v59 = vmax.f32 %v2194_v45, 0.0  ;;  %v4116_v45 = vor.u32 %v4645_v9, %v4113_v34  ;;  %v4108_v14 = vor.u32 %v4643_v48, %v4105_v30  ;;  %v4036_v56 = vor.u32 %v4625_v62, %v4033_v52  ;;  %v4201_v44 = vld [vmem:[#allocation9 + $0x178] sm:$0xf0]  ;;  %v4621_v5 = vld [vmem:[#allocation9 + $0x4] sm:$0xf] }
 0x12e   :  { %v2199_v15 = vmax.f32 %v2191_v61, 0.0  ;;  %v4089_v61 = vld [vmem:[#allocation9 + $0x98] sm:$0xf0]  ;;  %v4017_v28 = vld [vmem:[#allocation9 + $0x8] sm:$0xf0] }
 0x12f   :  { %2603 = vmatpush.bf16.msra.mxu0 %v4048_v47  ;;  %v1912_v39 = vpop.f32.mrf.mxu2  ;;  %v4183_v47 = vld [vmem:[#allocation9 + $0x150] sm:$0xf]  ;;  %v5097_v11 = vpack.c.bf16 %v2202_v59, %v2198_v2  ;;  %v4623_v59 = vld [vmem:[#allocation9 + $0x14] sm:$0xf]  ;;  %v4193_v2 = vld [vmem:[#allocation9 + $0x168] sm:$0xf0] }
 0x130   :  { %2617 = vmatpush.bf16.msra.mxu1 %v4112_v58  ;;  %v1913_v1 = vadd.f32 %v1912_v39, %v1899_v50  ;;  %v1926_v32 = vpop.f32.mrf.mxu3  ;;  %v4184_v10 = vor.u32 %v4664_v18, %v4183_v47  ;;  %v4152_v50 = vor.u32 %v4656_v46, %v4151_v42  ;;  %v4143_v39 = vld [vmem:[#allocation9 + $0x100] sm:$0xf]  ;;  %v4639_v18 = vld [vmem:[#allocation9 + $0x94] sm:$0xf]  ;;  %v4661_v23 = vld [vmem:[#allocation9 + $0x144] sm:$0xf] }
 0x131   :  { %v4177_v24 = vld [vmem:[#allocation9 + $0x148] sm:$0xf0]  ;;  %v4657_v3 = vld [vmem:[#allocation9 + $0x124] sm:$0xf]  ;;  %v4684_v62 = vld [vmem:[#allocation9 + $0x1f4] sm:$0xf0] }
 0x132   :  { %v1927_v58 = vadd.f32 %v1926_v32, %v1913_v1  ;;  %2630 = vmatpush.bf16.msra.mxu2 %v4184_v10  ;;  %v4144_v1 = vor.u32 %v4654_v55, %v4143_v39  ;;  %v4667_v32 = vld [vmem:[#allocation9 + $0x174] sm:$0xf]  ;;  %v4665_v10 = vld [vmem:[#allocation9 + $0x164] sm:$0xf]  ;;  %v4161_v9 = vld [vmem:[#allocation9 + $0x128] sm:$0xf0] }
 0x133   :  { %2604 = vmatpush.bf16.msra.mxu0 %v4040_v7  ;;  %v4129_v7 = vld [vmem:[#allocation9 + $0xe8] sm:$0xf0] }
 0x134   :  { %2618 = vmatpush.bf16.msra.mxu1 %v4104_v12  ;;  %v2195_v6 = vadd.f32 %v2183_v38, %v1927_v58  ;;  %v4175_v12 = vld [vmem:[#allocation9 + $0x140] sm:$0xf]  ;;  %v4132_v22 = vor.u32 %v4649_v0, %v4129_v7  ;;  %v4160_v38 = vor.u32 %v4658_v37, %v4159_v35  ;;  %v4637_v0 = vld [vmem:[#allocation9 + $0x84] sm:$0xf]  ;;  %v4081_v7 = vld [vmem:[#allocation9 + $0x88] sm:$0xf0]  ;;  %v4164_v35 = vor.u32 %v4657_v3, %v4161_v9 }
 0x135   :  { %v4176_v20 = vor.u32 %v4662_v13, %v4175_v12  ;;  %v4020_v12 = vor.u32 %v4621_v5, %v4017_v28  ;;  %v4663_v13 = vld [vmem:[#allocation9 + $0x154] sm:$0xf]  ;;  %v4145_v30 = vld [vmem:[#allocation9 + $0x108] sm:$0xf0]  ;;  %v4265_v3 = vld [vmem:[#allocation9 + $0x1f8] sm:$0xf0] }
 0x136   :  { %v2203_v16 = vmax.f32 %v2195_v6, 0.0  ;;  %v4196_v6 = vor.u32 %v4665_v10, %v4193_v2  ;;  %v4239_v10 = vld [vmem:[#allocation9 + $0x1c0] sm:$0xf]  ;;  %v4678_v2 = vld [vmem:[#allocation9 + $0x1c4] sm:$0xf0] }
 0x137   :  { %2605 = vmatpush.bf16.msra.mxu0 %v4032_v36  ;;  %2631 = vmatpush.bf16.msra.mxu2 %v4176_v20  ;;  %v4240_v28 = vor.u32 %v4678_v2, %v4239_v10  ;;  %v4681_v9 = vld [vmem:[#allocation9 + $0x1e4] sm:$0xf] }
 0x138   :  { %2619 = vmatpush.bf16.msra.mxu1 %v4096_v31  ;;  %v5099_v36 = vpack.c.bf16 %v2203_v16, %v2199_v15  ;;  %v4124_v31 = vor.u32 %v4647_v25, %v4121_v26  ;;  %v4185_v15 = vld [vmem:[#allocation9 + $0x158] sm:$0xf0]  ;;  %v4084_v16 = vor.u32 %v4637_v0, %v4081_v7  ;;  %v4180_v26 = vor.u32 %v4661_v23, %v4177_v24  ;;  %v4231_v7 = vld [vmem:[#allocation9 + $0x1b0] sm:$0xf]  ;;  %v4672_v24 = vld [vmem:[#allocation9 + $0x194] sm:$0xf0] }
 0x139   :  { %v4188_v20 = vor.u32 %v4663_v13, %v4185_v15  ;;  %v4215_v23 = vld [vmem:[#allocation9 + $0x190] sm:$0xf] }
 0x13b   :  { %2606 = vmatpush.bf16.msra.mxu0 %v4024_v49  ;;  %2632 = vmatpush.bf16.msra.mxu2 %v4168_v27  ;;  %v4041_v49 = vld [vmem:[#allocation9 + $0x38] sm:$0xf0] }
 0x13c   :  { %2620 = vmatpush.bf16.msra.mxu1 %v4088_v51  ;;  %v4044_v51 = vor.u32 %v4627_v41, %v4041_v49  ;;  %v4655_v41 = vld [vmem:[#allocation9 + $0x114] sm:$0xf] }
 0x13f   :  { %2607 = vmatpush.bf16.msra.mxu0 %v4016_v17  ;;  %2633 = vmatpush.bf16.msra.mxu2 %v4160_v38  ;;  %v4025_v17 = vld [vmem:[#allocation9 + $0x18] sm:$0xf0]  ;;  %v1938_v47 = vpop.f32.mrf.mxu0 }
 0x140   :  { %2621 = vmatpush.bf16.msra.mxu1 %v4080_v60  ;;  %v4204_v60 = vor.u32 %v4667_v32, %v4201_v44  ;;  %v1952_v58 = vpop.f32.mrf.mxu1  ;;  %v4153_v38 = vld [vmem:[#allocation9 + $0x118] sm:$0xf0]  ;;  %v4255_v32 = vld [vmem:[#allocation9 + $0x1e0] sm:$0xf]  ;;  %v4682_v44 = vld [vmem:[#allocation9 + $0x1e4] sm:$0xf0] }
 0x141   :  { %v1953_v8 = vadd.f32 %v1952_v58, %v1938_v47 }
 0x142   :  { %2608 = vmatmul.bf16.vlgmr.msra.gmra.mxu0 %v5097_v11 }
 0x143   :  { %2656 = vmatpush.bf16.msrb.mxu0 %v4076_v63  ;;  %2622 = vmatmul.bf16.vlgmr.msra.gmra.mxu1 %v5099_v36  ;;  %v4028_v63 = vor.u32 %v4623_v59, %v4025_v17  ;;  %v4256_v59 = vor.u32 %v4682_v44, %v4255_v32  ;;  %v4247_v17 = vld [vmem:[#allocation9 + $0x1d0] sm:$0xf]  ;;  %v4671_v44 = vld [vmem:[#allocation9 + $0x194] sm:$0xf] }
 0x144   :  { %2670 = vmatpush.bf16.msrb.mxu1 %v4140_v4  ;;  %2634 = vmatpush.bf16.msra.mxu2 %v4152_v50  ;;  %v4092_v4 = vor.u32 %v4639_v18, %v4089_v61  ;;  %v4263_v50 = vld [vmem:[#allocation9 + $0x1f0] sm:$0xf]  ;;  %v2184_v18 = vperm.slane %v5091_v33, 2 }
 0x145   :  { %v4264_v53 = vor.u32 %v4684_v62, %v4263_v50  ;;  %v4233_v50 = vld [vmem:[#allocation9 + $0x1b8] sm:$0xf0] }
 0x147   :  { %2657 = vmatpush.bf16.msrb.mxu0 %v4068_v19  ;;  %v1966_v19 = vpop.f32.mrf.mxu2  ;;  %2642 = vmatpush.bf16.msra.mxu3 %v4264_v53  ;;  %v4225_v53 = vld [vmem:[#allocation9 + $0x1a8] sm:$0xf0] }
 0x148   :  { %2671 = vmatpush.bf16.msrb.mxu1 %v4132_v22  ;;  %2635 = vmatpush.bf16.msra.mxu2 %v4144_v1  ;;  %v1980_v21 = vpop.f32.mrf.mxu3  ;;  %v1940_v22 = vpop.f32.mrf.mxu0  ;;  %v1967_v27 = vadd.f32 %v1966_v19, %v1953_v8  ;;  %v4674_v8 = vld [vmem:[#allocation9 + $0x1a4] sm:$0xf0] }
 0x149   :  { %v1954_v25 = vpop.f32.mrf.mxu1 }
 0x14a   :  { %v1981_v37 = vadd.f32 %v1980_v21, %v1967_v27  ;;  %v4223_v21 = vld [vmem:[#allocation9 + $0x1a0] sm:$0xf]  ;;  %v4670_v27 = vld [vmem:[#allocation9 + $0x184] sm:$0xf0] }
 0x14b   :  { %2658 = vmatpush.bf16.msrb.mxu0 %v4060_v29  ;;  %v4659_v29 = vld [vmem:[#allocation9 + $0x134] sm:$0xf]  ;;  %2643 = vmatpush.bf16.msra.mxu3 %v4256_v59 }
 0x14c   :  { %2672 = vmatpush.bf16.msrb.mxu1 %v4124_v31  ;;  %2684 = vmatpush.bf16.msrb.mxu2 %v4204_v60  ;;  %v4169_v31 = vld [vmem:[#allocation9 + $0x138] sm:$0xf0]  ;;  %v4680_v60 = vld [vmem:[#allocation9 + $0x1d4] sm:$0xf0] }
 0x14d   :  { %v4172_v57 = vor.u32 %v4659_v29, %v4169_v31  ;;  %v4248_v58 = vor.u32 %v4680_v60, %v4247_v17  ;;  %v4683_v31 = vld [vmem:[#allocation9 + $0x1f4] sm:$0xf] }
 0x14f   :  { %2659 = vmatpush.bf16.msrb.mxu0 %v4052_v40  ;;  %v1968_v34 = vpop.f32.mrf.mxu2  ;;  %2644 = vmatpush.bf16.msra.mxu3 %v4248_v58  ;;  %v4209_v58 = vld [vmem:[#allocation9 + $0x188] sm:$0xf0] }
 0x150   :  { %2673 = vmatpush.bf16.msrb.mxu1 %v4116_v45  ;;  %2685 = vmatpush.bf16.msrb.mxu2 %v4196_v6  ;;  %v1982_v40 = vpop.f32.mrf.mxu3  ;;  %v1955_v45 = vadd.f32 %v1954_v25, %v1940_v22  ;;  %v4224_v22 = vor.u32 %v4674_v8, %v4223_v21  ;;  %v4216_v25 = vor.u32 %v4672_v24, %v4215_v23 }
 0x152   :  { %v1969_v48 = vadd.f32 %v1968_v34, %v1955_v45  ;;  %v4257_v34 = vld [vmem:[#allocation9 + $0x1e8] sm:$0xf0] }
 0x153   :  { %2660 = vmatpush.bf16.msrb.mxu0 %v4044_v51  ;;  %2645 = vmatpush.bf16.msra.mxu3 %v4240_v28 }
 0x154   :  { %2674 = vmatpush.bf16.msrb.mxu1 %v4108_v14  ;;  %2686 = vmatpush.bf16.msrb.mxu2 %v4188_v20  ;;  %v1983_v54 = vadd.f32 %v1982_v40, %v1969_v48 }
 0x157   :  { %2661 = vmatpush.bf16.msrb.mxu0 %v4036_v56 }
 0x158   :  { %2675 = vmatpush.bf16.msrb.mxu1 %v4100_v43  ;;  %2687 = vmatpush.bf16.msrb.mxu2 %v4180_v26  ;;  %v4207_v26 = vld [vmem:[#allocation9 + $0x180] sm:$0xf] }
 0x159   :  { %v4208_v29 = vor.u32 %v4670_v27, %v4207_v26  ;;  %v4692_v26 = vld [vmem:[#allocation11 + $0x38] sm:$0xff]  ;;  %v4691_v27 = vld [vmem:[#allocation11 + $0x30] sm:$0xff] }
 0x15b   :  { %2662 = vmatpush.bf16.msrb.mxu0 %v4028_v63 }
 0x15c   :  { %2676 = vmatpush.bf16.msrb.mxu1 %v4092_v4  ;;  %2688 = vmatpush.bf16.msrb.mxu2 %v4172_v57  ;;  %v4268_v57 = vor.u32 %v4683_v31, %v4265_v3  ;;  %v4689_v31 = vld [vmem:[#allocation11 + $0x20] sm:$0xff]  ;;  %v4700_v3 = vld [vmem:[#allocation11 + $0x78] sm:$0xff] }
 0x15f   :  { %2663 = vmatpush.bf16.msrb.mxu0 %v4020_v12  ;;  %v1994_v49 = vpop.f32.mrf.mxu0  ;;  %v4676_v12 = vld [vmem:[#allocation9 + $0x1b4] sm:$0xf0] }
 0x160   :  { %2677 = vmatpush.bf16.msrb.mxu1 %v4084_v16  ;;  %v2008_v42 = vpop.f32.mrf.mxu1  ;;  %2689 = vmatpush.bf16.msrb.mxu2 %v4164_v35  ;;  %v1995_v46 = vadd.f32 %v1994_v49, %v1981_v37  ;;  %v4232_v15 = vor.u32 %v4676_v12, %v4231_v7  ;;  %v4260_v37 = vor.u32 %v4681_v9, %v4257_v34  ;;  %v4699_v9 = vld [vmem:[#allocation11 + $0x70] sm:$0xff]  ;;  %v4686_v34 = vld [vmem:[#allocation11 + $0x8] sm:$0xff] }
 0x162   :  { %2664 = vmatmul.bf16.vlgmr.msrb.gmra.mxu0 %v5097_v11  ;;  %v4156_v11 = vor.u32 %v4655_v41, %v4153_v38  ;;  %v2009_v51 = vadd.f32 %v2008_v42, %v1995_v46  ;;  %2646 = vmatpush.bf16.msra.mxu3 %v4232_v15  ;;  %v4679_v41 = vld [vmem:[#allocation9 + $0x1d4] sm:$0xf]  ;;  %v4249_v38 = vld [vmem:[#allocation9 + $0x1d8] sm:$0xf0]  ;;  %v4677_v42 = vld [vmem:[#allocation9 + $0x1c4] sm:$0xf] }
 0x163   :  { %2678 = vmatmul.bf16.vlgmr.msrb.gmra.mxu1 %v5099_v36  ;;  %v4653_v36 = vld [vmem:[#allocation9 + $0x104] sm:$0xf]  ;;  %v4252_v45 = vor.u32 %v4679_v41, %v4249_v38  ;;  %2850 = vmatpush.bf16.msra.mxu0 %v4692_v26  ;;  %v4696_v41 = vld [vmem:[#allocation11 + $0x58] sm:$0xff] }
 0x164   :  { %2690 = vmatpush.bf16.msrb.mxu2 %v4156_v11  ;;  %v4148_v14 = vor.u32 %v4653_v36, %v4145_v30  ;;  %v4241_v11 = vld [vmem:[#allocation9 + $0x1c8] sm:$0xf0]  ;;  %v4675_v30 = vld [vmem:[#allocation9 + $0x1b4] sm:$0xf]  ;;  %2864 = vmatpush.bf16.msra.mxu1 %v4700_v3  ;;  %v4701_v26 = vld [vmem:[#allocation12] sm:$0xff] }
 0x165   :  { %v4244_v48 = vor.u32 %v4677_v42, %v4241_v11  ;;  %v4694_v42 = vld [vmem:[#allocation11 + $0x48] sm:$0xff] }
 0x166   :  { %2647 = vmatpush.bf16.msra.mxu3 %v4224_v22 }
 0x167   :  { %v2022_v52 = vpop.f32.mrf.mxu2  ;;  %v1996_v39 = vpop.f32.mrf.mxu0  ;;  %2851 = vmatpush.bf16.msra.mxu0 %v4691_v27 }
 0x168   :  { %v2036_v55 = vpop.f32.mrf.mxu3  ;;  %2691 = vmatpush.bf16.msrb.mxu2 %v4148_v14  ;;  %v2023_v56 = vadd.f32 %v2022_v52, %v2009_v51  ;;  %v1997_v1 = vadd.f32 %v1996_v39, %v1983_v54  ;;  %v2010_v43 = vpop.f32.mrf.mxu1  ;;  %v4236_v14 = vor.u32 %v4675_v30, %v4233_v50  ;;  %v4673_v52 = vld [vmem:[#allocation9 + $0x1a4] sm:$0xf]  ;;  %2865 = vmatpush.bf16.msra.mxu1 %v4699_v9 }
 0x169   :  { %v4228_v39 = vor.u32 %v4673_v52, %v4225_v53 }
 0x16a   :  { %v2037_v47 = vadd.f32 %v2036_v55, %v2023_v56  ;;  %v2011_v61 = vadd.f32 %v2010_v43, %v1997_v1  ;;  %2648 = vmatpush.bf16.msra.mxu3 %v4216_v25  ;;  %v4217_v43 = vld [vmem:[#allocation9 + $0x198] sm:$0xf0] }
 0x16b   :  { %v4220_v17 = vor.u32 %v4671_v44, %v4217_v43 }
 0x16c   :  { %v2192_v6 = vadd.f32 %v2184_v18, %v2037_v47 }
 0x16e   :  { %v2200_v16 = vmax.f32 %v2192_v6, 0.0  ;;  %2649 = vmatpush.bf16.msra.mxu3 %v4208_v29  ;;  %v4690_v29 = vld [vmem:[#allocation11 + $0x28] sm:$0xff] }
 0x16f   :  { %v2024_v63 = vpop.f32.mrf.mxu2  ;;  %2852 = vmatpush.bf16.msra.mxu0 %v4690_v29 }
 0x170   :  { %v2025_v4 = vadd.f32 %v2024_v63, %v2011_v61  ;;  %v2038_v5 = vpop.f32.mrf.mxu3  ;;  %v4669_v61 = vld [vmem:[#allocation9 + $0x184] sm:$0xf] }
 0x171   :  { %v4212_v63 = vor.u32 %v4669_v61, %v4209_v58 }
 0x172   :  { %v2039_v0 = vadd.f32 %v2038_v5, %v2025_v4  ;;  %2698 = vmatpush.bf16.msrb.mxu3 %v4268_v57  ;;  %v4687_v57 = vld [vmem:[#allocation11 + $0x10] sm:$0xff] }
 0x173   :  { %2853 = vmatpush.bf16.msra.mxu0 %v4689_v31  ;;  %v4728_v31 = vld [vmem:[%s5128_s6] ss:$0 sm:$0xff] }
 0x174   :  { %v2196_v13 = vadd.f32 %v2184_v18, %v2039_v0 }
 0x176   :  { %v2204_v19 = vmax.f32 %v2196_v13, 0.0  ;;  %2699 = vmatpush.bf16.msrb.mxu3 %v4260_v37  ;;  %v2185_v13 = vperm.slane %v5091_v33, 3  ;;  %v4688_v33 = vld [vmem:[#allocation11 + $0x18] sm:$0xff]  ;;  %v4685_v37 = vld [vmem:[#allocation11] sm:$0xff] }
 0x177   :  { %2854 = vmatpush.bf16.msra.mxu0 %v4688_v33 }
 0x178   :  { %v2208_v20 = vpack.c.bf16 %v2204_v19, %v2200_v16 }
 0x17a   :  { %2636 = vmatmul.bf16.vlgmr.msra.gmra.mxu2 %v2208_v20  ;;  %2700 = vmatpush.bf16.msrb.mxu3 %v4252_v45  ;;  %v4695_v45 = vld [vmem:[#allocation11 + $0x50] sm:$0xff] }
 0x17b   :  { %2855 = vmatpush.bf16.msra.mxu0 %v4687_v57 }
 0x17e   :  { %2701 = vmatpush.bf16.msrb.mxu3 %v4244_v48  ;;  %v4693_v48 = vld [vmem:[#allocation11 + $0x40] sm:$0xff] }
 0x17f   :  { %v2050_v35 = vpop.f32.mrf.mxu0  ;;  %2856 = vmatpush.bf16.msra.mxu0 %v4686_v34 }
 0x180   :  { %v2064_v40 = vpop.f32.mrf.mxu1 }
 0x181   :  { %v2065_v51 = vadd.f32 %v2064_v40, %v2050_v35  ;;  %v4698_v35 = vld [vmem:[#allocation11 + $0x68] sm:$0xff]  ;;  %v4697_v40 = vld [vmem:[#allocation11 + $0x60] sm:$0xff] }
 0x182   :  { %2702 = vmatpush.bf16.msrb.mxu3 %v4236_v14  ;;  %2866 = vmatpush.bf16.msra.mxu1 %v4698_v35 }
 0x183   :  { %2857 = vmatpush.bf16.msra.mxu0 %v4685_v37 }
 0x186   :  { %2703 = vmatpush.bf16.msrb.mxu3 %v4228_v39  ;;  %2867 = vmatpush.bf16.msra.mxu1 %v4697_v40 }
 0x187   :  { %v2078_v49 = vpop.f32.mrf.mxu2  ;;  %v2052_v36 = vpop.f32.mrf.mxu0 }
 0x188   :  { %v2092_v46 = vpop.f32.mrf.mxu3  ;;  %v2066_v62 = vpop.f32.mrf.mxu1  ;;  %v2079_v54 = vadd.f32 %v2078_v49, %v2065_v51 }
 0x189   :  { %v2067_v56 = vadd.f32 %v2066_v62, %v2052_v36 }
 0x18a   :  { %2692 = vmatmul.bf16.vlgmr.msrb.gmra.mxu2 %v2208_v20  ;;  %v2093_v59 = vadd.f32 %v2092_v46, %v2079_v54  ;;  %2704 = vmatpush.bf16.msrb.mxu3 %v4220_v17  ;;  %v2274_v46 = vld [vmem:[%s5126_s4] sm:$0x3] }
 0x18b   :  { %2868 = vmatpush.bf16.msra.mxu1 %v4696_v41  ;;  %v2276_v30 = vperm.slane %v2274_v46, 0  ;;  %v2277_v17 = vperm.slane %v2274_v46, 1 }
 0x18e   :  { %2705 = vmatpush.bf16.msrb.mxu3 %v4212_v63 }
 0x18f   :  { %v2080_v55 = vpop.f32.mrf.mxu2  ;;  %2869 = vmatpush.bf16.msra.mxu1 %v4695_v45  ;;  %v4729_v45 = vld [vmem:[%s5130_s8] ss:$0 sm:$0xff] }
 0x190   :  { %v2094_v1 = vpop.f32.mrf.mxu3  ;;  %v2081_v47 = vadd.f32 %v2080_v55, %v2067_v56 }
 0x192   :  { %v2095_v2 = vadd.f32 %v2094_v1, %v2081_v47 }
 0x193   :  { %2870 = vmatpush.bf16.msra.mxu1 %v4694_v42 }
 0x197   :  { %2871 = vmatpush.bf16.msra.mxu1 %v4693_v48 }
 0x19f   :  { %v2106_v32 = vpop.f32.mrf.mxu0 }
 0x1a0   :  { %v2120_v60 = vpop.f32.mrf.mxu1  ;;  %v2107_v18 = vadd.f32 %v2106_v32, %v2093_v59 }
 0x1a2   :  { %v2121_v4 = vadd.f32 %v2120_v60, %v2107_v18 }
 0x1a7   :  { %v2134_v10 = vpop.f32.mrf.mxu2  ;;  %v2108_v28 = vpop.f32.mrf.mxu0 }
 0x1a8   :  { %v2148_v5 = vpop.f32.mrf.mxu3  ;;  %v2135_v6 = vadd.f32 %v2134_v10, %v2121_v4  ;;  %v2109_v0 = vadd.f32 %v2108_v28, %v2095_v2  ;;  %v2122_v7 = vpop.f32.mrf.mxu1 }
 0x1aa   :  { %v2149_v12 = vadd.f32 %v2148_v5, %v2135_v6  ;;  %v2123_v15 = vadd.f32 %v2122_v7, %v2109_v0 }
 0x1ac   :  { %v2193_v21 = vadd.f32 %v2185_v13, %v2149_v12 }
 0x1ae   :  { %v2201_v23 = vmax.f32 %v2193_v21, 0.0  ;;  %v4707_v21 = vld [vmem:[#allocation12 + $0x30] sm:$0xff] }
 0x1af   :  { %v2136_v16 = vpop.f32.mrf.mxu2 }
 0x1b0   :  { %v2137_v19 = vadd.f32 %v2136_v16, %v2123_v15  ;;  %v2150_v20 = vpop.f32.mrf.mxu3 }
 0x1b2   :  { %v2151_v8 = vadd.f32 %v2150_v20, %v2137_v19  ;;  %v4708_v20 = vld [vmem:[#allocation12 + $0x38] sm:$0xff] }
 0x1b3   :  { %2949 = vmatpush.bf16.msra.mxu2 %v4708_v20 }
 0x1b4   :  { %v2197_v22 = vadd.f32 %v2185_v13, %v2151_v8  ;;  %v4706_v8 = vld [vmem:[#allocation12 + $0x28] sm:$0xff] }
 0x1b6   :  { %v2205_v24 = vmax.f32 %v2197_v22, 0.0  ;;  %v4705_v22 = vld [vmem:[#allocation12 + $0x20] sm:$0xff] }
 0x1b7   :  { %2950 = vmatpush.bf16.msra.mxu2 %v4707_v21 }
 0x1b8   :  { %v2209_v25 = vpack.c.bf16 %v2205_v24, %v2201_v23  ;;  %v4704_v23 = vld [vmem:[#allocation12 + $0x18] sm:$0xff]  ;;  %v4703_v24 = vld [vmem:[#allocation12 + $0x10] sm:$0xff] }
 0x1ba   :  { %2650 = vmatmul.bf16.vlgmr.msra.gmra.mxu3 %v2209_v25 }
 0x1bb   :  { %2951 = vmatpush.bf16.msra.mxu2 %v4706_v8 }
 0x1bf   :  { %v2609_v38 = vpop.f32.mrf.mxu0  ;;  %2952 = vmatpush.bf16.msra.mxu2 %v4705_v22 }
 0x1c0   :  { %v2623_v11 = vpop.f32.mrf.mxu1  ;;  %v2610_v14 = vadd.f32 %v2609_v38, %v2276_v30 }
 0x1c2   :  { %v2624_v52 = vadd.f32 %v2623_v11, %v2610_v14 }
 0x1c3   :  { %2953 = vmatpush.bf16.msra.mxu2 %v4704_v23 }
 0x1c7   :  { %v2611_v36 = vpop.f32.mrf.mxu0  ;;  %2954 = vmatpush.bf16.msra.mxu2 %v4703_v24 }
 0x1c8   :  { %v2625_v62 = vpop.f32.mrf.mxu1  ;;  %v2612_v53 = vadd.f32 %v2611_v36, %v2276_v30 }
 0x1ca   :  { %2706 = vmatmul.bf16.vlgmr.msrb.gmra.mxu3 %v2209_v25  ;;  %v2626_v39 = vadd.f32 %v2625_v62, %v2612_v53  ;;  %v4702_v25 = vld [vmem:[#allocation12 + $0x8] sm:$0xff] }
 0x1cb   :  { %2955 = vmatpush.bf16.msra.mxu2 %v4702_v25 }
 0x1cf   :  { %2956 = vmatpush.bf16.msra.mxu2 %v4701_v26 }
 0x1df   :  { %v2665_v54 = vpop.f32.mrf.mxu0 }
 0x1e0   :  { %v2679_v43 = vpop.f32.mrf.mxu1  ;;  %v2666_v58 = vadd.f32 %v2665_v54, %v2277_v17 }
 0x1e2   :  { %v2680_v2 = vadd.f32 %v2679_v43, %v2666_v58 }
 0x1e7   :  { %v2667_v61 = vpop.f32.mrf.mxu0 }
 0x1e8   :  { %v2668_v10 = vadd.f32 %v2667_v61, %v2277_v17  ;;  %v2681_v4 = vpop.f32.mrf.mxu1 }
 0x1ea   :  { %v2682_v28 = vadd.f32 %v2681_v4, %v2668_v10 }
 0x1fd   :  { %v2637_v49 = vpop.f32.mrf.mxu2 }
 0x1fe   :  { %v2638_v55 = vadd.f32 %v2637_v49, %v2624_v52 }
 0x205   :  { %v2639_v50 = vpop.f32.mrf.mxu2 }
 0x206   :  { %v2640_v56 = vadd.f32 %v2639_v50, %v2626_v39 }
 0x20d   :  { %v2693_v59 = vpop.f32.mrf.mxu2 }
 0x20e   :  { %v2694_v6 = vadd.f32 %v2693_v59, %v2680_v2 }
 0x215   :  { %v2695_v5 = vpop.f32.mrf.mxu2 }
 0x216   :  { %v2696_v0 = vadd.f32 %v2695_v5, %v2682_v28 }
 0x23d   :  { %v2651_v51 = vpop.f32.mrf.mxu3 }
 0x23e   :  { %v2652_v1 = vadd.f32 %v2651_v51, %v2638_v55 }
 0x240   :  { %v2712_v60 = vmax.f32 %v2652_v1, 0.0 }
 0x245   :  { %v2653_v32 = vpop.f32.mrf.mxu3 }
 0x246   :  { %v2654_v44 = vadd.f32 %v2653_v32, %v2640_v56 }
 0x248   :  { %v2714_v47 = vmax.f32 %v2654_v44, 0.0 }
 0x24a   :  { %v2716_v18 = vpack.c.bf16 %v2714_v47, %v2712_v60 }
 0x24c   :  { %2858 = vmatmul.bf16.vlgmr.msra.gmra.mxu0 %v2716_v18 }
 0x24d   :  { %v2707_v63 = vpop.f32.mrf.mxu3 }
 0x24e   :  { %v2708_v7 = vadd.f32 %v2707_v63, %v2694_v6 }
 0x250   :  { %v2713_v15 = vmax.f32 %v2708_v7, 0.0 }
 0x255   :  { %v2709_v12 = vpop.f32.mrf.mxu3 }
 0x256   :  { %v2710_v13 = vadd.f32 %v2709_v12, %v2696_v0 }
 0x258   :  { %v2715_v16 = vmax.f32 %v2710_v13, 0.0 }
 0x25a   :  { %v2717_v19 = vpack.c.bf16 %v2715_v16, %v2713_v15 }
 0x25c   :  { %2872 = vmatmul.bf16.vlgmr.msra.gmra.mxu1 %v2717_v19 }
 0x2c9   :  { %v2859_v27 = vpop.f32.mrf.mxu0 }
 0x2ca   :  { %v2860_v3 = vadd.f32 %v4728_v31, %v2859_v27 }
 0x2d1   :  { %v2861_v33 = vpop.f32.mrf.mxu0 }
 0x2d2   :  { %v2862_v57 = vadd.f32 %v4728_v31, %v2861_v33 }
 0x2d9   :  { %v2873_v29 = vpop.f32.mrf.mxu1 }
 0x2da   :  { %v2874_v9 = vadd.f32 %v2873_v29, %v2860_v3 }
 0x2dc   :  { %v2878_v37 = vmax.f32 %v2874_v9, 0.0 }
 0x2e1   :  { %v2875_v34 = vpop.f32.mrf.mxu1 }
 0x2e2   :  { %v2876_v35 = vadd.f32 %v2875_v34, %v2862_v57 }
 0x2e4   :  { %v2879_v40 = vmax.f32 %v2876_v35, 0.0 }
 0x2e6   :  { %v2880_v41 = vpack.c.bf16 %v2879_v40, %v2878_v37 }
 0x2e8   :  { %2957 = vmatmul.bf16.vlgmr.msra.gmra.mxu2 %v2880_v41 }
 0x36b   :  { %v2958_v38 = vpop.f32.mrf.mxu2 }
 0x36c   :  { %v2959_v42 = vadd.f32 %v4729_v45, %v2958_v38 }
 0x373   :  { %v2960_v49 = vpop.f32.mrf.mxu2 }
 0x374   :  { %v2961_v11 = vadd.f32 %v4729_v45, %v2960_v49 }
 0x376   :  { %v4712_v46 = vpack.c.bf16 %v2961_v11, %v2959_v42 }
 0x378   :  { %4713 = vst [vmem:[#allocation14] sm:$0xff] %v4712_v46  }
 0x379   :  { %2979 = dma.vmem_to_hbm [thread:$0]  %s2972_s24, 128, %s2974_s26, [#allocation5], %s4916_s30, %s4916_s30, %s4919_s18  }
 0x37a   :  { %4906 = dma.done.wait [#allocation5], 128  }
 0x37b   :  { %4907 = vsyncadd [#allocation5], 4294967168 }
 0x37c   :  { %2984 = vsyncpa [#allocation4], 1 }
 0x37d   :  { %2985 = vsyncpa [#allocation7], 1 }
 0x37e   :  { %2986 = vsyncpa [#allocation10], 1 }
 0x37f   :  { %2987 = vsyncpa [#allocation13], 1 }
 0x380   :  { %2988 = vsyncpa [#allocation5], 1 }

// kernel: tpu_custom_call.1
= control target key start
LH: loop header
LB: loop body
LE: loop exit
PB: predicated region body
PF: predicated region fallthrough
CT: control target
= control target key end

     0   :  { %14 = vsyncpa [#allocation4], 0  ;;  %s5122_s0 = inlined_call_operand.hbm [shape: f32[16,1024], index: 0, kind: input, shape index: {}]   ;;  %s5123_s1 = inlined_call_operand.hbm [shape: bf16[1024,512], index: 1, kind: input, shape index: {}]   ;;  %s5124_s2 = inlined_call_operand.hbm [shape: f32[1,512], index: 2, kind: input, shape index: {}]   ;;  %s5125_s3 = inlined_call_operand.hbm [shape: bf16[512,256], index: 3, kind: input, shape index: {}]   ;;  %s5126_s4 = inlined_call_operand.vmem [shape: f32[1,256], index: 4, kind: input, shape index: {}]   ;;  %s5127_s5 = inlined_call_operand.hbm [shape: bf16[256,128], index: 5, kind: input, shape index: {}]   ;;  %s5128_s6 = inlined_call_operand.vmem [shape: f32[1,128], index: 6, kind: input, shape index: {}]   ;;  %s5129_s7 = inlined_call_operand.hbm [shape: bf16[128,128], index: 7, kind: input, shape index: {}]   ;;  %s5130_s8 = inlined_call_operand.vmem [shape: f32[1,128], index: 8, kind: input, shape index: {}]   ;;  %s5131_s9 = inlined_call_operand.hbm [shape: bf16[16,128], index: 9, kind: output, shape index: {}]  }
   0x1   :  { %15 = vsyncpa [#allocation7], 0 }
   0x2   :  { %16 = vsyncpa [#allocation10], 0 }
   0x3   :  { %17 = vsyncpa [#allocation13], 0  ;;  %s36_s11 = sshll.u32 %s5123_s1, 4  ;;  %s37_s11 = int_to_ptr.hbm [resolvable:$true] %s36_s11 }
   0x4   :  { %18 = vsyncpa [#allocation5], 0  ;;  %s4908_s12 = smov [#allocation6]   ;;  %s60_s16 = sshll.u32 %s5125_s3, 4  ;;  %s61_s16 = int_to_ptr.hbm [resolvable:$true] %s60_s16 }
   0x5   :  { %s38_s13 = sshll.u32 %s4908_s12, 4  ;;  %s4909_s17 = smov 256   ;;  %s39_s13 = int_to_ptr.vmem [resolvable:$true] %s38_s13 }
   0x6   :  { %s4910_s18 = smov 16   ;;  %s4911_s19 = smov [#allocation9]  }
   0x7   :  { %44 = dma.hbm_to_vmem [thread:$0]  %s37_s11, 32768, %s39_s13, [#allocation7], %s4909_s17, %s4909_s17, %s4910_s18  }
   0x8   :  { %s62_s20 = sshll.u32 %s4911_s19, 4  ;;  %s4912_s21 = smov 128   ;;  %s63_s20 = int_to_ptr.vmem [resolvable:$true] %s62_s20 }
   0x9   :  { %s4913_s22 = smov 8   ;;  %s23_s24 = sshll.u32 %s5122_s0, 4  ;;  %s24_s24 = int_to_ptr.hbm [resolvable:$true] %s23_s24 }
   0xa   :  { %68 = dma.hbm_to_vmem [thread:$0]  %s61_s16, 8192, %s63_s20, [#allocation10], %s4912_s21, %s4912_s21, %s4913_s22  }
   0xb   :  { %s4914_s25 = smov [#allocation3]   ;;  %s50_s28 = sshll.u32 %s5124_s2, 4  ;;  %s51_s28 = int_to_ptr.hbm [resolvable:$true] %s50_s28 }
   0xc   :  { %s25_s26 = sshll.u32 %s4914_s25, 4  ;;  %s4915_s29 = smov 1024   ;;  %s26_s26 = int_to_ptr.vmem [resolvable:$true] %s25_s26 }
   0xd   :  { %s4916_s30 = smov 64   ;;  %s4917_s10 = smov [#allocation8]  }
   0xe   :  { %31 = dma.hbm_to_vmem [thread:$0]  %s24_s24, 2048, %s26_s26, [#allocation4], %s4915_s29, %s4915_s29, %s4916_s30  }
   0xf   :  { %s52_s11 = sshll.u32 %s4917_s10, 4  ;;  %s75_s14 = sshll.u32 %s5127_s5, 4  ;;  %s53_s11 = int_to_ptr.vmem [resolvable:$true] %s52_s11  ;;  %s76_s14 = int_to_ptr.hbm [resolvable:$true] %s75_s14 }
  0x10   :  { %55 = dma.hbm_to_vmem [thread:$0]  %s51_s28, 64, %s53_s11, [#allocation7]  }
  0x11   :  { %s4918_s0 = smov [#allocation11]   ;;  %s90_s2 = sshll.u32 %s5129_s7, 4  ;;  %s91_s2 = int_to_ptr.hbm [resolvable:$true] %s90_s2 }
  0x12   :  { %s77_s15 = sshll.u32 %s4918_s0, 4  ;;  %s4919_s18 = smov 4   ;;  %s78_s15 = int_to_ptr.vmem [resolvable:$true] %s77_s15 }
  0x13   :  { %83 = dma.hbm_to_vmem [thread:$0]  %s76_s14, 2048, %s78_s15, [#allocation10], %s4916_s30, %s4916_s30, %s4919_s18  }
  0x14   :  { %s4920_s19 = smov [#allocation12]  }
  0x15   :  { %s92_s20 = sshll.u32 %s4920_s19, 4  ;;  %s93_s20 = int_to_ptr.vmem [resolvable:$true] %s92_s20 }
  0x16   :  { %98 = dma.hbm_to_vmem [thread:$0]  %s91_s2, 1024, %s93_s20, [#allocation13], %s4916_s30, %s4916_s30, %s4919_s18  }
  0x17   :  { %4898 = dma.done.wait [#allocation4], 2048  }
  0x18   :  { %4899 = vsyncadd [#allocation4], 4294965248 }
  0x19   :  { %4900 = dma.done.wait [#allocation7], 32832  }
  0x1a   :  { %4901 = vsyncadd [#allocation7], 4294934464 }
  0x1b   :  { %4902 = dma.done.wait [#allocation10], 10240  }
  0x1c   :  { %4903 = vsyncadd [#allocation10], 4294957056 }
  0x1d   :  { %4904 = dma.done.wait [#allocation13], 1024  }
  0x1e   :  { %4905 = vsyncadd [#allocation13], 4294966272  ;;  %v3103_v0 = vld [vmem:[#allocation6 + $0xe0] sm:$0xf]  ;;  %v4395_v1 = vld [vmem:[#allocation6 + $0xec] sm:$0xf0] }
  0x1f   :  { %v3231_v2 = vld [vmem:[#allocation6 + $0x1e0] sm:$0xf]  ;;  %v3104_v3 = vor.u32 %v4395_v1, %v3103_v0  ;;  %v4427_v4 = vld [vmem:[#allocation6 + $0x1ec] sm:$0xf0]  ;;  %s4921_s23 = smov [#allocation14]   ;;  %s2973_s26 = sshll.u32 %s5131_s9, 4  ;;  %s2974_s26 = int_to_ptr.hbm [resolvable:$true] %s2973_s26 }
  0x20   :  { %v3359_v5 = vld [vmem:[#allocation6 + $0x2e0] sm:$0xf]  ;;  %v4459_v6 = vld [vmem:[#allocation6 + $0x2ec] sm:$0xf0]  ;;  %v3232_v7 = vor.u32 %v4427_v4, %v3231_v2  ;;  %s2971_s24 = sshll.u32 %s4921_s23, 4  ;;  %s2972_s24 = int_to_ptr.vmem [resolvable:$true] %s2971_s24 }
  0x21   :  { %v3360_v8 = vor.u32 %v4459_v6, %v3359_v5  ;;  %v3487_v9 = vld [vmem:[#allocation6 + $0x3e0] sm:$0xf]  ;;  %v4491_v10 = vld [vmem:[#allocation6 + $0x3ec] sm:$0xf0]  ;;  %1705 = vmatpush.bf16.msra.mxu0 %v3104_v3 }
  0x22   :  { %v3087_v11 = vld [vmem:[#allocation6 + $0xc0] sm:$0xf]  ;;  %v3488_v12 = vor.u32 %v4491_v10, %v3487_v9  ;;  %v4391_v13 = vld [vmem:[#allocation6 + $0xcc] sm:$0xf0]  ;;  %1719 = vmatpush.bf16.msra.mxu1 %v3232_v7 }
  0x23   :  { %v3215_v14 = vld [vmem:[#allocation6 + $0x1c0] sm:$0xf]  ;;  %v4423_v15 = vld [vmem:[#allocation6 + $0x1cc] sm:$0xf0]  ;;  %1733 = vmatpush.bf16.msra.mxu2 %v3360_v8  ;;  %v3088_v16 = vor.u32 %v4391_v13, %v3087_v11 }
  0x24   :  { %v3216_v17 = vor.u32 %v4423_v15, %v3215_v14  ;;  %v3343_v18 = vld [vmem:[#allocation6 + $0x2c0] sm:$0xf]  ;;  %v4455_v19 = vld [vmem:[#allocation6 + $0x2cc] sm:$0xf0]  ;;  %1747 = vmatpush.bf16.msra.mxu3 %v3488_v12 }
  0x25   :  { %v3471_v20 = vld [vmem:[#allocation6 + $0x3c0] sm:$0xf]  ;;  %v3344_v21 = vor.u32 %v4455_v19, %v3343_v18  ;;  %v4487_v22 = vld [vmem:[#allocation6 + $0x3cc] sm:$0xf0]  ;;  %1706 = vmatpush.bf16.msra.mxu0 %v3088_v16 }
  0x26   :  { %v3071_v23 = vld [vmem:[#allocation6 + $0xa0] sm:$0xf]  ;;  %v4387_v24 = vld [vmem:[#allocation6 + $0xac] sm:$0xf0]  ;;  %v3472_v25 = vor.u32 %v4487_v22, %v3471_v20  ;;  %1720 = vmatpush.bf16.msra.mxu1 %v3216_v17 }
  0x27   :  { %v3199_v26 = vld [vmem:[#allocation6 + $0x1a0] sm:$0xf]  ;;  %v4419_v27 = vld [vmem:[#allocation6 + $0x1ac] sm:$0xf0]  ;;  %v3072_v29 = vor.u32 %v4387_v24, %v3071_v23  ;;  %1734 = vmatpush.bf16.msra.mxu2 %v3344_v21 }
  0x28   :  { %v3327_v28 = vld [vmem:[#allocation6 + $0x2a0] sm:$0xf]  ;;  %v4451_v30 = vld [vmem:[#allocation6 + $0x2ac] sm:$0xf0]  ;;  %v3200_v33 = vor.u32 %v4419_v27, %v3199_v26  ;;  %1748 = vmatpush.bf16.msra.mxu3 %v3472_v25 }
  0x29   :  { %v3455_v31 = vld [vmem:[#allocation6 + $0x3a0] sm:$0xf]  ;;  %v4483_v32 = vld [vmem:[#allocation6 + $0x3ac] sm:$0xf0]  ;;  %v3328_v34 = vor.u32 %v4451_v30, %v3327_v28  ;;  %1707 = vmatpush.bf16.msra.mxu0 %v3072_v29 }
  0x2a   :  { %v3055_v35 = vld [vmem:[#allocation6 + $0x80] sm:$0xf]  ;;  %v4383_v36 = vld [vmem:[#allocation6 + $0x8c] sm:$0xf0]  ;;  %v3456_v38 = vor.u32 %v4483_v32, %v3455_v31  ;;  %1721 = vmatpush.bf16.msra.mxu1 %v3200_v33 }
  0x2b   :  { %v3183_v37 = vld [vmem:[#allocation6 + $0x180] sm:$0xf]  ;;  %v4415_v39 = vld [vmem:[#allocation6 + $0x18c] sm:$0xf0]  ;;  %v3056_v44 = vor.u32 %v4383_v36, %v3055_v35  ;;  %1735 = vmatpush.bf16.msra.mxu2 %v3328_v34 }
  0x2c   :  { %v3311_v40 = vld [vmem:[#allocation6 + $0x280] sm:$0xf]  ;;  %v4447_v41 = vld [vmem:[#allocation6 + $0x28c] sm:$0xf0]  ;;  %v3184_v45 = vor.u32 %v4415_v39, %v3183_v37  ;;  %1749 = vmatpush.bf16.msra.mxu3 %v3456_v38 }
  0x2d   :  { %v3439_v42 = vld [vmem:[#allocation6 + $0x380] sm:$0xf]  ;;  %v4479_v43 = vld [vmem:[#allocation6 + $0x38c] sm:$0xf0]  ;;  %v3312_v46 = vor.u32 %v4447_v41, %v3311_v40  ;;  %1708 = vmatpush.bf16.msra.mxu0 %v3056_v44 }
  0x2e   :  { %v3039_v47 = vld [vmem:[#allocation6 + $0x60] sm:$0xf]  ;;  %v4379_v48 = vld [vmem:[#allocation6 + $0x6c] sm:$0xf0]  ;;  %v3440_v50 = vor.u32 %v4479_v43, %v3439_v42  ;;  %1722 = vmatpush.bf16.msra.mxu1 %v3184_v45 }
  0x2f   :  { %v3167_v49 = vld [vmem:[#allocation6 + $0x160] sm:$0xf]  ;;  %v4411_v51 = vld [vmem:[#allocation6 + $0x16c] sm:$0xf0]  ;;  %v3040_v56 = vor.u32 %v4379_v48, %v3039_v47  ;;  %1736 = vmatpush.bf16.msra.mxu2 %v3312_v46 }
  0x30   :  { %v3295_v52 = vld [vmem:[#allocation6 + $0x260] sm:$0xf]  ;;  %v4443_v53 = vld [vmem:[#allocation6 + $0x26c] sm:$0xf0]  ;;  %v3168_v57 = vor.u32 %v4411_v51, %v3167_v49  ;;  %1750 = vmatpush.bf16.msra.mxu3 %v3440_v50 }
  0x31   :  { %v3423_v54 = vld [vmem:[#allocation6 + $0x360] sm:$0xf]  ;;  %v4475_v55 = vld [vmem:[#allocation6 + $0x36c] sm:$0xf0]  ;;  %v3296_v58 = vor.u32 %v4443_v53, %v3295_v52  ;;  %1709 = vmatpush.bf16.msra.mxu0 %v3040_v56 }
  0x32   :  { %v3023_v59 = vld [vmem:[#allocation6 + $0x40] sm:$0xf]  ;;  %v4375_v60 = vld [vmem:[#allocation6 + $0x4c] sm:$0xf0]  ;;  %v3424_v62 = vor.u32 %v4475_v55, %v3423_v54  ;;  %1723 = vmatpush.bf16.msra.mxu1 %v3168_v57 }
  0x33   :  { %v3151_v61 = vld [vmem:[#allocation6 + $0x140] sm:$0xf]  ;;  %v4407_v63 = vld [vmem:[#allocation6 + $0x14c] sm:$0xf0]  ;;  %v3024_v4 = vor.u32 %v4375_v60, %v3023_v59  ;;  %1737 = vmatpush.bf16.msra.mxu2 %v3296_v58 }
  0x34   :  { %v3279_v0 = vld [vmem:[#allocation6 + $0x240] sm:$0xf]  ;;  %v4439_v1 = vld [vmem:[#allocation6 + $0x24c] sm:$0xf0]  ;;  %v3152_v5 = vor.u32 %v4407_v63, %v3151_v61  ;;  %1751 = vmatpush.bf16.msra.mxu3 %v3424_v62 }
  0x35   :  { %v3407_v2 = vld [vmem:[#allocation6 + $0x340] sm:$0xf]  ;;  %v4471_v3 = vld [vmem:[#allocation6 + $0x34c] sm:$0xf0]  ;;  %v3280_v6 = vor.u32 %v4439_v1, %v3279_v0  ;;  %1710 = vmatpush.bf16.msra.mxu0 %v3024_v4 }
  0x36   :  { %v3007_v7 = vld [vmem:[#allocation6 + $0x20] sm:$0xf]  ;;  %v4371_v8 = vld [vmem:[#allocation6 + $0x2c] sm:$0xf0]  ;;  %v3408_v10 = vor.u32 %v4471_v3, %v3407_v2  ;;  %1724 = vmatpush.bf16.msra.mxu1 %v3152_v5 }
  0x37   :  { %v3135_v9 = vld [vmem:[#allocation6 + $0x120] sm:$0xf]  ;;  %v4403_v11 = vld [vmem:[#allocation6 + $0x12c] sm:$0xf0]  ;;  %v3008_v16 = vor.u32 %v4371_v8, %v3007_v7  ;;  %1738 = vmatpush.bf16.msra.mxu2 %v3280_v6  ;;  %v146_v6 = vld [vmem:[#allocation3 + $0x8] sm:$0xff] }
  0x38   :  { %v3263_v12 = vld [vmem:[#allocation6 + $0x220] sm:$0xf]  ;;  %v4435_v13 = vld [vmem:[#allocation6 + $0x22c] sm:$0xf0]  ;;  %v3136_v19 = vor.u32 %v4403_v11, %v3135_v9  ;;  %1752 = vmatpush.bf16.msra.mxu3 %v3408_v10  ;;  %v154_v7 = vld [vmem:[#allocation3 + $0x48] sm:$0xff] }
  0x39   :  { %v3391_v14 = vld [vmem:[#allocation6 + $0x320] sm:$0xf]  ;;  %v4467_v15 = vld [vmem:[#allocation6 + $0x32c] sm:$0xf0]  ;;  %v3264_v20 = vor.u32 %v4435_v13, %v3263_v12  ;;  %1711 = vmatpush.bf16.msra.mxu0 %v3008_v16  ;;  %v148_v8 = vld [vmem:[#allocation3 + $0x18] sm:$0xff]  ;;  %v5003_v10 = vpack.c.bf16 %v154_v7, %v146_v6 }
  0x3a   :  { %v2991_v17 = vld [vmem:[#allocation6] sm:$0xf]  ;;  %v4367_v18 = vld [vmem:[#allocation6 + $0xc] sm:$0xf0]  ;;  %v3392_v24 = vor.u32 %v4467_v15, %v3391_v14  ;;  %1725 = vmatpush.bf16.msra.mxu1 %v3136_v19  ;;  %v156_v11 = vld [vmem:[#allocation3 + $0x58] sm:$0xff] }
  0x3b   :  { %v3119_v21 = vld [vmem:[#allocation6 + $0x100] sm:$0xf]  ;;  %v4399_v22 = vld [vmem:[#allocation6 + $0x10c] sm:$0xf0]  ;;  %v2992_v31 = vor.u32 %v4367_v18, %v2991_v17  ;;  %1739 = vmatpush.bf16.msra.mxu2 %v3264_v20  ;;  %v5005_v17 = vpack.c.bf16 %v156_v11, %v148_v8 }
  0x3c   :  { %v3247_v23 = vld [vmem:[#allocation6 + $0x200] sm:$0xf]  ;;  %v4431_v25 = vld [vmem:[#allocation6 + $0x20c] sm:$0xf0]  ;;  %v3120_v35 = vor.u32 %v4399_v22, %v3119_v21  ;;  %1753 = vmatpush.bf16.msra.mxu3 %v3392_v24 }
  0x3d   :  { %v3375_v26 = vld [vmem:[#allocation6 + $0x300] sm:$0xf]  ;;  %v4463_v27 = vld [vmem:[#allocation6 + $0x30c] sm:$0xf0]  ;;  %v3248_v36 = vor.u32 %v4431_v25, %v3247_v23  ;;  %1712 = vmatpush.bf16.msra.mxu0 %v2992_v31 }
  0x3e   :  { %v3615_v28 = vld [vmem:[#allocation6 + $0x4e0] sm:$0xf]  ;;  %v4523_v29 = vld [vmem:[#allocation6 + $0x4ec] sm:$0xf0]  ;;  %v3376_v39 = vor.u32 %v4463_v27, %v3375_v26  ;;  %1726 = vmatpush.bf16.msra.mxu1 %v3120_v35 }
  0x3f   :  { %v3743_v30 = vld [vmem:[#allocation6 + $0x5e0] sm:$0xf]  ;;  %v4555_v32 = vld [vmem:[#allocation6 + $0x5ec] sm:$0xf0]  ;;  %v3616_v40 = vor.u32 %v4523_v29, %v3615_v28  ;;  %1740 = vmatpush.bf16.msra.mxu2 %v3248_v36 }
  0x40   :  { %v3871_v33 = vld [vmem:[#allocation6 + $0x6e0] sm:$0xf]  ;;  %v4587_v34 = vld [vmem:[#allocation6 + $0x6ec] sm:$0xf0]  ;;  %v3744_v43 = vor.u32 %v4555_v32, %v3743_v30  ;;  %1754 = vmatpush.bf16.msra.mxu3 %v3376_v39 }
  0x41   :  { %v3999_v37 = vld [vmem:[#allocation6 + $0x7e0] sm:$0xf]  ;;  %v4619_v38 = vld [vmem:[#allocation6 + $0x7ec] sm:$0xf0]  ;;  %v3872_v44 = vor.u32 %v4587_v34, %v3871_v33  ;;  %1761 = vmatpush.bf16.msrb.mxu0 %v3616_v40  ;;  %1727 = vmatmul.bf16.vlgmr.msra.gmra.mxu1 %v5003_v10 }
  0x42   :  { %v3599_v41 = vld [vmem:[#allocation6 + $0x4c0] sm:$0xf]  ;;  %v4519_v42 = vld [vmem:[#allocation6 + $0x4cc] sm:$0xf0]  ;;  %v4000_v48 = vor.u32 %v4619_v38, %v3999_v37  ;;  %1775 = vmatpush.bf16.msrb.mxu1 %v3744_v43 }
  0x43   :  { %v3727_v45 = vld [vmem:[#allocation6 + $0x5c0] sm:$0xf]  ;;  %v4551_v46 = vld [vmem:[#allocation6 + $0x5cc] sm:$0xf0]  ;;  %v3600_v55 = vor.u32 %v4519_v42, %v3599_v41  ;;  %1789 = vmatpush.bf16.msrb.mxu2 %v3872_v44  ;;  %1755 = vmatmul.bf16.vlgmr.msra.gmra.mxu3 %v5005_v17 }
  0x44   :  { %v3855_v47 = vld [vmem:[#allocation6 + $0x6c0] sm:$0xf]  ;;  %v4583_v49 = vld [vmem:[#allocation6 + $0x6cc] sm:$0xf0]  ;;  %v3728_v60 = vor.u32 %v4551_v46, %v3727_v45  ;;  %1803 = vmatpush.bf16.msrb.mxu3 %v4000_v48 }
  0x45   :  { %v3983_v50 = vld [vmem:[#allocation6 + $0x7c0] sm:$0xf]  ;;  %v4615_v51 = vld [vmem:[#allocation6 + $0x7cc] sm:$0xf0]  ;;  %v3856_v61 = vor.u32 %v4583_v49, %v3855_v47  ;;  %1762 = vmatpush.bf16.msrb.mxu0 %v3600_v55 }
  0x46   :  { %v145_v52 = vld [vmem:[#allocation3] sm:$0xff]  ;;  %v147_v54 = vld [vmem:[#allocation3 + $0x10] sm:$0xff]  ;;  %v3984_v2 = vor.u32 %v4615_v51, %v3983_v50  ;;  %1776 = vmatpush.bf16.msrb.mxu1 %v3728_v60 }
  0x47   :  { %v153_v53 = vld [vmem:[#allocation3 + $0x40] sm:$0xff]  ;;  %v4515_v57 = vld [vmem:[#allocation6 + $0x4ac] sm:$0xf0]  ;;  %1790 = vmatpush.bf16.msrb.mxu2 %v3856_v61 }
  0x48   :  { %v3583_v56 = vld [vmem:[#allocation6 + $0x4a0] sm:$0xf]  ;;  %v4997_v58 = vpack.c.bf16 %v153_v53, %v145_v52  ;;  %v155_v59 = vld [vmem:[#allocation3 + $0x50] sm:$0xff]  ;;  %1804 = vmatpush.bf16.msrb.mxu3 %v3984_v2 }
  0x49   :  { %v3711_v62 = vld [vmem:[#allocation6 + $0x5a0] sm:$0xf]  ;;  %v4547_v63 = vld [vmem:[#allocation6 + $0x5ac] sm:$0xf0]  ;;  %v4999_v1 = vpack.c.bf16 %v155_v59, %v147_v54  ;;  %v3584_v9 = vor.u32 %v4515_v57, %v3583_v56 }
  0x4a   :  { %v3839_v0 = vld [vmem:[#allocation6 + $0x6a0] sm:$0xf]  ;;  %v4579_v3 = vld [vmem:[#allocation6 + $0x6ac] sm:$0xf0]  ;;  %1713 = vmatmul.bf16.vlgmr.msra.gmra.mxu0 %v4997_v58  ;;  %v3712_v12 = vor.u32 %v4547_v63, %v3711_v62 }
  0x4b   :  { %v3967_v4 = vld [vmem:[#allocation6 + $0x7a0] sm:$0xf]  ;;  %v4611_v5 = vld [vmem:[#allocation6 + $0x7ac] sm:$0xf0]  ;;  %1741 = vmatmul.bf16.vlgmr.msra.gmra.mxu2 %v4999_v1  ;;  %v3840_v13 = vor.u32 %v4579_v3, %v3839_v0  ;;  %1763 = vmatpush.bf16.msrb.mxu0 %v3584_v9  ;;  %v4393_v9 = vld [vmem:[#allocation6 + $0xe4] sm:$0xf] }
  0x4c   :  { %v3567_v14 = vld [vmem:[#allocation6 + $0x480] sm:$0xf]  ;;  %v4511_v15 = vld [vmem:[#allocation6 + $0x48c] sm:$0xf0]  ;;  %v3968_v18 = vor.u32 %v4611_v5, %v3967_v4  ;;  %1777 = vmatpush.bf16.msrb.mxu1 %v3712_v12  ;;  %v3105_v12 = vld [vmem:[#allocation6 + $0xf0] sm:$0xf0] }
  0x4d   :  { %v3695_v16 = vld [vmem:[#allocation6 + $0x580] sm:$0xf]  ;;  %v4543_v19 = vld [vmem:[#allocation6 + $0x58c] sm:$0xf0]  ;;  %v3568_v24 = vor.u32 %v4511_v15, %v3567_v14  ;;  %1791 = vmatpush.bf16.msrb.mxu2 %v3840_v13  ;;  %v4425_v13 = vld [vmem:[#allocation6 + $0x1e4] sm:$0xf] }
  0x4e   :  { %v3823_v20 = vld [vmem:[#allocation6 + $0x680] sm:$0xf]  ;;  %v4575_v21 = vld [vmem:[#allocation6 + $0x68c] sm:$0xf0]  ;;  %v3696_v25 = vor.u32 %v4543_v19, %v3695_v16  ;;  %1805 = vmatpush.bf16.msrb.mxu3 %v3968_v18  ;;  %v3233_v14 = vld [vmem:[#allocation6 + $0x1f0] sm:$0xf0] }
  0x4f   :  { %v3951_v22 = vld [vmem:[#allocation6 + $0x780] sm:$0xf]  ;;  %v4607_v23 = vld [vmem:[#allocation6 + $0x78c] sm:$0xf0]  ;;  %v3824_v26 = vor.u32 %v4575_v21, %v3823_v20  ;;  %1764 = vmatpush.bf16.msrb.mxu0 %v3568_v24  ;;  %v4457_v15 = vld [vmem:[#allocation6 + $0x2e4] sm:$0xf] }
  0x50   :  { %v3551_v27 = vld [vmem:[#allocation6 + $0x460] sm:$0xf]  ;;  %v4507_v28 = vld [vmem:[#allocation6 + $0x46c] sm:$0xf0]  ;;  %v3952_v30 = vor.u32 %v4607_v23, %v3951_v22  ;;  %1778 = vmatpush.bf16.msrb.mxu1 %v3696_v25  ;;  %v3361_v16 = vld [vmem:[#allocation6 + $0x2f0] sm:$0xf0] }
  0x51   :  { %v3679_v29 = vld [vmem:[#allocation6 + $0x560] sm:$0xf]  ;;  %v4539_v31 = vld [vmem:[#allocation6 + $0x56c] sm:$0xf0]  ;;  %v3552_v36 = vor.u32 %v4507_v28, %v3551_v27  ;;  %1792 = vmatpush.bf16.msrb.mxu2 %v3824_v26  ;;  %v4489_v18 = vld [vmem:[#allocation6 + $0x3e4] sm:$0xf] }
  0x52   :  { %v3807_v32 = vld [vmem:[#allocation6 + $0x660] sm:$0xf]  ;;  %v4571_v33 = vld [vmem:[#allocation6 + $0x66c] sm:$0xf0]  ;;  %v3680_v37 = vor.u32 %v4539_v31, %v3679_v29  ;;  %1806 = vmatpush.bf16.msrb.mxu3 %v3952_v30  ;;  %v3489_v20 = vld [vmem:[#allocation6 + $0x3f0] sm:$0xf0]  ;;  %v3108_v29 = vor.u32 %v4393_v9, %v3105_v12 }
  0x53   :  { %v3935_v34 = vld [vmem:[#allocation6 + $0x760] sm:$0xf]  ;;  %v4603_v35 = vld [vmem:[#allocation6 + $0x76c] sm:$0xf0]  ;;  %v3808_v38 = vor.u32 %v4571_v33, %v3807_v32  ;;  %1765 = vmatpush.bf16.msrb.mxu0 %v3552_v36  ;;  %v150_v27 = vld [vmem:[#allocation3 + $0x28] sm:$0xff]  ;;  %v3236_v33 = vor.u32 %v4425_v13, %v3233_v14 }
  0x54   :  { %v3535_v39 = vld [vmem:[#allocation6 + $0x440] sm:$0xf]  ;;  %v4503_v40 = vld [vmem:[#allocation6 + $0x44c] sm:$0xf0]  ;;  %v3936_v42 = vor.u32 %v4603_v35, %v3935_v34  ;;  %1779 = vmatpush.bf16.msrb.mxu1 %v3680_v37  ;;  %v158_v30 = vld [vmem:[#allocation3 + $0x68] sm:$0xff]  ;;  %v3364_v34 = vor.u32 %v4457_v15, %v3361_v16 }
  0x55   :  { %v3663_v41 = vld [vmem:[#allocation6 + $0x540] sm:$0xf]  ;;  %v4535_v43 = vld [vmem:[#allocation6 + $0x54c] sm:$0xf0]  ;;  %v3536_v48 = vor.u32 %v4503_v40, %v3535_v39  ;;  %1793 = vmatpush.bf16.msrb.mxu2 %v3808_v38  ;;  %v152_v31 = vld [vmem:[#allocation3 + $0x38] sm:$0xff]  ;;  %v3492_v38 = vor.u32 %v4489_v18, %v3489_v20 }
  0x56   :  { %v3791_v44 = vld [vmem:[#allocation6 + $0x640] sm:$0xf]  ;;  %v4567_v45 = vld [vmem:[#allocation6 + $0x64c] sm:$0xf0]  ;;  %v3664_v50 = vor.u32 %v4535_v43, %v3663_v41  ;;  %1807 = vmatpush.bf16.msrb.mxu3 %v3936_v42  ;;  %v160_v32 = vld [vmem:[#allocation3 + $0x78] sm:$0xff] }
  0x57   :  { %v3919_v46 = vld [vmem:[#allocation6 + $0x740] sm:$0xf]  ;;  %v4599_v47 = vld [vmem:[#allocation6 + $0x74c] sm:$0xf0]  ;;  %v3792_v51 = vor.u32 %v4567_v45, %v3791_v44  ;;  %1766 = vmatpush.bf16.msrb.mxu0 %v3536_v48  ;;  %v4389_v35 = vld [vmem:[#allocation6 + $0xc4] sm:$0xf]  ;;  %v5013_v44 = vpack.c.bf16 %v158_v30, %v150_v27 }
  0x58   :  { %v3519_v49 = vld [vmem:[#allocation6 + $0x420] sm:$0xf]  ;;  %v4499_v52 = vld [vmem:[#allocation6 + $0x42c] sm:$0xf0]  ;;  %v3920_v55 = vor.u32 %v4599_v47, %v3919_v46  ;;  %1780 = vmatpush.bf16.msrb.mxu1 %v3664_v50  ;;  %v3089_v36 = vld [vmem:[#allocation6 + $0xd0] sm:$0xf0]  ;;  %v5015_v47 = vpack.c.bf16 %v160_v32, %v152_v31 }
  0x59   :  { %v3647_v53 = vld [vmem:[#allocation6 + $0x520] sm:$0xf]  ;;  %v4531_v54 = vld [vmem:[#allocation6 + $0x52c] sm:$0xf0]  ;;  %v3520_v63 = vor.u32 %v4499_v52, %v3519_v49  ;;  %1794 = vmatpush.bf16.msrb.mxu2 %v3792_v51  ;;  %v4421_v37 = vld [vmem:[#allocation6 + $0x1c4] sm:$0xf]  ;;  %v3092_v48 = vor.u32 %v4389_v35, %v3089_v36 }
  0x5a   :  { %v3775_v56 = vld [vmem:[#allocation6 + $0x620] sm:$0xf]  ;;  %v4563_v57 = vld [vmem:[#allocation6 + $0x62c] sm:$0xf0]  ;;  %v3648_v5 = vor.u32 %v4531_v54, %v3647_v53  ;;  %1808 = vmatpush.bf16.msrb.mxu3 %v3920_v55  ;;  %v3217_v40 = vld [vmem:[#allocation6 + $0x1d0] sm:$0xf0] }
  0x5b   :  { %v3903_v59 = vld [vmem:[#allocation6 + $0x720] sm:$0xf]  ;;  %v4595_v60 = vld [vmem:[#allocation6 + $0x72c] sm:$0xf0]  ;;  %v3776_v6 = vor.u32 %v4563_v57, %v3775_v56  ;;  %1767 = vmatpush.bf16.msrb.mxu0 %v3520_v63  ;;  %v4453_v41 = vld [vmem:[#allocation6 + $0x2c4] sm:$0xf]  ;;  %v3220_v49 = vor.u32 %v4421_v37, %v3217_v40 }
  0x5c   :  { %v3503_v61 = vld [vmem:[#allocation6 + $0x400] sm:$0xf]  ;;  %v4495_v62 = vld [vmem:[#allocation6 + $0x40c] sm:$0xf0]  ;;  %v3904_v11 = vor.u32 %v4595_v60, %v3903_v59  ;;  %1781 = vmatpush.bf16.msrb.mxu1 %v3648_v5  ;;  %v3345_v42 = vld [vmem:[#allocation6 + $0x2d0] sm:$0xf0] }
  0x5d   :  { %v3631_v0 = vld [vmem:[#allocation6 + $0x500] sm:$0xf]  ;;  %v4527_v2 = vld [vmem:[#allocation6 + $0x50c] sm:$0xf0]  ;;  %v3504_v19 = vor.u32 %v4495_v62, %v3503_v61  ;;  %1795 = vmatpush.bf16.msrb.mxu2 %v3776_v6  ;;  %v4485_v45 = vld [vmem:[#allocation6 + $0x3c4] sm:$0xf]  ;;  %v3348_v50 = vor.u32 %v4453_v41, %v3345_v42 }
  0x5e   :  { %v3759_v3 = vld [vmem:[#allocation6 + $0x600] sm:$0xf]  ;;  %v4559_v4 = vld [vmem:[#allocation6 + $0x60c] sm:$0xf0]  ;;  %v3632_v23 = vor.u32 %v4527_v2, %v3631_v0  ;;  %1809 = vmatpush.bf16.msrb.mxu3 %v3904_v11  ;;  %v3473_v46 = vld [vmem:[#allocation6 + $0x3d0] sm:$0xf0] }
  0x5f   :  { %v3887_v7 = vld [vmem:[#allocation6 + $0x700] sm:$0xf]  ;;  %v4591_v8 = vld [vmem:[#allocation6 + $0x70c] sm:$0xf0]  ;;  %v3760_v24 = vor.u32 %v4559_v4, %v3759_v3  ;;  %1768 = vmatpush.bf16.msrb.mxu0 %v3504_v19  ;;  %v4385_v51 = vld [vmem:[#allocation6 + $0xa4] sm:$0xf]  ;;  %v3476_v54 = vor.u32 %v4485_v45, %v3473_v46 }
  0x60   :  { %v149_v21 = vld [vmem:[#allocation3 + $0x20] sm:$0xff]  ;;  %v151_v25 = vld [vmem:[#allocation3 + $0x30] sm:$0xff]  ;;  %v3888_v28 = vor.u32 %v4591_v8, %v3887_v7  ;;  %1782 = vmatpush.bf16.msrb.mxu1 %v3632_v23 }
  0x61   :  { %v157_v22 = vld [vmem:[#allocation3 + $0x60] sm:$0xff]  ;;  %v159_v26 = vld [vmem:[#allocation3 + $0x70] sm:$0xff]  ;;  %1796 = vmatpush.bf16.msrb.mxu2 %v3760_v24 }
  0x62   :  { %v5009_v39 = vpack.c.bf16 %v157_v22, %v149_v21  ;;  %v5011_v43 = vpack.c.bf16 %v159_v26, %v151_v25  ;;  %1810 = vmatpush.bf16.msrb.mxu3 %v3888_v28  ;;  %v3073_v52 = vld [vmem:[#allocation6 + $0xb0] sm:$0xf0]  ;;  %v4417_v53 = vld [vmem:[#allocation6 + $0x1a4] sm:$0xf] }
  0x63   :  { %1817 = vmatpush.bf16.msra.mxu0 %v3108_v29  ;;  %v3201_v55 = vld [vmem:[#allocation6 + $0x1b0] sm:$0xf0]  ;;  %v4449_v56 = vld [vmem:[#allocation6 + $0x2a4] sm:$0xf]  ;;  %1783 = vmatmul.bf16.vlgmr.msrb.gmra.mxu1 %v5013_v44  ;;  %v3076_v61 = vor.u32 %v4385_v51, %v3073_v52 }
  0x64   :  { %1831 = vmatpush.bf16.msra.mxu1 %v3236_v33  ;;  %1769 = vmatmul.bf16.vlgmr.msrb.gmra.mxu0 %v5009_v39  ;;  %v3329_v57 = vld [vmem:[#allocation6 + $0x2b0] sm:$0xf0]  ;;  %v4481_v59 = vld [vmem:[#allocation6 + $0x3a4] sm:$0xf]  ;;  %v3204_v62 = vor.u32 %v4417_v53, %v3201_v55 }
  0x65   :  { %1845 = vmatpush.bf16.msra.mxu2 %v3364_v34  ;;  %v3457_v60 = vld [vmem:[#allocation6 + $0x3b0] sm:$0xf0]  ;;  %1811 = vmatmul.bf16.vlgmr.msrb.gmra.mxu3 %v5015_v47  ;;  %v3332_v63 = vor.u32 %v4449_v56, %v3329_v57  ;;  %v4381_v0 = vld [vmem:[#allocation6 + $0x84] sm:$0xf] }
  0x66   :  { %1859 = vmatpush.bf16.msra.mxu3 %v3492_v38  ;;  %1797 = vmatmul.bf16.vlgmr.msrb.gmra.mxu2 %v5011_v43  ;;  %v3057_v2 = vld [vmem:[#allocation6 + $0x90] sm:$0xf0]  ;;  %v4413_v3 = vld [vmem:[#allocation6 + $0x184] sm:$0xf]  ;;  %v3460_v4 = vor.u32 %v4481_v59, %v3457_v60 }
  0x67   :  { %1818 = vmatpush.bf16.msra.mxu0 %v3092_v48  ;;  %v3185_v5 = vld [vmem:[#allocation6 + $0x190] sm:$0xf0]  ;;  %v4445_v6 = vld [vmem:[#allocation6 + $0x284] sm:$0xf]  ;;  %v3060_v11 = vor.u32 %v4381_v0, %v3057_v2 }
  0x68   :  { %1832 = vmatpush.bf16.msra.mxu1 %v3220_v49  ;;  %v3313_v7 = vld [vmem:[#allocation6 + $0x290] sm:$0xf0]  ;;  %v4477_v8 = vld [vmem:[#allocation6 + $0x384] sm:$0xf]  ;;  %v3188_v12 = vor.u32 %v4413_v3, %v3185_v5 }
  0x69   :  { %1846 = vmatpush.bf16.msra.mxu2 %v3348_v50  ;;  %v3441_v9 = vld [vmem:[#allocation6 + $0x390] sm:$0xf0]  ;;  %v3316_v13 = vor.u32 %v4445_v6, %v3313_v7  ;;  %v4377_v14 = vld [vmem:[#allocation6 + $0x64] sm:$0xf] }
  0x6a   :  { %1860 = vmatpush.bf16.msra.mxu3 %v3476_v54  ;;  %v3041_v15 = vld [vmem:[#allocation6 + $0x70] sm:$0xf0]  ;;  %v4409_v16 = vld [vmem:[#allocation6 + $0x164] sm:$0xf]  ;;  %v3444_v18 = vor.u32 %v4477_v8, %v3441_v9 }
  0x6b   :  { %1819 = vmatpush.bf16.msra.mxu0 %v3076_v61  ;;  %v3169_v19 = vld [vmem:[#allocation6 + $0x170] sm:$0xf0]  ;;  %v4441_v20 = vld [vmem:[#allocation6 + $0x264] sm:$0xf]  ;;  %v3044_v24 = vor.u32 %v4377_v14, %v3041_v15 }
  0x6c   :  { %1833 = vmatpush.bf16.msra.mxu1 %v3204_v62  ;;  %v3297_v21 = vld [vmem:[#allocation6 + $0x270] sm:$0xf0]  ;;  %v4473_v22 = vld [vmem:[#allocation6 + $0x364] sm:$0xf]  ;;  %v3172_v25 = vor.u32 %v4409_v16, %v3169_v19 }
  0x6d   :  { %1847 = vmatpush.bf16.msra.mxu2 %v3332_v63  ;;  %v3425_v23 = vld [vmem:[#allocation6 + $0x370] sm:$0xf0]  ;;  %v3300_v26 = vor.u32 %v4441_v20, %v3297_v21  ;;  %v4373_v27 = vld [vmem:[#allocation6 + $0x44] sm:$0xf] }
  0x6e   :  { %1861 = vmatpush.bf16.msra.mxu3 %v3460_v4  ;;  %v3025_v28 = vld [vmem:[#allocation6 + $0x50] sm:$0xf0]  ;;  %v4405_v29 = vld [vmem:[#allocation6 + $0x144] sm:$0xf]  ;;  %v3428_v30 = vor.u32 %v4473_v22, %v3425_v23 }
  0x6f   :  { %1820 = vmatpush.bf16.msra.mxu0 %v3060_v11  ;;  %v3153_v31 = vld [vmem:[#allocation6 + $0x150] sm:$0xf0]  ;;  %v4437_v32 = vld [vmem:[#allocation6 + $0x244] sm:$0xf]  ;;  %v3028_v36 = vor.u32 %v4373_v27, %v3025_v28 }
  0x70   :  { %1834 = vmatpush.bf16.msra.mxu1 %v3188_v12  ;;  %v3281_v33 = vld [vmem:[#allocation6 + $0x250] sm:$0xf0]  ;;  %v4469_v34 = vld [vmem:[#allocation6 + $0x344] sm:$0xf]  ;;  %v3156_v37 = vor.u32 %v4405_v29, %v3153_v31 }
  0x71   :  { %1848 = vmatpush.bf16.msra.mxu2 %v3316_v13  ;;  %v3409_v35 = vld [vmem:[#allocation6 + $0x350] sm:$0xf0]  ;;  %v3284_v38 = vor.u32 %v4437_v32, %v3281_v33  ;;  %v4369_v40 = vld [vmem:[#allocation6 + $0x24] sm:$0xf] }
  0x72   :  { %1862 = vmatpush.bf16.msra.mxu3 %v3444_v18  ;;  %v3009_v41 = vld [vmem:[#allocation6 + $0x30] sm:$0xf0]  ;;  %v4401_v42 = vld [vmem:[#allocation6 + $0x124] sm:$0xf]  ;;  %v3412_v45 = vor.u32 %v4469_v34, %v3409_v35 }
  0x73   :  { %1821 = vmatpush.bf16.msra.mxu0 %v3044_v24  ;;  %v3137_v46 = vld [vmem:[#allocation6 + $0x130] sm:$0xf0]  ;;  %v4433_v48 = vld [vmem:[#allocation6 + $0x224] sm:$0xf]  ;;  %v3012_v52 = vor.u32 %v4369_v40, %v3009_v41 }
  0x74   :  { %1835 = vmatpush.bf16.msra.mxu1 %v3172_v25  ;;  %v3265_v49 = vld [vmem:[#allocation6 + $0x230] sm:$0xf0]  ;;  %v4465_v50 = vld [vmem:[#allocation6 + $0x324] sm:$0xf]  ;;  %v3140_v55 = vor.u32 %v4401_v42, %v3137_v46 }
  0x75   :  { %1849 = vmatpush.bf16.msra.mxu2 %v3300_v26  ;;  %v3393_v51 = vld [vmem:[#allocation6 + $0x330] sm:$0xf0]  ;;  %v4365_v53 = vld [vmem:[#allocation6 + $0x4] sm:$0xf]  ;;  %v3268_v56 = vor.u32 %v4433_v48, %v3265_v49 }
  0x76   :  { %1863 = vmatpush.bf16.msra.mxu3 %v3428_v30  ;;  %v2993_v54 = vld [vmem:[#allocation6 + $0x10] sm:$0xf0]  ;;  %v4397_v57 = vld [vmem:[#allocation6 + $0x104] sm:$0xf]  ;;  %v3396_v61 = vor.u32 %v4465_v50, %v3393_v51 }
  0x77   :  { %1822 = vmatpush.bf16.msra.mxu0 %v3028_v36  ;;  %v3121_v59 = vld [vmem:[#allocation6 + $0x110] sm:$0xf0]  ;;  %v4429_v60 = vld [vmem:[#allocation6 + $0x204] sm:$0xf]  ;;  %v2996_v5 = vor.u32 %v4365_v53, %v2993_v54 }
  0x78   :  { %1836 = vmatpush.bf16.msra.mxu1 %v3156_v37  ;;  %v3249_v62 = vld [vmem:[#allocation6 + $0x210] sm:$0xf0]  ;;  %v4461_v63 = vld [vmem:[#allocation6 + $0x304] sm:$0xf]  ;;  %v3124_v9 = vor.u32 %v4397_v57, %v3121_v59 }
  0x79   :  { %1850 = vmatpush.bf16.msra.mxu2 %v3284_v38  ;;  %v3377_v0 = vld [vmem:[#allocation6 + $0x310] sm:$0xf0]  ;;  %v4521_v2 = vld [vmem:[#allocation6 + $0x4e4] sm:$0xf]  ;;  %v3252_v11 = vor.u32 %v4429_v60, %v3249_v62 }
  0x7a   :  { %1864 = vmatpush.bf16.msra.mxu3 %v3412_v45  ;;  %v3617_v3 = vld [vmem:[#allocation6 + $0x4f0] sm:$0xf0]  ;;  %v4553_v4 = vld [vmem:[#allocation6 + $0x5e4] sm:$0xf]  ;;  %v3380_v14 = vor.u32 %v4461_v63, %v3377_v0 }
  0x7b   :  { %1823 = vmatpush.bf16.msra.mxu0 %v3012_v52  ;;  %v3745_v6 = vld [vmem:[#allocation6 + $0x5f0] sm:$0xf0]  ;;  %v4585_v7 = vld [vmem:[#allocation6 + $0x6e4] sm:$0xf]  ;;  %v3620_v15 = vor.u32 %v4521_v2, %v3617_v3 }
  0x7c   :  { %v3873_v8 = vld [vmem:[#allocation6 + $0x6f0] sm:$0xf0]  ;;  %1837 = vmatpush.bf16.msra.mxu1 %v3140_v55  ;;  %v4617_v12 = vld [vmem:[#allocation6 + $0x7e4] sm:$0xf]  ;;  %v3748_v16 = vor.u32 %v4553_v4, %v3745_v6 }
  0x7d   :  { %1851 = vmatpush.bf16.msra.mxu2 %v3268_v56  ;;  %v4001_v13 = vld [vmem:[#allocation6 + $0x7f0] sm:$0xf0]  ;;  %v3876_v18 = vor.u32 %v4585_v7, %v3873_v8  ;;  %v4517_v19 = vld [vmem:[#allocation6 + $0x4c4] sm:$0xf] }
  0x7e   :  { %1865 = vmatpush.bf16.msra.mxu3 %v3396_v61  ;;  %v3601_v20 = vld [vmem:[#allocation6 + $0x4d0] sm:$0xf0]  ;;  %v4549_v21 = vld [vmem:[#allocation6 + $0x5c4] sm:$0xf]  ;;  %v4004_v22 = vor.u32 %v4617_v12, %v4001_v13 }
  0x7f   :  { %1824 = vmatpush.bf16.msra.mxu0 %v2996_v5  ;;  %v3729_v23 = vld [vmem:[#allocation6 + $0x5d0] sm:$0xf0]  ;;  %v4581_v24 = vld [vmem:[#allocation6 + $0x6c4] sm:$0xf]  ;;  %v3604_v28 = vor.u32 %v4517_v19, %v3601_v20 }
  0x80   :  { %v3857_v25 = vld [vmem:[#allocation6 + $0x6d0] sm:$0xf0]  ;;  %1838 = vmatpush.bf16.msra.mxu1 %v3124_v9  ;;  %v4613_v26 = vld [vmem:[#allocation6 + $0x7c4] sm:$0xf]  ;;  %v3732_v29 = vor.u32 %v4549_v21, %v3729_v23 }
  0x81   :  { %1852 = vmatpush.bf16.msra.mxu2 %v3252_v11  ;;  %v3985_v27 = vld [vmem:[#allocation6 + $0x7d0] sm:$0xf0]  ;;  %v3860_v30 = vor.u32 %v4581_v24, %v3857_v25  ;;  %v4513_v31 = vld [vmem:[#allocation6 + $0x4a4] sm:$0xf] }
  0x82   :  { %1866 = vmatpush.bf16.msra.mxu3 %v3380_v14  ;;  %v3585_v32 = vld [vmem:[#allocation6 + $0x4b0] sm:$0xf0]  ;;  %v4545_v33 = vld [vmem:[#allocation6 + $0x5a4] sm:$0xf]  ;;  %v3988_v34 = vor.u32 %v4613_v26, %v3985_v27  ;;  %1825 = vmatmul.bf16.vlgmr.msra.gmra.mxu0 %v4997_v58 }
  0x83   :  { %1873 = vmatpush.bf16.msrb.mxu0 %v3620_v15  ;;  %v3713_v35 = vld [vmem:[#allocation6 + $0x5b0] sm:$0xf0]  ;;  %v4577_v36 = vld [vmem:[#allocation6 + $0x6a4] sm:$0xf]  ;;  %1839 = vmatmul.bf16.vlgmr.msra.gmra.mxu1 %v5003_v10  ;;  %v3588_v41 = vor.u32 %v4513_v31, %v3585_v32 }
  0x84   :  { %1887 = vmatpush.bf16.msrb.mxu1 %v3748_v16  ;;  %v3841_v37 = vld [vmem:[#allocation6 + $0x6b0] sm:$0xf0]  ;;  %v4609_v38 = vld [vmem:[#allocation6 + $0x7a4] sm:$0xf]  ;;  %1853 = vmatmul.bf16.vlgmr.msra.gmra.mxu2 %v4999_v1  ;;  %v3716_v42 = vor.u32 %v4545_v33, %v3713_v35 }
  0x85   :  { %1901 = vmatpush.bf16.msrb.mxu2 %v3876_v18  ;;  %v3969_v40 = vld [vmem:[#allocation6 + $0x7b0] sm:$0xf0]  ;;  %1867 = vmatmul.bf16.vlgmr.msra.gmra.mxu3 %v5005_v17  ;;  %v3844_v45 = vor.u32 %v4577_v36, %v3841_v37  ;;  %v4509_v46 = vld [vmem:[#allocation6 + $0x484] sm:$0xf] }
  0x86   :  { %1915 = vmatpush.bf16.msrb.mxu3 %v4004_v22  ;;  %v3569_v48 = vld [vmem:[#allocation6 + $0x490] sm:$0xf0]  ;;  %v4541_v49 = vld [vmem:[#allocation6 + $0x584] sm:$0xf]  ;;  %v3972_v50 = vor.u32 %v4609_v38, %v3969_v40 }
  0x87   :  { %1874 = vmatpush.bf16.msrb.mxu0 %v3604_v28  ;;  %v3697_v51 = vld [vmem:[#allocation6 + $0x590] sm:$0xf0]  ;;  %v4573_v52 = vld [vmem:[#allocation6 + $0x684] sm:$0xf]  ;;  %v3572_v56 = vor.u32 %v4509_v46, %v3569_v48  ;;  %v3111_v48 = vld [vmem:[#allocation6 + $0xe8] sm:$0xf] }
  0x88   :  { %1888 = vmatpush.bf16.msrb.mxu1 %v3732_v29  ;;  %v3825_v53 = vld [vmem:[#allocation6 + $0x690] sm:$0xf0]  ;;  %v4605_v54 = vld [vmem:[#allocation6 + $0x784] sm:$0xf]  ;;  %v3700_v57 = vor.u32 %v4541_v49, %v3697_v51  ;;  %v4396_v49 = vld [vmem:[#allocation6 + $0xf4] sm:$0xf0] }
  0x89   :  { %1902 = vmatpush.bf16.msrb.mxu2 %v3860_v30  ;;  %v3953_v55 = vld [vmem:[#allocation6 + $0x790] sm:$0xf0]  ;;  %v3828_v59 = vor.u32 %v4573_v52, %v3825_v53  ;;  %v4505_v60 = vld [vmem:[#allocation6 + $0x464] sm:$0xf]  ;;  %v4428_v52 = vld [vmem:[#allocation6 + $0x1f4] sm:$0xf0] }
  0x8a   :  { %1916 = vmatpush.bf16.msrb.mxu3 %v3988_v34  ;;  %v3553_v61 = vld [vmem:[#allocation6 + $0x470] sm:$0xf0]  ;;  %v4537_v62 = vld [vmem:[#allocation6 + $0x564] sm:$0xf]  ;;  %v3956_v63 = vor.u32 %v4605_v54, %v3953_v55  ;;  %v3367_v53 = vld [vmem:[#allocation6 + $0x2e8] sm:$0xf] }
  0x8b   :  { %1875 = vmatpush.bf16.msrb.mxu0 %v3588_v41  ;;  %v3681_v0 = vld [vmem:[#allocation6 + $0x570] sm:$0xf0]  ;;  %v4569_v2 = vld [vmem:[#allocation6 + $0x664] sm:$0xf]  ;;  %v3556_v6 = vor.u32 %v4505_v60, %v3553_v61  ;;  %v4460_v54 = vld [vmem:[#allocation6 + $0x2f4] sm:$0xf0]  ;;  %v3112_v61 = vor.u32 %v4396_v49, %v3111_v48 }
  0x8c   :  { %1889 = vmatpush.bf16.msrb.mxu1 %v3716_v42  ;;  %v3809_v3 = vld [vmem:[#allocation6 + $0x670] sm:$0xf0]  ;;  %v4601_v4 = vld [vmem:[#allocation6 + $0x764] sm:$0xf]  ;;  %v3684_v7 = vor.u32 %v4537_v62, %v3681_v0  ;;  %v3095_v0 = vld [vmem:[#allocation6 + $0xc8] sm:$0xf] }
  0x8d   :  { %1903 = vmatpush.bf16.msrb.mxu2 %v3844_v45  ;;  %v3937_v5 = vld [vmem:[#allocation6 + $0x770] sm:$0xf0]  ;;  %v3812_v8 = vor.u32 %v4569_v2, %v3809_v3  ;;  %v4501_v9 = vld [vmem:[#allocation6 + $0x444] sm:$0xf]  ;;  %v4392_v2 = vld [vmem:[#allocation6 + $0xd4] sm:$0xf0] }
  0x8e   :  { %1917 = vmatpush.bf16.msrb.mxu3 %v3972_v50  ;;  %v3537_v11 = vld [vmem:[#allocation6 + $0x450] sm:$0xf0]  ;;  %v4533_v12 = vld [vmem:[#allocation6 + $0x544] sm:$0xf]  ;;  %v3940_v13 = vor.u32 %v4601_v4, %v3937_v5  ;;  %v3239_v50 = vld [vmem:[#allocation6 + $0x1e8] sm:$0xf] }
  0x8f   :  { %1876 = vmatpush.bf16.msrb.mxu0 %v3572_v56  ;;  %v3665_v14 = vld [vmem:[#allocation6 + $0x550] sm:$0xf0]  ;;  %v4565_v15 = vld [vmem:[#allocation6 + $0x644] sm:$0xf]  ;;  %v3540_v20 = vor.u32 %v4501_v9, %v3537_v11  ;;  %v3240_v62 = vor.u32 %v4428_v52, %v3239_v50  ;;  %v3223_v3 = vld [vmem:[#allocation6 + $0x1c8] sm:$0xf]  ;;  %v3096_v11 = vor.u32 %v4392_v2, %v3095_v0 }
  0x90   :  { %1890 = vmatpush.bf16.msrb.mxu1 %v3700_v57  ;;  %v3793_v16 = vld [vmem:[#allocation6 + $0x650] sm:$0xf0]  ;;  %v4597_v18 = vld [vmem:[#allocation6 + $0x744] sm:$0xf]  ;;  %v3668_v21 = vor.u32 %v4533_v12, %v3665_v14  ;;  %v3495_v57 = vld [vmem:[#allocation6 + $0x3e8] sm:$0xf] }
  0x91   :  { %1904 = vmatpush.bf16.msrb.mxu2 %v3828_v59  ;;  %v3921_v19 = vld [vmem:[#allocation6 + $0x750] sm:$0xf0]  ;;  %v3796_v22 = vor.u32 %v4565_v15, %v3793_v16  ;;  %v4497_v23 = vld [vmem:[#allocation6 + $0x424] sm:$0xf]  ;;  %v4492_v59 = vld [vmem:[#allocation6 + $0x3f4] sm:$0xf0] }
  0x92   :  { %1918 = vmatpush.bf16.msrb.mxu3 %v3956_v63  ;;  %v3521_v24 = vld [vmem:[#allocation6 + $0x430] sm:$0xf0]  ;;  %v4529_v25 = vld [vmem:[#allocation6 + $0x524] sm:$0xf]  ;;  %v3924_v26 = vor.u32 %v4597_v18, %v3921_v19  ;;  %v3368_v63 = vor.u32 %v4460_v54, %v3367_v53  ;;  %v3496_v4 = vor.u32 %v4492_v59, %v3495_v57  ;;  %v4424_v5 = vld [vmem:[#allocation6 + $0x1d4] sm:$0xf0] }
  0x93   :  { %1877 = vmatpush.bf16.msrb.mxu0 %v3556_v6  ;;  %v3649_v27 = vld [vmem:[#allocation6 + $0x530] sm:$0xf0]  ;;  %v4561_v28 = vld [vmem:[#allocation6 + $0x624] sm:$0xf]  ;;  %v3524_v32 = vor.u32 %v4497_v23, %v3521_v24  ;;  %v3351_v6 = vld [vmem:[#allocation6 + $0x2c8] sm:$0xf]  ;;  %v3224_v12 = vor.u32 %v4424_v5, %v3223_v3 }
  0x94   :  { %1891 = vmatpush.bf16.msrb.mxu1 %v3684_v7  ;;  %v3777_v29 = vld [vmem:[#allocation6 + $0x630] sm:$0xf0]  ;;  %v4593_v30 = vld [vmem:[#allocation6 + $0x724] sm:$0xf]  ;;  %v3652_v35 = vor.u32 %v4529_v25, %v3649_v27  ;;  %v4456_v7 = vld [vmem:[#allocation6 + $0x2d4] sm:$0xf0] }
  0x95   :  { %1905 = vmatpush.bf16.msrb.mxu2 %v3812_v8  ;;  %v3905_v31 = vld [vmem:[#allocation6 + $0x730] sm:$0xf0]  ;;  %v4493_v33 = vld [vmem:[#allocation6 + $0x404] sm:$0xf]  ;;  %v3780_v36 = vor.u32 %v4561_v28, %v3777_v29  ;;  %v3479_v8 = vld [vmem:[#allocation6 + $0x3c8] sm:$0xf] }
  0x96   :  { %1919 = vmatpush.bf16.msrb.mxu3 %v3940_v13  ;;  %v3505_v34 = vld [vmem:[#allocation6 + $0x410] sm:$0xf0]  ;;  %v4525_v37 = vld [vmem:[#allocation6 + $0x504] sm:$0xf]  ;;  %v3908_v41 = vor.u32 %v4593_v30, %v3905_v31  ;;  %v4488_v9 = vld [vmem:[#allocation6 + $0x3d4] sm:$0xf0]  ;;  %v3352_v13 = vor.u32 %v4456_v7, %v3351_v6 }
  0x97   :  { %1878 = vmatpush.bf16.msrb.mxu0 %v3540_v20  ;;  %v3633_v38 = vld [vmem:[#allocation6 + $0x510] sm:$0xf0]  ;;  %v4557_v40 = vld [vmem:[#allocation6 + $0x604] sm:$0xf]  ;;  %v3508_v51 = vor.u32 %v4493_v33, %v3505_v34  ;;  %v3079_v14 = vld [vmem:[#allocation6 + $0xa8] sm:$0xf]  ;;  %v3480_v18 = vor.u32 %v4488_v9, %v3479_v8 }
  0x98   :  { %1892 = vmatpush.bf16.msrb.mxu1 %v3668_v21  ;;  %v3761_v42 = vld [vmem:[#allocation6 + $0x610] sm:$0xf0]  ;;  %v4589_v45 = vld [vmem:[#allocation6 + $0x704] sm:$0xf]  ;;  %v3636_v55 = vor.u32 %v4525_v37, %v3633_v38  ;;  %v4388_v15 = vld [vmem:[#allocation6 + $0xb4] sm:$0xf0] }
  0x99   :  { %1906 = vmatpush.bf16.msrb.mxu2 %v3796_v22  ;;  %v3889_v46 = vld [vmem:[#allocation6 + $0x710] sm:$0xf0]  ;;  %v3764_v56 = vor.u32 %v4557_v40, %v3761_v42  ;;  %v3207_v16 = vld [vmem:[#allocation6 + $0x1a8] sm:$0xf]  ;;  %v4420_v19 = vld [vmem:[#allocation6 + $0x1b4] sm:$0xf0]  ;;  %v3080_v24 = vor.u32 %v4388_v15, %v3079_v14 }
  0x9a   :  { %1920 = vmatpush.bf16.msrb.mxu3 %v3924_v26  ;;  %v3892_v60 = vor.u32 %v4589_v45, %v3889_v46  ;;  %v3335_v20 = vld [vmem:[#allocation6 + $0x2a8] sm:$0xf]  ;;  %v4452_v21 = vld [vmem:[#allocation6 + $0x2b4] sm:$0xf0]  ;;  %v3208_v25 = vor.u32 %v4420_v19, %v3207_v16 }
  0x9b   :  { %1879 = vmatpush.bf16.msrb.mxu0 %v3524_v32  ;;  %v3463_v22 = vld [vmem:[#allocation6 + $0x3a8] sm:$0xf]  ;;  %v4484_v23 = vld [vmem:[#allocation6 + $0x3b4] sm:$0xf0]  ;;  %v3336_v26 = vor.u32 %v4452_v21, %v3335_v20 }
  0x9c   :  { %1893 = vmatpush.bf16.msrb.mxu1 %v3652_v35  ;;  %v3063_v27 = vld [vmem:[#allocation6 + $0x88] sm:$0xf]  ;;  %v4384_v28 = vld [vmem:[#allocation6 + $0x94] sm:$0xf0]  ;;  %v3464_v30 = vor.u32 %v4484_v23, %v3463_v22 }
  0x9d   :  { %1907 = vmatpush.bf16.msrb.mxu2 %v3780_v36  ;;  %v3191_v29 = vld [vmem:[#allocation6 + $0x188] sm:$0xf]  ;;  %v4416_v31 = vld [vmem:[#allocation6 + $0x194] sm:$0xf0]  ;;  %v3064_v36 = vor.u32 %v4384_v28, %v3063_v27 }
  0x9e   :  { %1921 = vmatpush.bf16.msrb.mxu3 %v3908_v41  ;;  %v3319_v32 = vld [vmem:[#allocation6 + $0x288] sm:$0xf]  ;;  %v4448_v33 = vld [vmem:[#allocation6 + $0x294] sm:$0xf0]  ;;  %v3192_v37 = vor.u32 %v4416_v31, %v3191_v29 }
  0x9f   :  { %1880 = vmatpush.bf16.msrb.mxu0 %v3508_v51  ;;  %v3447_v34 = vld [vmem:[#allocation6 + $0x388] sm:$0xf]  ;;  %v4480_v35 = vld [vmem:[#allocation6 + $0x394] sm:$0xf0]  ;;  %v3320_v38 = vor.u32 %v4448_v33, %v3319_v32 }
  0xa0   :  { %1894 = vmatpush.bf16.msrb.mxu1 %v3636_v55  ;;  %v3047_v40 = vld [vmem:[#allocation6 + $0x68] sm:$0xf]  ;;  %v4380_v41 = vld [vmem:[#allocation6 + $0x74] sm:$0xf0]  ;;  %v3448_v45 = vor.u32 %v4480_v35, %v3447_v34 }
  0xa1   :  { %1908 = vmatpush.bf16.msrb.mxu2 %v3764_v56  ;;  %v3175_v42 = vld [vmem:[#allocation6 + $0x168] sm:$0xf]  ;;  %v4412_v46 = vld [vmem:[#allocation6 + $0x174] sm:$0xf0]  ;;  %v3048_v52 = vor.u32 %v4380_v41, %v3047_v40 }
  0xa2   :  { %1922 = vmatpush.bf16.msrb.mxu3 %v3892_v60  ;;  %1881 = vmatmul.bf16.vlgmr.msrb.gmra.mxu0 %v5009_v39  ;;  %v3303_v48 = vld [vmem:[#allocation6 + $0x268] sm:$0xf]  ;;  %v4444_v49 = vld [vmem:[#allocation6 + $0x274] sm:$0xf0]  ;;  %v3176_v53 = vor.u32 %v4412_v46, %v3175_v42 }
  0xa3   :  { %1929 = vmatpush.bf16.msra.mxu0 %v3112_v61  ;;  %1895 = vmatmul.bf16.vlgmr.msrb.gmra.mxu1 %v5013_v44  ;;  %v3431_v50 = vld [vmem:[#allocation6 + $0x368] sm:$0xf]  ;;  %v4476_v51 = vld [vmem:[#allocation6 + $0x374] sm:$0xf0]  ;;  %v3304_v54 = vor.u32 %v4444_v49, %v3303_v48 }
  0xa4   :  { %1943 = vmatpush.bf16.msra.mxu1 %v3240_v62  ;;  %1909 = vmatmul.bf16.vlgmr.msrb.gmra.mxu2 %v5011_v43  ;;  %v3031_v55 = vld [vmem:[#allocation6 + $0x48] sm:$0xf]  ;;  %v4376_v56 = vld [vmem:[#allocation6 + $0x54] sm:$0xf0]  ;;  %v3432_v59 = vor.u32 %v4476_v51, %v3431_v50 }
  0xa5   :  { %1957 = vmatpush.bf16.msra.mxu2 %v3368_v63  ;;  %1923 = vmatmul.bf16.vlgmr.msrb.gmra.mxu3 %v5015_v47  ;;  %v3159_v57 = vld [vmem:[#allocation6 + $0x148] sm:$0xf]  ;;  %v4408_v60 = vld [vmem:[#allocation6 + $0x154] sm:$0xf0]  ;;  %v3032_v2 = vor.u32 %v4376_v56, %v3031_v55 }
  0xa6   :  { %1971 = vmatpush.bf16.msra.mxu3 %v3496_v4  ;;  %v3287_v61 = vld [vmem:[#allocation6 + $0x248] sm:$0xf]  ;;  %v4440_v62 = vld [vmem:[#allocation6 + $0x254] sm:$0xf0]  ;;  %v3160_v3 = vor.u32 %v4408_v60, %v3159_v57 }
  0xa7   :  { %1930 = vmatpush.bf16.msra.mxu0 %v3096_v11  ;;  %v3415_v63 = vld [vmem:[#allocation6 + $0x348] sm:$0xf]  ;;  %v4472_v0 = vld [vmem:[#allocation6 + $0x354] sm:$0xf0]  ;;  %v3288_v4 = vor.u32 %v4440_v62, %v3287_v61 }
  0xa8   :  { %1944 = vmatpush.bf16.msra.mxu1 %v3224_v12  ;;  %v3015_v5 = vld [vmem:[#allocation6 + $0x28] sm:$0xf]  ;;  %v4372_v6 = vld [vmem:[#allocation6 + $0x34] sm:$0xf0]  ;;  %v3416_v8 = vor.u32 %v4472_v0, %v3415_v63 }
  0xa9   :  { %1958 = vmatpush.bf16.msra.mxu2 %v3352_v13  ;;  %v3143_v7 = vld [vmem:[#allocation6 + $0x128] sm:$0xf]  ;;  %v4404_v9 = vld [vmem:[#allocation6 + $0x134] sm:$0xf0]  ;;  %v3016_v15 = vor.u32 %v4372_v6, %v3015_v5 }
  0xaa   :  { %1972 = vmatpush.bf16.msra.mxu3 %v3480_v18  ;;  %v3271_v11 = vld [vmem:[#allocation6 + $0x228] sm:$0xf]  ;;  %v4436_v12 = vld [vmem:[#allocation6 + $0x234] sm:$0xf0]  ;;  %v3144_v19 = vor.u32 %v4404_v9, %v3143_v7 }
  0xab   :  { %1931 = vmatpush.bf16.msra.mxu0 %v3080_v24  ;;  %v3399_v13 = vld [vmem:[#allocation6 + $0x328] sm:$0xf]  ;;  %v4468_v14 = vld [vmem:[#allocation6 + $0x334] sm:$0xf0]  ;;  %v3272_v20 = vor.u32 %v4436_v12, %v3271_v11 }
  0xac   :  { %1945 = vmatpush.bf16.msra.mxu1 %v3208_v25  ;;  %v2999_v16 = vld [vmem:[#allocation6 + $0x8] sm:$0xf]  ;;  %v4368_v18 = vld [vmem:[#allocation6 + $0x14] sm:$0xf0]  ;;  %v3400_v24 = vor.u32 %v4468_v14, %v3399_v13 }
  0xad   :  { %1959 = vmatpush.bf16.msra.mxu2 %v3336_v26  ;;  %v3127_v21 = vld [vmem:[#allocation6 + $0x108] sm:$0xf]  ;;  %v4400_v22 = vld [vmem:[#allocation6 + $0x114] sm:$0xf0]  ;;  %v3000_v31 = vor.u32 %v4368_v18, %v2999_v16 }
  0xae   :  { %1973 = vmatpush.bf16.msra.mxu3 %v3464_v30  ;;  %v3255_v23 = vld [vmem:[#allocation6 + $0x208] sm:$0xf]  ;;  %v4432_v25 = vld [vmem:[#allocation6 + $0x214] sm:$0xf0]  ;;  %v3128_v35 = vor.u32 %v4400_v22, %v3127_v21 }
  0xaf   :  { %1932 = vmatpush.bf16.msra.mxu0 %v3064_v36  ;;  %v3383_v26 = vld [vmem:[#allocation6 + $0x308] sm:$0xf]  ;;  %v4464_v27 = vld [vmem:[#allocation6 + $0x314] sm:$0xf0]  ;;  %v3256_v36 = vor.u32 %v4432_v25, %v3255_v23 }
  0xb0   :  { %1946 = vmatpush.bf16.msra.mxu1 %v3192_v37  ;;  %v3623_v28 = vld [vmem:[#allocation6 + $0x4e8] sm:$0xf]  ;;  %v4524_v29 = vld [vmem:[#allocation6 + $0x4f4] sm:$0xf0]  ;;  %v3384_v40 = vor.u32 %v4464_v27, %v3383_v26 }
  0xb1   :  { %1960 = vmatpush.bf16.msra.mxu2 %v3320_v38  ;;  %v3751_v30 = vld [vmem:[#allocation6 + $0x5e8] sm:$0xf]  ;;  %v4556_v32 = vld [vmem:[#allocation6 + $0x5f4] sm:$0xf0]  ;;  %v3624_v41 = vor.u32 %v4524_v29, %v3623_v28 }
  0xb2   :  { %1974 = vmatpush.bf16.msra.mxu3 %v3448_v45  ;;  %v3879_v33 = vld [vmem:[#allocation6 + $0x6e8] sm:$0xf]  ;;  %v4588_v34 = vld [vmem:[#allocation6 + $0x6f4] sm:$0xf0]  ;;  %v3752_v42 = vor.u32 %v4556_v32, %v3751_v30 }
  0xb3   :  { %1933 = vmatpush.bf16.msra.mxu0 %v3048_v52  ;;  %v4007_v37 = vld [vmem:[#allocation6 + $0x7e8] sm:$0xf]  ;;  %v4620_v38 = vld [vmem:[#allocation6 + $0x7f4] sm:$0xf0]  ;;  %v3880_v45 = vor.u32 %v4588_v34, %v3879_v33 }
  0xb4   :  { %1947 = vmatpush.bf16.msra.mxu1 %v3176_v53  ;;  %v3607_v46 = vld [vmem:[#allocation6 + $0x4c8] sm:$0xf]  ;;  %v4520_v48 = vld [vmem:[#allocation6 + $0x4d4] sm:$0xf0]  ;;  %v4008_v50 = vor.u32 %v4620_v38, %v4007_v37 }
  0xb5   :  { %1961 = vmatpush.bf16.msra.mxu2 %v3304_v54  ;;  %v3735_v49 = vld [vmem:[#allocation6 + $0x5c8] sm:$0xf]  ;;  %v4552_v51 = vld [vmem:[#allocation6 + $0x5d4] sm:$0xf0]  ;;  %v3608_v56 = vor.u32 %v4520_v48, %v3607_v46 }
  0xb6   :  { %1975 = vmatpush.bf16.msra.mxu3 %v3432_v59  ;;  %v3863_v52 = vld [vmem:[#allocation6 + $0x6c8] sm:$0xf]  ;;  %v4584_v53 = vld [vmem:[#allocation6 + $0x6d4] sm:$0xf0]  ;;  %v3736_v57 = vor.u32 %v4552_v51, %v3735_v49 }
  0xb7   :  { %1934 = vmatpush.bf16.msra.mxu0 %v3032_v2  ;;  %v3991_v54 = vld [vmem:[#allocation6 + $0x7c8] sm:$0xf]  ;;  %v4616_v55 = vld [vmem:[#allocation6 + $0x7d4] sm:$0xf0]  ;;  %v3864_v59 = vor.u32 %v4584_v53, %v3863_v52 }
  0xb8   :  { %1948 = vmatpush.bf16.msra.mxu1 %v3160_v3  ;;  %v3591_v60 = vld [vmem:[#allocation6 + $0x4a8] sm:$0xf]  ;;  %v4516_v61 = vld [vmem:[#allocation6 + $0x4b4] sm:$0xf0]  ;;  %v3992_v63 = vor.u32 %v4616_v55, %v3991_v54 }
  0xb9   :  { %1962 = vmatpush.bf16.msra.mxu2 %v3288_v4  ;;  %v3719_v62 = vld [vmem:[#allocation6 + $0x5a8] sm:$0xf]  ;;  %v4548_v0 = vld [vmem:[#allocation6 + $0x5b4] sm:$0xf0]  ;;  %v3592_v6 = vor.u32 %v4516_v61, %v3591_v60 }
  0xba   :  { %1976 = vmatpush.bf16.msra.mxu3 %v3416_v8  ;;  %v3847_v2 = vld [vmem:[#allocation6 + $0x6a8] sm:$0xf]  ;;  %v4580_v3 = vld [vmem:[#allocation6 + $0x6b4] sm:$0xf0]  ;;  %v3720_v7 = vor.u32 %v4548_v0, %v3719_v62 }
  0xbb   :  { %1935 = vmatpush.bf16.msra.mxu0 %v3016_v15  ;;  %v3975_v4 = vld [vmem:[#allocation6 + $0x7a8] sm:$0xf]  ;;  %v4612_v5 = vld [vmem:[#allocation6 + $0x7b4] sm:$0xf0]  ;;  %v3848_v8 = vor.u32 %v4580_v3, %v3847_v2 }
  0xbc   :  { %1949 = vmatpush.bf16.msra.mxu1 %v3144_v19  ;;  %v3575_v9 = vld [vmem:[#allocation6 + $0x488] sm:$0xf]  ;;  %v4512_v11 = vld [vmem:[#allocation6 + $0x494] sm:$0xf0]  ;;  %v3976_v13 = vor.u32 %v4612_v5, %v3975_v4 }
  0xbd   :  { %1963 = vmatpush.bf16.msra.mxu2 %v3272_v20  ;;  %v3703_v12 = vld [vmem:[#allocation6 + $0x588] sm:$0xf]  ;;  %v4544_v14 = vld [vmem:[#allocation6 + $0x594] sm:$0xf0]  ;;  %v3576_v20 = vor.u32 %v4512_v11, %v3575_v9  ;;  %v4394_v11 = vld [vmem:[#allocation6 + $0xec] sm:$0xf] }
  0xbe   :  { %1977 = vmatpush.bf16.msra.mxu3 %v3400_v24  ;;  %v3831_v15 = vld [vmem:[#allocation6 + $0x688] sm:$0xf]  ;;  %v4576_v16 = vld [vmem:[#allocation6 + $0x694] sm:$0xf0]  ;;  %v3704_v21 = vor.u32 %v4544_v14, %v3703_v12  ;;  %v3113_v12 = vld [vmem:[#allocation6 + $0xf8] sm:$0xf0] }
  0xbf   :  { %1936 = vmatpush.bf16.msra.mxu0 %v3000_v31  ;;  %v3959_v18 = vld [vmem:[#allocation6 + $0x788] sm:$0xf]  ;;  %v4608_v19 = vld [vmem:[#allocation6 + $0x794] sm:$0xf0]  ;;  %v3832_v22 = vor.u32 %v4576_v16, %v3831_v15  ;;  %v3241_v15 = vld [vmem:[#allocation6 + $0x1f8] sm:$0xf0] }
  0xc0   :  { %1950 = vmatpush.bf16.msra.mxu1 %v3128_v35  ;;  %v3559_v23 = vld [vmem:[#allocation6 + $0x468] sm:$0xf]  ;;  %v4508_v24 = vld [vmem:[#allocation6 + $0x474] sm:$0xf0]  ;;  %v3960_v26 = vor.u32 %v4608_v19, %v3959_v18  ;;  %v4458_v16 = vld [vmem:[#allocation6 + $0x2ec] sm:$0xf] }
  0xc1   :  { %1964 = vmatpush.bf16.msra.mxu2 %v3256_v36  ;;  %v3687_v25 = vld [vmem:[#allocation6 + $0x568] sm:$0xf]  ;;  %v4540_v27 = vld [vmem:[#allocation6 + $0x574] sm:$0xf0]  ;;  %v3560_v32 = vor.u32 %v4508_v24, %v3559_v23  ;;  %v3369_v18 = vld [vmem:[#allocation6 + $0x2f8] sm:$0xf0]  ;;  %v3116_v24 = vor.u32 %v4394_v11, %v3113_v12 }
  0xc2   :  { %1978 = vmatpush.bf16.msra.mxu3 %v3384_v40  ;;  %1937 = vmatmul.bf16.vlgmr.msra.gmra.mxu0 %v4997_v58  ;;  %v3815_v28 = vld [vmem:[#allocation6 + $0x668] sm:$0xf]  ;;  %v4572_v29 = vld [vmem:[#allocation6 + $0x674] sm:$0xf0]  ;;  %v3688_v33 = vor.u32 %v4540_v27, %v3687_v25  ;;  %v4390_v27 = vld [vmem:[#allocation6 + $0xcc] sm:$0xf] }
  0xc3   :  { %1985 = vmatpush.bf16.msrb.mxu0 %v3624_v41  ;;  %1951 = vmatmul.bf16.vlgmr.msra.gmra.mxu1 %v5003_v10  ;;  %v3943_v30 = vld [vmem:[#allocation6 + $0x768] sm:$0xf]  ;;  %v4604_v31 = vld [vmem:[#allocation6 + $0x774] sm:$0xf0]  ;;  %v3816_v34 = vor.u32 %v4572_v29, %v3815_v28  ;;  %v3097_v28 = vld [vmem:[#allocation6 + $0xd8] sm:$0xf0] }
  0xc4   :  { %1999 = vmatpush.bf16.msrb.mxu1 %v3752_v42  ;;  %1965 = vmatmul.bf16.vlgmr.msra.gmra.mxu2 %v4999_v1  ;;  %v3543_v35 = vld [vmem:[#allocation6 + $0x448] sm:$0xf]  ;;  %v4504_v36 = vld [vmem:[#allocation6 + $0x454] sm:$0xf0]  ;;  %v3944_v38 = vor.u32 %v4604_v31, %v3943_v30  ;;  %v4422_v29 = vld [vmem:[#allocation6 + $0x1cc] sm:$0xf] }
  0xc5   :  { %2013 = vmatpush.bf16.msrb.mxu2 %v3880_v45  ;;  %1979 = vmatmul.bf16.vlgmr.msra.gmra.mxu3 %v5005_v17  ;;  %v3671_v37 = vld [vmem:[#allocation6 + $0x548] sm:$0xf]  ;;  %v4536_v40 = vld [vmem:[#allocation6 + $0x554] sm:$0xf0]  ;;  %v3544_v48 = vor.u32 %v4504_v36, %v3543_v35  ;;  %v3225_v31 = vld [vmem:[#allocation6 + $0x1d8] sm:$0xf0]  ;;  %v3100_v36 = vor.u32 %v4390_v27, %v3097_v28 }
  0xc6   :  { %2027 = vmatpush.bf16.msrb.mxu3 %v4008_v50  ;;  %v3799_v41 = vld [vmem:[#allocation6 + $0x648] sm:$0xf]  ;;  %v4568_v42 = vld [vmem:[#allocation6 + $0x654] sm:$0xf0]  ;;  %v3672_v49 = vor.u32 %v4536_v40, %v3671_v37  ;;  %v3481_v35 = vld [vmem:[#allocation6 + $0x3d8] sm:$0xf0]  ;;  %v3228_v37 = vor.u32 %v4422_v29, %v3225_v31 }
  0xc7   :  { %1986 = vmatpush.bf16.msrb.mxu0 %v3608_v56  ;;  %v3927_v45 = vld [vmem:[#allocation6 + $0x748] sm:$0xf]  ;;  %v4600_v46 = vld [vmem:[#allocation6 + $0x754] sm:$0xf0]  ;;  %v3800_v50 = vor.u32 %v4568_v42, %v3799_v41  ;;  %v4386_v40 = vld [vmem:[#allocation6 + $0xac] sm:$0xf] }
  0xc8   :  { %2000 = vmatpush.bf16.msrb.mxu1 %v3736_v57  ;;  %v3527_v51 = vld [vmem:[#allocation6 + $0x428] sm:$0xf]  ;;  %v4500_v52 = vld [vmem:[#allocation6 + $0x434] sm:$0xf0]  ;;  %v3928_v54 = vor.u32 %v4600_v46, %v3927_v45  ;;  %v3081_v41 = vld [vmem:[#allocation6 + $0xb8] sm:$0xf0] }
  0xc9   :  { %2014 = vmatpush.bf16.msrb.mxu2 %v3864_v59  ;;  %v3655_v53 = vld [vmem:[#allocation6 + $0x528] sm:$0xf]  ;;  %v4532_v55 = vld [vmem:[#allocation6 + $0x534] sm:$0xf0]  ;;  %v3528_v61 = vor.u32 %v4500_v52, %v3527_v51  ;;  %v4418_v42 = vld [vmem:[#allocation6 + $0x1ac] sm:$0xf]  ;;  %v3084_v52 = vor.u32 %v4386_v40, %v3081_v41 }
  0xca   :  { %2028 = vmatpush.bf16.msrb.mxu3 %v3992_v63  ;;  %v3783_v56 = vld [vmem:[#allocation6 + $0x628] sm:$0xf]  ;;  %v4564_v57 = vld [vmem:[#allocation6 + $0x634] sm:$0xf0]  ;;  %v3656_v0 = vor.u32 %v4532_v55, %v3655_v53  ;;  %v3209_v46 = vld [vmem:[#allocation6 + $0x1b8] sm:$0xf0] }
  0xcb   :  { %1987 = vmatpush.bf16.msrb.mxu0 %v3592_v6  ;;  %v3911_v59 = vld [vmem:[#allocation6 + $0x728] sm:$0xf]  ;;  %v4596_v60 = vld [vmem:[#allocation6 + $0x734] sm:$0xf0]  ;;  %v3784_v2 = vor.u32 %v4564_v57, %v3783_v56  ;;  %v3465_v51 = vld [vmem:[#allocation6 + $0x3b8] sm:$0xf0]  ;;  %v3212_v53 = vor.u32 %v4418_v42, %v3209_v46 }
  0xcc   :  { %2001 = vmatpush.bf16.msrb.mxu1 %v3720_v7  ;;  %v3511_v62 = vld [vmem:[#allocation6 + $0x408] sm:$0xf]  ;;  %v4496_v63 = vld [vmem:[#allocation6 + $0x414] sm:$0xf0]  ;;  %v3912_v6 = vor.u32 %v4596_v60, %v3911_v59  ;;  %v4382_v55 = vld [vmem:[#allocation6 + $0x8c] sm:$0xf] }
  0xcd   :  { %2015 = vmatpush.bf16.msrb.mxu2 %v3848_v8  ;;  %v3639_v3 = vld [vmem:[#allocation6 + $0x508] sm:$0xf]  ;;  %v4528_v4 = vld [vmem:[#allocation6 + $0x514] sm:$0xf0]  ;;  %v3512_v14 = vor.u32 %v4496_v63, %v3511_v62  ;;  %v3065_v56 = vld [vmem:[#allocation6 + $0x98] sm:$0xf0] }
  0xce   :  { %2029 = vmatpush.bf16.msrb.mxu3 %v3976_v13  ;;  %v3767_v5 = vld [vmem:[#allocation6 + $0x608] sm:$0xf]  ;;  %v4560_v7 = vld [vmem:[#allocation6 + $0x614] sm:$0xf0]  ;;  %v4426_v13 = vld [vmem:[#allocation6 + $0x1ec] sm:$0xf]  ;;  %v3640_v19 = vor.u32 %v4528_v4, %v3639_v3  ;;  %v5037_v3 = vpop.f32.mrf.mxu0 }
  0xcf   :  { %1988 = vmatpush.bf16.msrb.mxu0 %v3576_v20  ;;  %v3895_v8 = vld [vmem:[#allocation6 + $0x708] sm:$0xf]  ;;  %v4592_v9 = vld [vmem:[#allocation6 + $0x714] sm:$0xf0]  ;;  %v3768_v20 = vor.u32 %v4560_v7, %v3767_v5  ;;  %v3244_v25 = vor.u32 %v4426_v13, %v3241_v15  ;;  %v4414_v57 = vld [vmem:[#allocation6 + $0x18c] sm:$0xf] }
  0xd0   :  { %2002 = vmatpush.bf16.msrb.mxu1 %v3704_v21  ;;  %v4490_v21 = vld [vmem:[#allocation6 + $0x3ec] sm:$0xf]  ;;  %v3896_v23 = vor.u32 %v4592_v9, %v3895_v8  ;;  %v3193_v60 = vld [vmem:[#allocation6 + $0x198] sm:$0xf0]  ;;  %v5039_v9 = vpop.f32.mrf.mxu1 }
  0xd1   :  { %2016 = vmatpush.bf16.msrb.mxu2 %v3832_v22  ;;  %v3497_v22 = vld [vmem:[#allocation6 + $0x3f8] sm:$0xf0]  ;;  %v4478_v63 = vld [vmem:[#allocation6 + $0x38c] sm:$0xf]  ;;  %v3196_v4 = vor.u32 %v4414_v57, %v3193_v60 }
  0xd2   :  { %2030 = vmatpush.bf16.msrb.mxu3 %v3960_v26  ;;  %v3372_v26 = vor.u32 %v4458_v16, %v3369_v18  ;;  %v3500_v30 = vor.u32 %v4490_v21, %v3497_v22  ;;  %v3321_v62 = vld [vmem:[#allocation6 + $0x298] sm:$0xf0]  ;;  %v4410_v8 = vld [vmem:[#allocation6 + $0x16c] sm:$0xf] }
  0xd3   :  { %1989 = vmatpush.bf16.msrb.mxu0 %v3560_v32  ;;  %v4454_v32 = vld [vmem:[#allocation6 + $0x2cc] sm:$0xf]  ;;  %v3049_v7 = vld [vmem:[#allocation6 + $0x78] sm:$0xf0] }
  0xd4   :  { %2003 = vmatpush.bf16.msrb.mxu1 %v3688_v33  ;;  %v3353_v33 = vld [vmem:[#allocation6 + $0x2d8] sm:$0xf0]  ;;  %v4442_v13 = vld [vmem:[#allocation6 + $0x26c] sm:$0xf] }
  0xd5   :  { %2017 = vmatpush.bf16.msrb.mxu2 %v3816_v34  ;;  %v4486_v34 = vld [vmem:[#allocation6 + $0x3cc] sm:$0xf]  ;;  %v3177_v12 = vld [vmem:[#allocation6 + $0x178] sm:$0xf0] }
  0xd6   :  { %2031 = vmatpush.bf16.msrb.mxu3 %v3944_v38  ;;  %v3356_v38 = vor.u32 %v4454_v32, %v3353_v33  ;;  %v3484_v45 = vor.u32 %v4486_v34, %v3481_v35  ;;  %v4474_v15 = vld [vmem:[#allocation6 + $0x36c] sm:$0xf]  ;;  %v3433_v16 = vld [vmem:[#allocation6 + $0x378] sm:$0xf0]  ;;  %v5043_v32 = vpop.f32.mrf.mxu3 }
  0xd7   :  { %1990 = vmatpush.bf16.msrb.mxu0 %v3544_v48  ;;  %v4450_v48 = vld [vmem:[#allocation6 + $0x2ac] sm:$0xf]  ;;  %v3033_v22 = vld [vmem:[#allocation6 + $0x58] sm:$0xf0] }
  0xd8   :  { %2004 = vmatpush.bf16.msrb.mxu1 %v3672_v49  ;;  %v3337_v49 = vld [vmem:[#allocation6 + $0x2b8] sm:$0xf0]  ;;  %v4374_v21 = vld [vmem:[#allocation6 + $0x4c] sm:$0xf] }
  0xd9   :  { %2018 = vmatpush.bf16.msrb.mxu2 %v3800_v50  ;;  %v4482_v50 = vld [vmem:[#allocation6 + $0x3ac] sm:$0xf]  ;;  %v3289_v27 = vld [vmem:[#allocation6 + $0x258] sm:$0xf0]  ;;  %v3036_v31 = vor.u32 %v4374_v21, %v3033_v22 }
  0xda   :  { %2032 = vmatpush.bf16.msrb.mxu3 %v3928_v54  ;;  %v3340_v54 = vor.u32 %v4450_v48, %v3337_v49  ;;  %v3468_v59 = vor.u32 %v4482_v50, %v3465_v51  ;;  %v4470_v28 = vld [vmem:[#allocation6 + $0x34c] sm:$0xf]  ;;  %v3417_v29 = vld [vmem:[#allocation6 + $0x358] sm:$0xf0]  ;;  %v5047_v49 = vpop.f32.mrf.mxu1 }
  0xdb   :  { %1991 = vmatpush.bf16.msrb.mxu0 %v3528_v61  ;;  %v4446_v61 = vld [vmem:[#allocation6 + $0x28c] sm:$0xf]  ;;  %v3145_v40 = vld [vmem:[#allocation6 + $0x138] sm:$0xf0] }
  0xdc   :  { %2005 = vmatpush.bf16.msrb.mxu1 %v3656_v0  ;;  %v3449_v0 = vld [vmem:[#allocation6 + $0x398] sm:$0xf0]  ;;  %v3324_v5 = vor.u32 %v4446_v61, %v3321_v62  ;;  %v4370_v35 = vld [vmem:[#allocation6 + $0x2c] sm:$0xf] }
  0xdd   :  { %2019 = vmatpush.bf16.msrb.mxu2 %v3784_v2  ;;  %v3068_v2 = vor.u32 %v4382_v55, %v3065_v56  ;;  %v3452_v11 = vor.u32 %v4478_v63, %v3449_v0  ;;  %v4434_v41 = vld [vmem:[#allocation6 + $0x22c] sm:$0xf]  ;;  %v3273_v42 = vld [vmem:[#allocation6 + $0x238] sm:$0xf0] }
  0xde   :  { %2033 = vmatpush.bf16.msrb.mxu3 %v3912_v6  ;;  %v4378_v6 = vld [vmem:[#allocation6 + $0x6c] sm:$0xf]  ;;  %v3401_v48 = vld [vmem:[#allocation6 + $0x338] sm:$0xf0] }
  0xdf   :  { %1992 = vmatpush.bf16.msrb.mxu0 %v3512_v14  ;;  %v3305_v14 = vld [vmem:[#allocation6 + $0x278] sm:$0xf0]  ;;  %v3052_v18 = vor.u32 %v4378_v6, %v3049_v7  ;;  %v4466_v46 = vld [vmem:[#allocation6 + $0x32c] sm:$0xf] }
  0xe0   :  { %2006 = vmatpush.bf16.msrb.mxu1 %v3640_v19  ;;  %v3180_v19 = vor.u32 %v4410_v8, %v3177_v12  ;;  %v4366_v51 = vld [vmem:[#allocation6 + $0xc] sm:$0xf]  ;;  %v3129_v56 = vld [vmem:[#allocation6 + $0x118] sm:$0xf0] }
  0xe1   :  { %2020 = vmatpush.bf16.msrb.mxu2 %v3768_v20  ;;  %v3308_v20 = vor.u32 %v4442_v13, %v3305_v14  ;;  %v4398_v55 = vld [vmem:[#allocation6 + $0x10c] sm:$0xf]  ;;  %v3257_v60 = vld [vmem:[#allocation6 + $0x218] sm:$0xf0] }
  0xe2   :  { %2034 = vmatpush.bf16.msrb.mxu3 %v3896_v23  ;;  %1993 = vmatmul.bf16.vlgmr.msrb.gmra.mxu0 %v5009_v39  ;;  %v4406_v23 = vld [vmem:[#allocation6 + $0x14c] sm:$0xf]  ;;  %v3385_v62 = vld [vmem:[#allocation6 + $0x318] sm:$0xf0]  ;;  %v3132_v8 = vor.u32 %v4398_v55, %v3129_v56 }
  0xe3   :  { %2041 = vmatpush.bf16.msra.mxu0 %v3116_v24  ;;  %2007 = vmatmul.bf16.vlgmr.msrb.gmra.mxu1 %v5013_v44  ;;  %v3436_v24 = vor.u32 %v4474_v15, %v3433_v16  ;;  %v4430_v57 = vld [vmem:[#allocation6 + $0x20c] sm:$0xf]  ;;  %v3625_v0 = vld [vmem:[#allocation6 + $0x4f8] sm:$0xf0] }
  0xe4   :  { %2055 = vmatpush.bf16.msra.mxu1 %v3244_v25  ;;  %2021 = vmatmul.bf16.vlgmr.msrb.gmra.mxu2 %v5011_v43  ;;  %v3161_v25 = vld [vmem:[#allocation6 + $0x158] sm:$0xf0]  ;;  %v4462_v61 = vld [vmem:[#allocation6 + $0x30c] sm:$0xf] }
  0xe5   :  { %2069 = vmatpush.bf16.msra.mxu2 %v3372_v26  ;;  %2035 = vmatmul.bf16.vlgmr.msrb.gmra.mxu3 %v5015_v47  ;;  %v4438_v26 = vld [vmem:[#allocation6 + $0x24c] sm:$0xf]  ;;  %v3164_v33 = vor.u32 %v4406_v23, %v3161_v25  ;;  %v3881_v7 = vld [vmem:[#allocation6 + $0x6f8] sm:$0xf0]  ;;  %v3388_v15 = vor.u32 %v4462_v61, %v3385_v62 }
  0xe6   :  { %2083 = vmatpush.bf16.msra.mxu3 %v3500_v30  ;;  %v5041_v30 = vpop.f32.mrf.mxu2  ;;  %v3292_v34 = vor.u32 %v4438_v26, %v3289_v27  ;;  %v4522_v63 = vld [vmem:[#allocation6 + $0x4ec] sm:$0xf]  ;;  %v4009_v13 = vld [vmem:[#allocation6 + $0x7f8] sm:$0xf0] }
  0xe7   :  { %2042 = vmatpush.bf16.msra.mxu0 %v3100_v36  ;;  %v3017_v36 = vld [vmem:[#allocation6 + $0x38] sm:$0xf0]  ;;  %v4586_v6 = vld [vmem:[#allocation6 + $0x6ec] sm:$0xf]  ;;  %v3628_v16 = vor.u32 %v4522_v63, %v3625_v0 }
  0xe8   :  { %2056 = vmatpush.bf16.msra.mxu1 %v3228_v37  ;;  %v4402_v37 = vld [vmem:[#allocation6 + $0x12c] sm:$0xf]  ;;  %v3020_v50 = vor.u32 %v4370_v35, %v3017_v36  ;;  %v3609_v22 = vld [vmem:[#allocation6 + $0x4d8] sm:$0xf0] }
  0xe9   :  { %2070 = vmatpush.bf16.msra.mxu2 %v3356_v38  ;;  %v3420_v38 = vor.u32 %v4470_v28, %v3417_v29  ;;  %v4618_v12 = vld [vmem:[#allocation6 + $0x7ec] sm:$0xf]  ;;  %v3737_v25 = vld [vmem:[#allocation6 + $0x5d8] sm:$0xf0] }
  0xea   :  { %2084 = vmatpush.bf16.msra.mxu3 %v3484_v45  ;;  %v5045_v45 = vpop.f32.mrf.mxu0  ;;  %v4518_v21 = vld [vmem:[#allocation6 + $0x4cc] sm:$0xf]  ;;  %v3865_v27 = vld [vmem:[#allocation6 + $0x6d8] sm:$0xf0] }
  0xeb   :  { %2043 = vmatpush.bf16.msra.mxu0 %v3084_v52  ;;  %v3001_v52 = vld [vmem:[#allocation6 + $0x18] sm:$0xf0]  ;;  %v4550_v23 = vld [vmem:[#allocation6 + $0x5cc] sm:$0xf] }
  0xec   :  { %2057 = vmatpush.bf16.msra.mxu1 %v3212_v53  ;;  %v3148_v53 = vor.u32 %v4402_v37, %v3145_v40  ;;  %v4582_v26 = vld [vmem:[#allocation6 + $0x6cc] sm:$0xf]  ;;  %v3740_v35 = vor.u32 %v4550_v23, %v3737_v25  ;;  %v3577_v56 = vld [vmem:[#allocation6 + $0x498] sm:$0xf0] }
  0xed   :  { %2071 = vmatpush.bf16.msra.mxu2 %v3340_v54  ;;  %v3276_v54 = vor.u32 %v4434_v41, %v3273_v42  ;;  %v4614_v29 = vld [vmem:[#allocation6 + $0x7cc] sm:$0xf]  ;;  %v3868_v36 = vor.u32 %v4582_v26, %v3865_v27  ;;  %v3721_v42 = vld [vmem:[#allocation6 + $0x5b8] sm:$0xf0] }
  0xee   :  { %2085 = vmatpush.bf16.msra.mxu3 %v3468_v59  ;;  %v3404_v59 = vor.u32 %v4466_v46, %v3401_v48  ;;  %v5049_v14 = vpop.f32.mrf.mxu2  ;;  %v4514_v37 = vld [vmem:[#allocation6 + $0x4ac] sm:$0xf]  ;;  %v3849_v48 = vld [vmem:[#allocation6 + $0x6b8] sm:$0xf0] }
  0xef   :  { %2044 = vmatpush.bf16.msra.mxu0 %v3068_v2  ;;  %v4554_v2 = vld [vmem:[#allocation6 + $0x5ec] sm:$0xf]  ;;  %v3833_v61 = vld [vmem:[#allocation6 + $0x698] sm:$0xf0] }
  0xf0   :  { %2058 = vmatpush.bf16.msra.mxu1 %v3196_v4  ;;  %v3004_v4 = vor.u32 %v4366_v51, %v3001_v52  ;;  %v4546_v40 = vld [vmem:[#allocation6 + $0x5ac] sm:$0xf]  ;;  %v3977_v51 = vld [vmem:[#allocation6 + $0x7b8] sm:$0xf0] }
  0xf1   :  { %2072 = vmatpush.bf16.msra.mxu2 %v3324_v5  ;;  %v3753_v5 = vld [vmem:[#allocation6 + $0x5f8] sm:$0xf0]  ;;  %v4578_v46 = vld [vmem:[#allocation6 + $0x6ac] sm:$0xf] }
  0xf2   :  { %2086 = vmatpush.bf16.msra.mxu3 %v3452_v11  ;;  %v3260_v11 = vor.u32 %v4430_v57, %v3257_v60  ;;  %v5053_v28 = vpop.f32.mrf.mxu0  ;;  %v4510_v55 = vld [vmem:[#allocation6 + $0x48c] sm:$0xf]  ;;  %v3961_v63 = vld [vmem:[#allocation6 + $0x798] sm:$0xf0] }
  0xf3   :  { %2045 = vmatpush.bf16.msra.mxu0 %v3052_v18  ;;  %v5051_v18 = vpop.f32.mrf.mxu3  ;;  %v4574_v60 = vld [vmem:[#allocation6 + $0x68c] sm:$0xf]  ;;  %v3673_v27 = vld [vmem:[#allocation6 + $0x558] sm:$0xf0] }
  0xf4   :  { %2059 = vmatpush.bf16.msra.mxu1 %v3180_v19  ;;  %v3756_v19 = vor.u32 %v4554_v2, %v3753_v5  ;;  %v4506_v5 = vld [vmem:[#allocation6 + $0x46c] sm:$0xf] }
  0xf5   :  { %2073 = vmatpush.bf16.msra.mxu2 %v3308_v20  ;;  %v3884_v20 = vor.u32 %v4586_v6, %v3881_v7  ;;  %v3561_v6 = vld [vmem:[#allocation6 + $0x478] sm:$0xf0]  ;;  %v4538_v7 = vld [vmem:[#allocation6 + $0x56c] sm:$0xf] }
  0xf6   :  { %2087 = vmatpush.bf16.msra.mxu3 %v3436_v24  ;;  %v4012_v24 = vor.u32 %v4618_v12, %v4009_v13  ;;  %v5061_v57 = vpop.f32.mrf.mxu2  ;;  %v3689_v12 = vld [vmem:[#allocation6 + $0x578] sm:$0xf0]  ;;  %v4570_v13 = vld [vmem:[#allocation6 + $0x66c] sm:$0xf] }
  0xf7   :  { %2046 = vmatpush.bf16.msra.mxu0 %v3036_v31  ;;  %v3993_v31 = vld [vmem:[#allocation6 + $0x7d8] sm:$0xf0]  ;;  %v4502_v23 = vld [vmem:[#allocation6 + $0x44c] sm:$0xf] }
  0xf8   :  { %2060 = vmatpush.bf16.msra.mxu1 %v3164_v33  ;;  %v5055_v33 = vpop.f32.mrf.mxu1  ;;  %v3996_v41 = vor.u32 %v4614_v29, %v3993_v31  ;;  %v4534_v25 = vld [vmem:[#allocation6 + $0x54c] sm:$0xf]  ;;  %v3801_v31 = vld [vmem:[#allocation6 + $0x658] sm:$0xf0] }
  0xf9   :  { %2074 = vmatpush.bf16.msra.mxu2 %v3292_v34  ;;  %v3612_v34 = vor.u32 %v4518_v21, %v3609_v22  ;;  %v3692_v21 = vor.u32 %v4538_v7, %v3689_v12  ;;  %v4566_v29 = vld [vmem:[#allocation6 + $0x64c] sm:$0xf]  ;;  %v3897_v7 = vld [vmem:[#allocation6 + $0x718] sm:$0xf0] }
  0xfa   :  { %2088 = vmatpush.bf16.msra.mxu3 %v3420_v38  ;;  %v3593_v38 = vld [vmem:[#allocation6 + $0x4b8] sm:$0xf0]  ;;  %v5065_v0 = vpop.f32.mrf.mxu0 }
  0xfb   :  { %2047 = vmatpush.bf16.msra.mxu0 %v3020_v50  ;;  %v4610_v50 = vld [vmem:[#allocation6 + $0x7ac] sm:$0xf]  ;;  %v3596_v52 = vor.u32 %v4514_v37, %v3593_v38  ;;  %v5063_v62 = vpop.f32.mrf.mxu3  ;;  %v4636_v12 = vld [vmem:[#allocation9 + $0x74] sm:$0xf0] }
  0xfc   :  { %2061 = vmatpush.bf16.msra.mxu1 %v3148_v53  ;;  %v3724_v53 = vor.u32 %v4546_v40, %v3721_v42  ;;  %v3676_v40 = vor.u32 %v4534_v25, %v3673_v27 }
  0xfd   :  { %2075 = vmatpush.bf16.msra.mxu2 %v3276_v54  ;;  %v3852_v54 = vor.u32 %v4578_v46, %v3849_v48  ;;  %v4498_v46 = vld [vmem:[#allocation6 + $0x42c] sm:$0xf]  ;;  %v3529_v48 = vld [vmem:[#allocation6 + $0x438] sm:$0xf0] }
  0xfe   :  { %2089 = vmatpush.bf16.msra.mxu3 %v3404_v59  ;;  %v3980_v59 = vor.u32 %v4610_v50, %v3977_v51  ;;  %v4530_v50 = vld [vmem:[#allocation6 + $0x52c] sm:$0xf] }
  0xff   :  { %2048 = vmatpush.bf16.msra.mxu0 %v3004_v4  ;;  %v3836_v4 = vor.u32 %v4574_v60, %v3833_v61 }
 0x100   :  { %2062 = vmatpush.bf16.msra.mxu1 %v3132_v8  ;;  %v5067_v8 = vpop.f32.mrf.mxu1 }
 0x101   :  { %2076 = vmatpush.bf16.msra.mxu2 %v3260_v11 }
 0x102   :  { %2090 = vmatpush.bf16.msra.mxu3 %v3388_v15  ;;  %2049 = vmatmul.bf16.vlgmr.msra.gmra.mxu0 %v4997_v58  ;;  %v4606_v58 = vld [vmem:[#allocation6 + $0x78c] sm:$0xf]  ;;  %v3817_v15 = vld [vmem:[#allocation6 + $0x678] sm:$0xf0]  ;;  %v1826_v42 = vpop.f32.mrf.mxu0 }
 0x103   :  { %2097 = vmatpush.bf16.msrb.mxu0 %v3628_v16  ;;  %2063 = vmatmul.bf16.vlgmr.msra.gmra.mxu1 %v5003_v10  ;;  %v3580_v10 = vor.u32 %v4510_v55, %v3577_v56  ;;  %v3964_v11 = vor.u32 %v4606_v58, %v3961_v63  ;;  %v4602_v16 = vld [vmem:[#allocation6 + $0x76c] sm:$0xf]  ;;  %v3820_v22 = vor.u32 %v4570_v13, %v3817_v15  ;;  %v5071_v38 = vpop.f32.mrf.mxu3  ;;  %v3513_v58 = vld [vmem:[#allocation6 + $0x418] sm:$0xf0] }
 0x104   :  { %2111 = vmatpush.bf16.msrb.mxu1 %v3756_v19  ;;  %2077 = vmatmul.bf16.vlgmr.msra.gmra.mxu2 %v4999_v1  ;;  %v4542_v1 = vld [vmem:[#allocation6 + $0x58c] sm:$0xf]  ;;  %v3945_v19 = vld [vmem:[#allocation6 + $0x778] sm:$0xf0]  ;;  %v1729_v13 = vadd.f32 %v5039_v9, %v5037_v3  ;;  %v4063_v3 = vld [vmem:[#allocation9 + $0x60] sm:$0xf] }
 0x105   :  { %2125 = vmatpush.bf16.msrb.mxu2 %v3884_v20  ;;  %2091 = vmatmul.bf16.vlgmr.msra.gmra.mxu3 %v5005_v17  ;;  %v3705_v17 = vld [vmem:[#allocation6 + $0x598] sm:$0xf0]  ;;  %v3564_v20 = vor.u32 %v4506_v5, %v3561_v6  ;;  %v3948_v26 = vor.u32 %v4602_v16, %v3945_v19  ;;  %v4594_v56 = vld [vmem:[#allocation6 + $0x72c] sm:$0xf]  ;;  %v4135_v16 = vld [vmem:[#allocation9 + $0xf0] sm:$0xf] }
 0x106   :  { %2139 = vmatpush.bf16.msrb.mxu3 %v4012_v24  ;;  %v3708_v2 = vor.u32 %v4542_v1, %v3705_v17  ;;  %v3545_v24 = vld [vmem:[#allocation6 + $0x458] sm:$0xf0]  ;;  %v4494_v17 = vld [vmem:[#allocation6 + $0x40c] sm:$0xf] }
 0x107   :  { %2098 = vmatpush.bf16.msrb.mxu0 %v3612_v34  ;;  %v4598_v34 = vld [vmem:[#allocation6 + $0x74c] sm:$0xf]  ;;  %v3548_v37 = vor.u32 %v4502_v23, %v3545_v24  ;;  %v3913_v1 = vld [vmem:[#allocation6 + $0x738] sm:$0xf0]  ;;  %v3516_v15 = vor.u32 %v4494_v17, %v3513_v58  ;;  %v1731_v24 = vadd.f32 %v5047_v49, %v5045_v45 }
 0x108   :  { %2112 = vmatpush.bf16.msrb.mxu1 %v3740_v35  ;;  %v3929_v35 = vld [vmem:[#allocation6 + $0x758] sm:$0xf0]  ;;  %v1840_v55 = vpop.f32.mrf.mxu1  ;;  %v4526_v63 = vld [vmem:[#allocation6 + $0x50c] sm:$0xf] }
 0x109   :  { %2126 = vmatpush.bf16.msrb.mxu2 %v3868_v36  ;;  %v5069_v36 = vpop.f32.mrf.mxu2  ;;  %v3932_v51 = vor.u32 %v4598_v34, %v3929_v35  ;;  %v3769_v5 = vld [vmem:[#allocation6 + $0x618] sm:$0xf0]  ;;  %v4590_v6 = vld [vmem:[#allocation6 + $0x70c] sm:$0xf]  ;;  %v1841_v27 = vadd.f32 %v1840_v55, %v1826_v42  ;;  %v1743_v34 = vadd.f32 %v5041_v30, %v1729_v13  ;;  %v4127_v35 = vld [vmem:[#allocation9 + $0xe0] sm:$0xf] }
 0x10a   :  { %2140 = vmatpush.bf16.msrb.mxu3 %v3996_v41  ;;  %v3804_v41 = vor.u32 %v4566_v29, %v3801_v31  ;;  %v4652_v19 = vld [vmem:[#allocation9 + $0xf4] sm:$0xf0]  ;;  %v3900_v25 = vor.u32 %v4590_v6, %v3897_v7  ;;  %v1828_v31 = vpop.f32.mrf.mxu0  ;;  %v4634_v9 = vld [vmem:[#allocation9 + $0x64] sm:$0xf0]  ;;  %v4031_v13 = vld [vmem:[#allocation9 + $0x20] sm:$0xf] }
 0x10b   :  { %2099 = vmatpush.bf16.msrb.mxu0 %v3596_v52  ;;  %v3657_v52 = vld [vmem:[#allocation6 + $0x538] sm:$0xf0]  ;;  %v1868_v23 = vpop.f32.mrf.mxu3  ;;  %v4136_v29 = vor.u32 %v4652_v19, %v4135_v16  ;;  %v4064_v45 = vor.u32 %v4634_v9, %v4063_v3  ;;  %v1757_v30 = vadd.f32 %v5043_v32, %v1743_v34  ;;  %v4023_v3 = vld [vmem:[#allocation9 + $0x10] sm:$0xf] }
 0x10c   :  { %2113 = vmatpush.bf16.msrb.mxu1 %v3724_v53  ;;  %v4562_v53 = vld [vmem:[#allocation6 + $0x62c] sm:$0xf]  ;;  %v3660_v60 = vor.u32 %v4530_v50, %v3657_v52  ;;  %v4119_v50 = vld [vmem:[#allocation9 + $0xd0] sm:$0xf] }
 0x10d   :  { %2127 = vmatpush.bf16.msrb.mxu2 %v3852_v54  ;;  %v3785_v54 = vld [vmem:[#allocation6 + $0x638] sm:$0xf0]  ;;  %v1771_v32 = vadd.f32 %v5053_v28, %v1757_v30 }
 0x10e   :  { %2141 = vmatpush.bf16.msrb.mxu3 %v3980_v59  ;;  %v3532_v59 = vor.u32 %v4498_v46, %v3529_v48  ;;  %v3788_v61 = vor.u32 %v4562_v53, %v3785_v54  ;;  %v4055_v46 = vld [vmem:[#allocation9 + $0x50] sm:$0xf]  ;;  %v4632_v48 = vld [vmem:[#allocation9 + $0x54] sm:$0xf0] }
 0x10f   :  { %2100 = vmatpush.bf16.msrb.mxu0 %v3580_v10  ;;  %v3641_v10 = vld [vmem:[#allocation6 + $0x518] sm:$0xf0]  ;;  %v4056_v52 = vor.u32 %v4632_v48, %v4055_v46  ;;  %v4191_v46 = vld [vmem:[#allocation9 + $0x160] sm:$0xf]  ;;  %v4666_v48 = vld [vmem:[#allocation9 + $0x164] sm:$0xf0] }
 0x110   :  { %2114 = vmatpush.bf16.msrb.mxu1 %v3708_v2  ;;  %v3916_v2 = vor.u32 %v4594_v56, %v3913_v1  ;;  %v4047_v56 = vld [vmem:[#allocation9 + $0x40] sm:$0xf]  ;;  %v4630_v1 = vld [vmem:[#allocation9 + $0x44] sm:$0xf0]  ;;  %v4644_v28 = vld [vmem:[#allocation9 + $0xb4] sm:$0xf0] }
 0x111   :  { %2128 = vmatpush.bf16.msrb.mxu2 %v3836_v4  ;;  %v4558_v4 = vld [vmem:[#allocation6 + $0x60c] sm:$0xf] }
 0x112   :  { %2142 = vmatpush.bf16.msrb.mxu3 %v3964_v11  ;;  %v4071_v11 = vld [vmem:[#allocation9 + $0x70] sm:$0xf] }
 0x113   :  { %2101 = vmatpush.bf16.msrb.mxu0 %v3564_v20  ;;  %v1854_v20 = vpop.f32.mrf.mxu2  ;;  %v1870_v55 = vpop.f32.mrf.mxu3 }
 0x114   :  { %2115 = vmatpush.bf16.msrb.mxu1 %v3692_v21  ;;  %v3644_v21 = vor.u32 %v4526_v63, %v3641_v10  ;;  %v1855_v49 = vadd.f32 %v1854_v20, %v1841_v27  ;;  %v4039_v63 = vld [vmem:[#allocation9 + $0x30] sm:$0xf]  ;;  %v4628_v10 = vld [vmem:[#allocation9 + $0x34] sm:$0xf0]  ;;  %v4095_v20 = vld [vmem:[#allocation9 + $0xa0] sm:$0xf] }
 0x115   :  { %2129 = vmatpush.bf16.msrb.mxu2 %v3820_v22  ;;  %v3772_v22 = vor.u32 %v4558_v4, %v3769_v5  ;;  %v4103_v5 = vld [vmem:[#allocation9 + $0xb0] sm:$0xf]  ;;  %v4040_v7 = vor.u32 %v4628_v10, %v4039_v63 }
 0x116   :  { %2143 = vmatpush.bf16.msrb.mxu3 %v3948_v26  ;;  %v4072_v26 = vor.u32 %v4636_v12, %v4071_v11  ;;  %v1869_v54 = vadd.f32 %v1868_v23, %v1855_v49  ;;  %v4104_v12 = vor.u32 %v4644_v28, %v4103_v5  ;;  %v4633_v5 = vld [vmem:[#allocation9 + $0x64] sm:$0xf]  ;;  %v4065_v28 = vld [vmem:[#allocation9 + $0x68] sm:$0xf0] }
 0x117   :  { %2102 = vmatpush.bf16.msrb.mxu0 %v3548_v37  ;;  %v4650_v37 = vld [vmem:[#allocation9 + $0xe4] sm:$0xf0] }
 0x118   :  { %2116 = vmatpush.bf16.msrb.mxu1 %v3676_v40  ;;  %v1842_v40 = vpop.f32.mrf.mxu1  ;;  %v4128_v42 = vor.u32 %v4650_v37, %v4127_v35 }
 0x119   :  { %2130 = vmatpush.bf16.msrb.mxu2 %v3804_v41  ;;  %v1745_v41 = vadd.f32 %v5049_v14, %v1731_v24  ;;  %v1843_v17 = vadd.f32 %v1842_v40, %v1828_v31  ;;  %v4087_v40 = vld [vmem:[#allocation9 + $0x90] sm:$0xf] }
 0x11a   :  { %2144 = vmatpush.bf16.msrb.mxu3 %v3932_v51  ;;  %v4648_v51 = vld [vmem:[#allocation9 + $0xd4] sm:$0xf0] }
 0x11b   :  { %2103 = vmatpush.bf16.msrb.mxu0 %v3532_v59  ;;  %v1759_v14 = vadd.f32 %v5051_v18, %v1745_v41  ;;  %v1856_v53 = vpop.f32.mrf.mxu2  ;;  %v4646_v59 = vld [vmem:[#allocation9 + $0xc4] sm:$0xf0]  ;;  %v4640_v41 = vld [vmem:[#allocation9 + $0x94] sm:$0xf0] }
 0x11c   :  { %2117 = vmatpush.bf16.msrb.mxu1 %v3660_v60  ;;  %v1857_v6 = vadd.f32 %v1856_v53, %v1843_v17  ;;  %v4192_v53 = vor.u32 %v4666_v48, %v4191_v46  ;;  %v4656_v46 = vld [vmem:[#allocation9 + $0x114] sm:$0xf0]  ;;  %v4643_v48 = vld [vmem:[#allocation9 + $0xb4] sm:$0xf] }
 0x11d   :  { %2131 = vmatpush.bf16.msrb.mxu2 %v3788_v61 }
 0x11e   :  { %2145 = vmatpush.bf16.msrb.mxu3 %v3916_v2  ;;  %v1785_v2 = vadd.f32 %v5055_v33, %v1771_v32  ;;  %v5091_v33 = vld [vmem:[#allocation8] sm:$0xf] }
 0x11f   :  { %2104 = vmatpush.bf16.msrb.mxu0 %v3516_v15  ;;  %v1882_v60 = vpop.f32.mrf.mxu0  ;;  %v4626_v15 = vld [vmem:[#allocation9 + $0x24] sm:$0xf0]  ;;  %v2182_v35 = vperm.slane %v5091_v33, 0 }
 0x120   :  { %2118 = vmatpush.bf16.msrb.mxu1 %v3644_v21  ;;  %v1896_v18 = vpop.f32.mrf.mxu1  ;;  %v1883_v61 = vadd.f32 %v1882_v60, %v1869_v54  ;;  %v1799_v16 = vadd.f32 %v5061_v57, %v1785_v2  ;;  %v4642_v21 = vld [vmem:[#allocation9 + $0xa4] sm:$0xf0]  ;;  %v4624_v57 = vld [vmem:[#allocation9 + $0x14] sm:$0xf0] }
 0x121   :  { %2132 = vmatpush.bf16.msrb.mxu2 %v3772_v22  ;;  %v4096_v31 = vor.u32 %v4642_v21, %v4095_v20  ;;  %v4024_v49 = vor.u32 %v4624_v57, %v4023_v3  ;;  %v4167_v21 = vld [vmem:[#allocation9 + $0x130] sm:$0xf]  ;;  %v4629_v3 = vld [vmem:[#allocation9 + $0x44] sm:$0xf]  ;;  %v4049_v57 = vld [vmem:[#allocation9 + $0x48] sm:$0xf0] }
 0x122   :  { %2146 = vmatpush.bf16.msrb.mxu3 %v3900_v25  ;;  %2105 = vmatmul.bf16.vlgmr.msrb.gmra.mxu0 %v5009_v39  ;;  %v4120_v39 = vor.u32 %v4648_v51, %v4119_v50  ;;  %v1897_v11 = vadd.f32 %v1896_v18, %v1883_v61  ;;  %v4199_v25 = vld [vmem:[#allocation9 + $0x170] sm:$0xf]  ;;  %v1813_v34 = vadd.f32 %v5063_v62, %v1799_v16  ;;  %v4079_v62 = vld [vmem:[#allocation9 + $0x80] sm:$0xf]  ;;  %v4664_v18 = vld [vmem:[#allocation9 + $0x154] sm:$0xf0] }
 0x123   :  { %2600 = vmatpush.bf16.msra.mxu0 %v4072_v26  ;;  %2119 = vmatmul.bf16.vlgmr.msrb.gmra.mxu1 %v5013_v44  ;;  %v1773_v44 = vadd.f32 %v5065_v0, %v1759_v14  ;;  %v4668_v26 = vld [vmem:[#allocation9 + $0x174] sm:$0xf0]  ;;  %v4088_v51 = vor.u32 %v4640_v41, %v4087_v40  ;;  %v4622_v14 = vld [vmem:[#allocation9 + $0x4] sm:$0xf0]  ;;  %v4052_v40 = vor.u32 %v4629_v3, %v4049_v57  ;;  %v4627_v41 = vld [vmem:[#allocation9 + $0x34] sm:$0xf] }
 0x124   :  { %2614 = vmatpush.bf16.msra.mxu1 %v4136_v29  ;;  %2133 = vmatmul.bf16.vlgmr.msrb.gmra.mxu2 %v5011_v43  ;;  %v4111_v43 = vld [vmem:[#allocation9 + $0xc0] sm:$0xf]  ;;  %v4200_v9 = vor.u32 %v4668_v26, %v4199_v25  ;;  %v2190_v54 = vadd.f32 %v2182_v35, %v1813_v34  ;;  %v4647_v25 = vld [vmem:[#allocation9 + $0xd4] sm:$0xf]  ;;  %v4121_v26 = vld [vmem:[#allocation9 + $0xd8] sm:$0xf0] }
 0x125   :  { %2147 = vmatmul.bf16.vlgmr.msrb.gmra.mxu3 %v5015_v47  ;;  %v4048_v47 = vor.u32 %v4630_v1, %v4047_v56  ;;  %v4112_v58 = vor.u32 %v4646_v59, %v4111_v43  ;;  %v1787_v4 = vadd.f32 %v5067_v8, %v1773_v44  ;;  %v1871_v8 = vadd.f32 %v1870_v55, %v1857_v6  ;;  %v4635_v55 = vld [vmem:[#allocation9 + $0x74] sm:$0xf]  ;;  %v4073_v56 = vld [vmem:[#allocation9 + $0x78] sm:$0xf0]  ;;  %v4113_v34 = vld [vmem:[#allocation9 + $0xc8] sm:$0xf0] }
 0x126   :  { %2628 = vmatpush.bf16.msra.mxu2 %v4200_v9  ;;  %v4651_v44 = vld [vmem:[#allocation9 + $0xf4] sm:$0xf]  ;;  %v4137_v43 = vld [vmem:[#allocation9 + $0xf8] sm:$0xf0]  ;;  %v4076_v63 = vor.u32 %v4635_v55, %v4073_v56  ;;  %v2198_v2 = vmax.f32 %v2190_v54, 0.0 }
 0x127   :  { %2601 = vmatpush.bf16.msra.mxu0 %v4064_v45  ;;  %v1801_v0 = vadd.f32 %v5069_v36, %v1787_v4  ;;  %v1910_v19 = vpop.f32.mrf.mxu2  ;;  %v1884_v22 = vpop.f32.mrf.mxu0  ;;  %v4032_v36 = vor.u32 %v4626_v15, %v4031_v13  ;;  %v4140_v4 = vor.u32 %v4651_v44, %v4137_v43  ;;  %v4662_v13 = vld [vmem:[#allocation9 + $0x144] sm:$0xf0]  ;;  %v4645_v9 = vld [vmem:[#allocation9 + $0xc4] sm:$0xf]  ;;  %v4097_v54 = vld [vmem:[#allocation9 + $0xa8] sm:$0xf0] }
 0x128   :  { %2615 = vmatpush.bf16.msra.mxu1 %v4128_v42  ;;  %v1924_v23 = vpop.f32.mrf.mxu3  ;;  %v1911_v27 = vadd.f32 %v1910_v19, %v1897_v11  ;;  %v1885_v29 = vadd.f32 %v1884_v22, %v1871_v8  ;;  %v1898_v37 = vpop.f32.mrf.mxu1  ;;  %v4015_v42 = vld [vmem:[#allocation9] sm:$0xf]  ;;  %v4068_v19 = vor.u32 %v4633_v5, %v4065_v28  ;;  %v4660_v8 = vld [vmem:[#allocation9 + $0x134] sm:$0xf0]  ;;  %v4654_v55 = vld [vmem:[#allocation9 + $0x104] sm:$0xf0] }
 0x129   :  { %v1815_v24 = vadd.f32 %v5071_v38, %v1801_v0  ;;  %v2183_v38 = vperm.slane %v5091_v33, 1  ;;  %v4016_v17 = vor.u32 %v4622_v14, %v4015_v42  ;;  %v4649_v0 = vld [vmem:[#allocation9 + $0xe4] sm:$0xf]  ;;  %v4151_v42 = vld [vmem:[#allocation9 + $0x110] sm:$0xf] }
 0x12a   :  { %v1925_v30 = vadd.f32 %v1924_v23, %v1911_v27  ;;  %v1899_v50 = vadd.f32 %v1898_v37, %v1885_v29  ;;  %2629 = vmatpush.bf16.msra.mxu2 %v4192_v53  ;;  %v4631_v23 = vld [vmem:[#allocation9 + $0x54] sm:$0xf]  ;;  %v4168_v27 = vor.u32 %v4660_v8, %v4167_v21  ;;  %v4658_v37 = vld [vmem:[#allocation9 + $0x124] sm:$0xf0]  ;;  %v4641_v53 = vld [vmem:[#allocation9 + $0xa4] sm:$0xf] }
 0x12b   :  { %2602 = vmatpush.bf16.msra.mxu0 %v4056_v52  ;;  %v2194_v45 = vadd.f32 %v2182_v35, %v1815_v24  ;;  %v4638_v52 = vld [vmem:[#allocation9 + $0x84] sm:$0xf0]  ;;  %v4057_v24 = vld [vmem:[#allocation9 + $0x58] sm:$0xf0]  ;;  %v4159_v35 = vld [vmem:[#allocation9 + $0x120] sm:$0xf]  ;;  %v4100_v43 = vor.u32 %v4641_v53, %v4097_v54 }
 0x12c   :  { %2616 = vmatpush.bf16.msra.mxu1 %v4120_v39  ;;  %v4080_v60 = vor.u32 %v4638_v52, %v4079_v62  ;;  %v2191_v61 = vadd.f32 %v2183_v38, %v1925_v30  ;;  %v4060_v29 = vor.u32 %v4631_v23, %v4057_v24  ;;  %v4105_v30 = vld [vmem:[#allocation9 + $0xb8] sm:$0xf0]  ;;  %v4625_v62 = vld [vmem:[#allocation9 + $0x24] sm:$0xf]  ;;  %v4033_v52 = vld [vmem:[#allocation9 + $0x28] sm:$0xf0] }
 0x12d   :  { %v2202_v59 = vmax.f32 %v2194_v45, 0.0  ;;  %v4116_v45 = vor.u32 %v4645_v9, %v4113_v34  ;;  %v4108_v14 = vor.u32 %v4643_v48, %v4105_v30  ;;  %v4036_v56 = vor.u32 %v4625_v62, %v4033_v52  ;;  %v4201_v44 = vld [vmem:[#allocation9 + $0x178] sm:$0xf0]  ;;  %v4621_v5 = vld [vmem:[#allocation9 + $0x4] sm:$0xf] }
 0x12e   :  { %v2199_v15 = vmax.f32 %v2191_v61, 0.0  ;;  %v4089_v61 = vld [vmem:[#allocation9 + $0x98] sm:$0xf0]  ;;  %v4017_v28 = vld [vmem:[#allocation9 + $0x8] sm:$0xf0] }
 0x12f   :  { %2603 = vmatpush.bf16.msra.mxu0 %v4048_v47  ;;  %v1912_v39 = vpop.f32.mrf.mxu2  ;;  %v4183_v47 = vld [vmem:[#allocation9 + $0x150] sm:$0xf]  ;;  %v5097_v11 = vpack.c.bf16 %v2202_v59, %v2198_v2  ;;  %v4623_v59 = vld [vmem:[#allocation9 + $0x14] sm:$0xf]  ;;  %v4193_v2 = vld [vmem:[#allocation9 + $0x168] sm:$0xf0] }
 0x130   :  { %2617 = vmatpush.bf16.msra.mxu1 %v4112_v58  ;;  %v1913_v1 = vadd.f32 %v1912_v39, %v1899_v50  ;;  %v1926_v32 = vpop.f32.mrf.mxu3  ;;  %v4184_v10 = vor.u32 %v4664_v18, %v4183_v47  ;;  %v4152_v50 = vor.u32 %v4656_v46, %v4151_v42  ;;  %v4143_v39 = vld [vmem:[#allocation9 + $0x100] sm:$0xf]  ;;  %v4639_v18 = vld [vmem:[#allocation9 + $0x94] sm:$0xf]  ;;  %v4661_v23 = vld [vmem:[#allocation9 + $0x144] sm:$0xf] }
 0x131   :  { %v4177_v24 = vld [vmem:[#allocation9 + $0x148] sm:$0xf0]  ;;  %v4657_v3 = vld [vmem:[#allocation9 + $0x124] sm:$0xf]  ;;  %v4684_v62 = vld [vmem:[#allocation9 + $0x1f4] sm:$0xf0] }
 0x132   :  { %v1927_v58 = vadd.f32 %v1926_v32, %v1913_v1  ;;  %2630 = vmatpush.bf16.msra.mxu2 %v4184_v10  ;;  %v4144_v1 = vor.u32 %v4654_v55, %v4143_v39  ;;  %v4667_v32 = vld [vmem:[#allocation9 + $0x174] sm:$0xf]  ;;  %v4665_v10 = vld [vmem:[#allocation9 + $0x164] sm:$0xf]  ;;  %v4161_v9 = vld [vmem:[#allocation9 + $0x128] sm:$0xf0] }
 0x133   :  { %2604 = vmatpush.bf16.msra.mxu0 %v4040_v7  ;;  %v4129_v7 = vld [vmem:[#allocation9 + $0xe8] sm:$0xf0] }
 0x134   :  { %2618 = vmatpush.bf16.msra.mxu1 %v4104_v12  ;;  %v2195_v6 = vadd.f32 %v2183_v38, %v1927_v58  ;;  %v4175_v12 = vld [vmem:[#allocation9 + $0x140] sm:$0xf]  ;;  %v4132_v22 = vor.u32 %v4649_v0, %v4129_v7  ;;  %v4160_v38 = vor.u32 %v4658_v37, %v4159_v35  ;;  %v4637_v0 = vld [vmem:[#allocation9 + $0x84] sm:$0xf]  ;;  %v4081_v7 = vld [vmem:[#allocation9 + $0x88] sm:$0xf0]  ;;  %v4164_v35 = vor.u32 %v4657_v3, %v4161_v9 }
 0x135   :  { %v4176_v20 = vor.u32 %v4662_v13, %v4175_v12  ;;  %v4020_v12 = vor.u32 %v4621_v5, %v4017_v28  ;;  %v4663_v13 = vld [vmem:[#allocation9 + $0x154] sm:$0xf]  ;;  %v4145_v30 = vld [vmem:[#allocation9 + $0x108] sm:$0xf0]  ;;  %v4265_v3 = vld [vmem:[#allocation9 + $0x1f8] sm:$0xf0] }
 0x136   :  { %v2203_v16 = vmax.f32 %v2195_v6, 0.0  ;;  %v4196_v6 = vor.u32 %v4665_v10, %v4193_v2  ;;  %v4239_v10 = vld [vmem:[#allocation9 + $0x1c0] sm:$0xf]  ;;  %v4678_v2 = vld [vmem:[#allocation9 + $0x1c4] sm:$0xf0] }
 0x137   :  { %2605 = vmatpush.bf16.msra.mxu0 %v4032_v36  ;;  %2631 = vmatpush.bf16.msra.mxu2 %v4176_v20  ;;  %v4240_v28 = vor.u32 %v4678_v2, %v4239_v10  ;;  %v4681_v9 = vld [vmem:[#allocation9 + $0x1e4] sm:$0xf] }
 0x138   :  { %2619 = vmatpush.bf16.msra.mxu1 %v4096_v31  ;;  %v5099_v36 = vpack.c.bf16 %v2203_v16, %v2199_v15  ;;  %v4124_v31 = vor.u32 %v4647_v25, %v4121_v26  ;;  %v4185_v15 = vld [vmem:[#allocation9 + $0x158] sm:$0xf0]  ;;  %v4084_v16 = vor.u32 %v4637_v0, %v4081_v7  ;;  %v4180_v26 = vor.u32 %v4661_v23, %v4177_v24  ;;  %v4231_v7 = vld [vmem:[#allocation9 + $0x1b0] sm:$0xf]  ;;  %v4672_v24 = vld [vmem:[#allocation9 + $0x194] sm:$0xf0] }
 0x139   :  { %v4188_v20 = vor.u32 %v4663_v13, %v4185_v15  ;;  %v4215_v23 = vld [vmem:[#allocation9 + $0x190] sm:$0xf] }
 0x13b   :  { %2606 = vmatpush.bf16.msra.mxu0 %v4024_v49  ;;  %2632 = vmatpush.bf16.msra.mxu2 %v4168_v27  ;;  %v4041_v49 = vld [vmem:[#allocation9 + $0x38] sm:$0xf0] }
 0x13c   :  { %2620 = vmatpush.bf16.msra.mxu1 %v4088_v51  ;;  %v4044_v51 = vor.u32 %v4627_v41, %v4041_v49  ;;  %v4655_v41 = vld [vmem:[#allocation9 + $0x114] sm:$0xf] }
 0x13f   :  { %2607 = vmatpush.bf16.msra.mxu0 %v4016_v17  ;;  %2633 = vmatpush.bf16.msra.mxu2 %v4160_v38  ;;  %v4025_v17 = vld [vmem:[#allocation9 + $0x18] sm:$0xf0]  ;;  %v1938_v47 = vpop.f32.mrf.mxu0 }
 0x140   :  { %2621 = vmatpush.bf16.msra.mxu1 %v4080_v60  ;;  %v4204_v60 = vor.u32 %v4667_v32, %v4201_v44  ;;  %v1952_v58 = vpop.f32.mrf.mxu1  ;;  %v4153_v38 = vld [vmem:[#allocation9 + $0x118] sm:$0xf0]  ;;  %v4255_v32 = vld [vmem:[#allocation9 + $0x1e0] sm:$0xf]  ;;  %v4682_v44 = vld [vmem:[#allocation9 + $0x1e4] sm:$0xf0] }
 0x141   :  { %v1953_v8 = vadd.f32 %v1952_v58, %v1938_v47 }
 0x142   :  { %2608 = vmatmul.bf16.vlgmr.msra.gmra.mxu0 %v5097_v11 }
 0x143   :  { %2656 = vmatpush.bf16.msrb.mxu0 %v4076_v63  ;;  %2622 = vmatmul.bf16.vlgmr.msra.gmra.mxu1 %v5099_v36  ;;  %v4028_v63 = vor.u32 %v4623_v59, %v4025_v17  ;;  %v4256_v59 = vor.u32 %v4682_v44, %v4255_v32  ;;  %v4247_v17 = vld [vmem:[#allocation9 + $0x1d0] sm:$0xf]  ;;  %v4671_v44 = vld [vmem:[#allocation9 + $0x194] sm:$0xf] }
 0x144   :  { %2670 = vmatpush.bf16.msrb.mxu1 %v4140_v4  ;;  %2634 = vmatpush.bf16.msra.mxu2 %v4152_v50  ;;  %v4092_v4 = vor.u32 %v4639_v18, %v4089_v61  ;;  %v4263_v50 = vld [vmem:[#allocation9 + $0x1f0] sm:$0xf]  ;;  %v2184_v18 = vperm.slane %v5091_v33, 2 }
 0x145   :  { %v4264_v53 = vor.u32 %v4684_v62, %v4263_v50  ;;  %v4233_v50 = vld [vmem:[#allocation9 + $0x1b8] sm:$0xf0] }
 0x147   :  { %2657 = vmatpush.bf16.msrb.mxu0 %v4068_v19  ;;  %v1966_v19 = vpop.f32.mrf.mxu2  ;;  %2642 = vmatpush.bf16.msra.mxu3 %v4264_v53  ;;  %v4225_v53 = vld [vmem:[#allocation9 + $0x1a8] sm:$0xf0] }
 0x148   :  { %2671 = vmatpush.bf16.msrb.mxu1 %v4132_v22  ;;  %2635 = vmatpush.bf16.msra.mxu2 %v4144_v1  ;;  %v1980_v21 = vpop.f32.mrf.mxu3  ;;  %v1940_v22 = vpop.f32.mrf.mxu0  ;;  %v1967_v27 = vadd.f32 %v1966_v19, %v1953_v8  ;;  %v4674_v8 = vld [vmem:[#allocation9 + $0x1a4] sm:$0xf0] }
 0x149   :  { %v1954_v25 = vpop.f32.mrf.mxu1 }
 0x14a   :  { %v1981_v37 = vadd.f32 %v1980_v21, %v1967_v27  ;;  %v4223_v21 = vld [vmem:[#allocation9 + $0x1a0] sm:$0xf]  ;;  %v4670_v27 = vld [vmem:[#allocation9 + $0x184] sm:$0xf0] }
 0x14b   :  { %2658 = vmatpush.bf16.msrb.mxu0 %v4060_v29  ;;  %v4659_v29 = vld [vmem:[#allocation9 + $0x134] sm:$0xf]  ;;  %2643 = vmatpush.bf16.msra.mxu3 %v4256_v59 }
 0x14c   :  { %2672 = vmatpush.bf16.msrb.mxu1 %v4124_v31  ;;  %2684 = vmatpush.bf16.msrb.mxu2 %v4204_v60  ;;  %v4169_v31 = vld [vmem:[#allocation9 + $0x138] sm:$0xf0]  ;;  %v4680_v60 = vld [vmem:[#allocation9 + $0x1d4] sm:$0xf0] }
 0x14d   :  { %v4172_v57 = vor.u32 %v4659_v29, %v4169_v31  ;;  %v4248_v58 = vor.u32 %v4680_v60, %v4247_v17  ;;  %v4683_v31 = vld [vmem:[#allocation9 + $0x1f4] sm:$0xf] }
 0x14f   :  { %2659 = vmatpush.bf16.msrb.mxu0 %v4052_v40  ;;  %v1968_v34 = vpop.f32.mrf.mxu2  ;;  %2644 = vmatpush.bf16.msra.mxu3 %v4248_v58  ;;  %v4209_v58 = vld [vmem:[#allocation9 + $0x188] sm:$0xf0] }
 0x150   :  { %2673 = vmatpush.bf16.msrb.mxu1 %v4116_v45  ;;  %2685 = vmatpush.bf16.msrb.mxu2 %v4196_v6  ;;  %v1982_v40 = vpop.f32.mrf.mxu3  ;;  %v1955_v45 = vadd.f32 %v1954_v25, %v1940_v22  ;;  %v4224_v22 = vor.u32 %v4674_v8, %v4223_v21  ;;  %v4216_v25 = vor.u32 %v4672_v24, %v4215_v23 }
 0x152   :  { %v1969_v48 = vadd.f32 %v1968_v34, %v1955_v45  ;;  %v4257_v34 = vld [vmem:[#allocation9 + $0x1e8] sm:$0xf0] }
 0x153   :  { %2660 = vmatpush.bf16.msrb.mxu0 %v4044_v51  ;;  %2645 = vmatpush.bf16.msra.mxu3 %v4240_v28 }
 0x154   :  { %2674 = vmatpush.bf16.msrb.mxu1 %v4108_v14  ;;  %2686 = vmatpush.bf16.msrb.mxu2 %v4188_v20  ;;  %v1983_v54 = vadd.f32 %v1982_v40, %v1969_v48 }
 0x157   :  { %2661 = vmatpush.bf16.msrb.mxu0 %v4036_v56 }
 0x158   :  { %2675 = vmatpush.bf16.msrb.mxu1 %v4100_v43  ;;  %2687 = vmatpush.bf16.msrb.mxu2 %v4180_v26  ;;  %v4207_v26 = vld [vmem:[#allocation9 + $0x180] sm:$0xf] }
 0x159   :  { %v4208_v29 = vor.u32 %v4670_v27, %v4207_v26  ;;  %v4692_v26 = vld [vmem:[#allocation11 + $0x38] sm:$0xff]  ;;  %v4691_v27 = vld [vmem:[#allocation11 + $0x30] sm:$0xff] }
 0x15b   :  { %2662 = vmatpush.bf16.msrb.mxu0 %v4028_v63 }
 0x15c   :  { %2676 = vmatpush.bf16.msrb.mxu1 %v4092_v4  ;;  %2688 = vmatpush.bf16.msrb.mxu2 %v4172_v57  ;;  %v4268_v57 = vor.u32 %v4683_v31, %v4265_v3  ;;  %v4689_v31 = vld [vmem:[#allocation11 + $0x20] sm:$0xff]  ;;  %v4700_v3 = vld [vmem:[#allocation11 + $0x78] sm:$0xff] }
 0x15f   :  { %2663 = vmatpush.bf16.msrb.mxu0 %v4020_v12  ;;  %v1994_v49 = vpop.f32.mrf.mxu0  ;;  %v4676_v12 = vld [vmem:[#allocation9 + $0x1b4] sm:$0xf0] }
 0x160   :  { %2677 = vmatpush.bf16.msrb.mxu1 %v4084_v16  ;;  %v2008_v42 = vpop.f32.mrf.mxu1  ;;  %2689 = vmatpush.bf16.msrb.mxu2 %v4164_v35  ;;  %v1995_v46 = vadd.f32 %v1994_v49, %v1981_v37  ;;  %v4232_v15 = vor.u32 %v4676_v12, %v4231_v7  ;;  %v4260_v37 = vor.u32 %v4681_v9, %v4257_v34  ;;  %v4699_v9 = vld [vmem:[#allocation11 + $0x70] sm:$0xff]  ;;  %v4686_v34 = vld [vmem:[#allocation11 + $0x8] sm:$0xff] }
 0x162   :  { %2664 = vmatmul.bf16.vlgmr.msrb.gmra.mxu0 %v5097_v11  ;;  %v4156_v11 = vor.u32 %v4655_v41, %v4153_v38  ;;  %v2009_v51 = vadd.f32 %v2008_v42, %v1995_v46  ;;  %2646 = vmatpush.bf16.msra.mxu3 %v4232_v15  ;;  %v4679_v41 = vld [vmem:[#allocation9 + $0x1d4] sm:$0xf]  ;;  %v4249_v38 = vld [vmem:[#allocation9 + $0x1d8] sm:$0xf0]  ;;  %v4677_v42 = vld [vmem:[#allocation9 + $0x1c4] sm:$0xf] }
 0x163   :  { %2678 = vmatmul.bf16.vlgmr.msrb.gmra.mxu1 %v5099_v36  ;;  %v4653_v36 = vld [vmem:[#allocation9 + $0x104] sm:$0xf]  ;;  %v4252_v45 = vor.u32 %v4679_v41, %v4249_v38  ;;  %2850 = vmatpush.bf16.msra.mxu0 %v4692_v26  ;;  %v4696_v41 = vld [vmem:[#allocation11 + $0x58] sm:$0xff] }
 0x164   :  { %2690 = vmatpush.bf16.msrb.mxu2 %v4156_v11  ;;  %v4148_v14 = vor.u32 %v4653_v36, %v4145_v30  ;;  %v4241_v11 = vld [vmem:[#allocation9 + $0x1c8] sm:$0xf0]  ;;  %v4675_v30 = vld [vmem:[#allocation9 + $0x1b4] sm:$0xf]  ;;  %2864 = vmatpush.bf16.msra.mxu1 %v4700_v3  ;;  %v4701_v26 = vld [vmem:[#allocation12] sm:$0xff] }
 0x165   :  { %v4244_v48 = vor.u32 %v4677_v42, %v4241_v11  ;;  %v4694_v42 = vld [vmem:[#allocation11 + $0x48] sm:$0xff] }
 0x166   :  { %2647 = vmatpush.bf16.msra.mxu3 %v4224_v22 }
 0x167   :  { %v2022_v52 = vpop.f32.mrf.mxu2  ;;  %v1996_v39 = vpop.f32.mrf.mxu0  ;;  %2851 = vmatpush.bf16.msra.mxu0 %v4691_v27 }
 0x168   :  { %v2036_v55 = vpop.f32.mrf.mxu3  ;;  %2691 = vmatpush.bf16.msrb.mxu2 %v4148_v14  ;;  %v2023_v56 = vadd.f32 %v2022_v52, %v2009_v51  ;;  %v1997_v1 = vadd.f32 %v1996_v39, %v1983_v54  ;;  %v2010_v43 = vpop.f32.mrf.mxu1  ;;  %v4236_v14 = vor.u32 %v4675_v30, %v4233_v50  ;;  %v4673_v52 = vld [vmem:[#allocation9 + $0x1a4] sm:$0xf]  ;;  %2865 = vmatpush.bf16.msra.mxu1 %v4699_v9 }
 0x169   :  { %v4228_v39 = vor.u32 %v4673_v52, %v4225_v53 }
 0x16a   :  { %v2037_v47 = vadd.f32 %v2036_v55, %v2023_v56  ;;  %v2011_v61 = vadd.f32 %v2010_v43, %v1997_v1  ;;  %2648 = vmatpush.bf16.msra.mxu3 %v4216_v25  ;;  %v4217_v43 = vld [vmem:[#allocation9 + $0x198] sm:$0xf0] }
 0x16b   :  { %v4220_v17 = vor.u32 %v4671_v44, %v4217_v43 }
 0x16c   :  { %v2192_v6 = vadd.f32 %v2184_v18, %v2037_v47 }
 0x16e   :  { %v2200_v16 = vmax.f32 %v2192_v6, 0.0  ;;  %2649 = vmatpush.bf16.msra.mxu3 %v4208_v29  ;;  %v4690_v29 = vld [vmem:[#allocation11 + $0x28] sm:$0xff] }
 0x16f   :  { %v2024_v63 = vpop.f32.mrf.mxu2  ;;  %2852 = vmatpush.bf16.msra.mxu0 %v4690_v29 }
 0x170   :  { %v2025_v4 = vadd.f32 %v2024_v63, %v2011_v61  ;;  %v2038_v5 = vpop.f32.mrf.mxu3  ;;  %v4669_v61 = vld [vmem:[#allocation9 + $0x184] sm:$0xf] }
 0x171   :  { %v4212_v63 = vor.u32 %v4669_v61, %v4209_v58 }
 0x172   :  { %v2039_v0 = vadd.f32 %v2038_v5, %v2025_v4  ;;  %2698 = vmatpush.bf16.msrb.mxu3 %v4268_v57  ;;  %v4687_v57 = vld [vmem:[#allocation11 + $0x10] sm:$0xff] }
 0x173   :  { %2853 = vmatpush.bf16.msra.mxu0 %v4689_v31  ;;  %v4728_v31 = vld [vmem:[%s5128_s6] ss:$0 sm:$0xff] }
 0x174   :  { %v2196_v13 = vadd.f32 %v2184_v18, %v2039_v0 }
 0x176   :  { %v2204_v19 = vmax.f32 %v2196_v13, 0.0  ;;  %2699 = vmatpush.bf16.msrb.mxu3 %v4260_v37  ;;  %v2185_v13 = vperm.slane %v5091_v33, 3  ;;  %v4688_v33 = vld [vmem:[#allocation11 + $0x18] sm:$0xff]  ;;  %v4685_v37 = vld [vmem:[#allocation11] sm:$0xff] }
 0x177   :  { %2854 = vmatpush.bf16.msra.mxu0 %v4688_v33 }
 0x178   :  { %v2208_v20 = vpack.c.bf16 %v2204_v19, %v2200_v16 }
 0x17a   :  { %2636 = vmatmul.bf16.vlgmr.msra.gmra.mxu2 %v2208_v20  ;;  %2700 = vmatpush.bf16.msrb.mxu3 %v4252_v45  ;;  %v4695_v45 = vld [vmem:[#allocation11 + $0x50] sm:$0xff] }
 0x17b   :  { %2855 = vmatpush.bf16.msra.mxu0 %v4687_v57 }
 0x17e   :  { %2701 = vmatpush.bf16.msrb.mxu3 %v4244_v48  ;;  %v4693_v48 = vld [vmem:[#allocation11 + $0x40] sm:$0xff] }
 0x17f   :  { %v2050_v35 = vpop.f32.mrf.mxu0  ;;  %2856 = vmatpush.bf16.msra.mxu0 %v4686_v34 }
 0x180   :  { %v2064_v40 = vpop.f32.mrf.mxu1 }
 0x181   :  { %v2065_v51 = vadd.f32 %v2064_v40, %v2050_v35  ;;  %v4698_v35 = vld [vmem:[#allocation11 + $0x68] sm:$0xff]  ;;  %v4697_v40 = vld [vmem:[#allocation11 + $0x60] sm:$0xff] }
 0x182   :  { %2702 = vmatpush.bf16.msrb.mxu3 %v4236_v14  ;;  %2866 = vmatpush.bf16.msra.mxu1 %v4698_v35 }
 0x183   :  { %2857 = vmatpush.bf16.msra.mxu0 %v4685_v37 }
 0x186   :  { %2703 = vmatpush.bf16.msrb.mxu3 %v4228_v39  ;;  %2867 = vmatpush.bf16.msra.mxu1 %v4697_v40 }
 0x187   :  { %v2078_v49 = vpop.f32.mrf.mxu2  ;;  %v2052_v36 = vpop.f32.mrf.mxu0 }
 0x188   :  { %v2092_v46 = vpop.f32.mrf.mxu3  ;;  %v2066_v62 = vpop.f32.mrf.mxu1  ;;  %v2079_v54 = vadd.f32 %v2078_v49, %v2065_v51 }
 0x189   :  { %v2067_v56 = vadd.f32 %v2066_v62, %v2052_v36 }
 0x18a   :  { %2692 = vmatmul.bf16.vlgmr.msrb.gmra.mxu2 %v2208_v20  ;;  %v2093_v59 = vadd.f32 %v2092_v46, %v2079_v54  ;;  %2704 = vmatpush.bf16.msrb.mxu3 %v4220_v17  ;;  %v2274_v46 = vld [vmem:[%s5126_s4] sm:$0x3] }
 0x18b   :  { %2868 = vmatpush.bf16.msra.mxu1 %v4696_v41  ;;  %v2276_v30 = vperm.slane %v2274_v46, 0  ;;  %v2277_v17 = vperm.slane %v2274_v46, 1 }
 0x18e   :  { %2705 = vmatpush.bf16.msrb.mxu3 %v4212_v63 }
 0x18f   :  { %v2080_v55 = vpop.f32.mrf.mxu2  ;;  %2869 = vmatpush.bf16.msra.mxu1 %v4695_v45  ;;  %v4729_v45 = vld [vmem:[%s5130_s8] ss:$0 sm:$0xff] }
 0x190   :  { %v2094_v1 = vpop.f32.mrf.mxu3  ;;  %v2081_v47 = vadd.f32 %v2080_v55, %v2067_v56 }
 0x192   :  { %v2095_v2 = vadd.f32 %v2094_v1, %v2081_v47 }
 0x193   :  { %2870 = vmatpush.bf16.msra.mxu1 %v4694_v42 }
 0x197   :  { %2871 = vmatpush.bf16.msra.mxu1 %v4693_v48 }
 0x19f   :  { %v2106_v32 = vpop.f32.mrf.mxu0 }
 0x1a0   :  { %v2120_v60 = vpop.f32.mrf.mxu1  ;;  %v2107_v18 = vadd.f32 %v2106_v32, %v2093_v59 }
 0x1a2   :  { %v2121_v4 = vadd.f32 %v2120_v60, %v2107_v18 }
 0x1a7   :  { %v2134_v10 = vpop.f32.mrf.mxu2  ;;  %v2108_v28 = vpop.f32.mrf.mxu0 }
 0x1a8   :  { %v2148_v5 = vpop.f32.mrf.mxu3  ;;  %v2135_v6 = vadd.f32 %v2134_v10, %v2121_v4  ;;  %v2109_v0 = vadd.f32 %v2108_v28, %v2095_v2  ;;  %v2122_v7 = vpop.f32.mrf.mxu1 }
 0x1aa   :  { %v2149_v12 = vadd.f32 %v2148_v5, %v2135_v6  ;;  %v2123_v15 = vadd.f32 %v2122_v7, %v2109_v0 }
 0x1ac   :  { %v2193_v21 = vadd.f32 %v2185_v13, %v2149_v12 }
 0x1ae   :  { %v2201_v23 = vmax.f32 %v2193_v21, 0.0  ;;  %v4707_v21 = vld [vmem:[#allocation12 + $0x30] sm:$0xff] }
 0x1af   :  { %v2136_v16 = vpop.f32.mrf.mxu2 }
 0x1b0   :  { %v2137_v19 = vadd.f32 %v2136_v16, %v2123_v15  ;;  %v2150_v20 = vpop.f32.mrf.mxu3 }
 0x1b2   :  { %v2151_v8 = vadd.f32 %v2150_v20, %v2137_v19  ;;  %v4708_v20 = vld [vmem:[#allocation12 + $0x38] sm:$0xff] }
 0x1b3   :  { %2949 = vmatpush.bf16.msra.mxu2 %v4708_v20 }
 0x1b4   :  { %v2197_v22 = vadd.f32 %v2185_v13, %v2151_v8  ;;  %v4706_v8 = vld [vmem:[#allocation12 + $0x28] sm:$0xff] }
 0x1b6   :  { %v2205_v24 = vmax.f32 %v2197_v22, 0.0  ;;  %v4705_v22 = vld [vmem:[#allocation12 + $0x20] sm:$0xff] }
 0x1b7   :  { %2950 = vmatpush.bf16.msra.mxu2 %v4707_v21 }
 0x1b8   :  { %v2209_v25 = vpack.c.bf16 %v2205_v24, %v2201_v23  ;;  %v4704_v23 = vld [vmem:[#allocation12 + $0x18] sm:$0xff]  ;;  %v4703_v24 = vld [vmem:[#allocation12 + $0x10] sm:$0xff] }
 0x1ba   :  { %2650 = vmatmul.bf16.vlgmr.msra.gmra.mxu3 %v2209_v25 }
 0x1bb   :  { %2951 = vmatpush.bf16.msra.mxu2 %v4706_v8 }
 0x1bf   :  { %v2609_v38 = vpop.f32.mrf.mxu0  ;;  %2952 = vmatpush.bf16.msra.mxu2 %v4705_v22 }
 0x1c0   :  { %v2623_v11 = vpop.f32.mrf.mxu1  ;;  %v2610_v14 = vadd.f32 %v2609_v38, %v2276_v30 }
 0x1c2   :  { %v2624_v52 = vadd.f32 %v2623_v11, %v2610_v14 }
 0x1c3   :  { %2953 = vmatpush.bf16.msra.mxu2 %v4704_v23 }
 0x1c7   :  { %v2611_v36 = vpop.f32.mrf.mxu0  ;;  %2954 = vmatpush.bf16.msra.mxu2 %v4703_v24 }
 0x1c8   :  { %v2625_v62 = vpop.f32.mrf.mxu1  ;;  %v2612_v53 = vadd.f32 %v2611_v36, %v2276_v30 }
 0x1ca   :  { %2706 = vmatmul.bf16.vlgmr.msrb.gmra.mxu3 %v2209_v25  ;;  %v2626_v39 = vadd.f32 %v2625_v62, %v2612_v53  ;;  %v4702_v25 = vld [vmem:[#allocation12 + $0x8] sm:$0xff] }
 0x1cb   :  { %2955 = vmatpush.bf16.msra.mxu2 %v4702_v25 }
 0x1cf   :  { %2956 = vmatpush.bf16.msra.mxu2 %v4701_v26 }
 0x1df   :  { %v2665_v54 = vpop.f32.mrf.mxu0 }
 0x1e0   :  { %v2679_v43 = vpop.f32.mrf.mxu1  ;;  %v2666_v58 = vadd.f32 %v2665_v54, %v2277_v17 }
 0x1e2   :  { %v2680_v2 = vadd.f32 %v2679_v43, %v2666_v58 }
 0x1e7   :  { %v2667_v61 = vpop.f32.mrf.mxu0 }
 0x1e8   :  { %v2668_v10 = vadd.f32 %v2667_v61, %v2277_v17  ;;  %v2681_v4 = vpop.f32.mrf.mxu1 }
 0x1ea   :  { %v2682_v28 = vadd.f32 %v2681_v4, %v2668_v10 }
 0x1fd   :  { %v2637_v49 = vpop.f32.mrf.mxu2 }
 0x1fe   :  { %v2638_v55 = vadd.f32 %v2637_v49, %v2624_v52 }
 0x205   :  { %v2639_v50 = vpop.f32.mrf.mxu2 }
 0x206   :  { %v2640_v56 = vadd.f32 %v2639_v50, %v2626_v39 }
 0x20d   :  { %v2693_v59 = vpop.f32.mrf.mxu2 }
 0x20e   :  { %v2694_v6 = vadd.f32 %v2693_v59, %v2680_v2 }
 0x215   :  { %v2695_v5 = vpop.f32.mrf.mxu2 }
 0x216   :  { %v2696_v0 = vadd.f32 %v2695_v5, %v2682_v28 }
 0x23d   :  { %v2651_v51 = vpop.f32.mrf.mxu3 }
 0x23e   :  { %v2652_v1 = vadd.f32 %v2651_v51, %v2638_v55 }
 0x240   :  { %v2712_v60 = vmax.f32 %v2652_v1, 0.0 }
 0x245   :  { %v2653_v32 = vpop.f32.mrf.mxu3 }
 0x246   :  { %v2654_v44 = vadd.f32 %v2653_v32, %v2640_v56 }
 0x248   :  { %v2714_v47 = vmax.f32 %v2654_v44, 0.0 }
 0x24a   :  { %v2716_v18 = vpack.c.bf16 %v2714_v47, %v2712_v60 }
 0x24c   :  { %2858 = vmatmul.bf16.vlgmr.msra.gmra.mxu0 %v2716_v18 }
 0x24d   :  { %v2707_v63 = vpop.f32.mrf.mxu3 }
 0x24e   :  { %v2708_v7 = vadd.f32 %v2707_v63, %v2694_v6 }
 0x250   :  { %v2713_v15 = vmax.f32 %v2708_v7, 0.0 }
 0x255   :  { %v2709_v12 = vpop.f32.mrf.mxu3 }
 0x256   :  { %v2710_v13 = vadd.f32 %v2709_v12, %v2696_v0 }
 0x258   :  { %v2715_v16 = vmax.f32 %v2710_v13, 0.0 }
 0x25a   :  { %v2717_v19 = vpack.c.bf16 %v2715_v16, %v2713_v15 }
 0x25c   :  { %2872 = vmatmul.bf16.vlgmr.msra.gmra.mxu1 %v2717_v19 }
 0x2c9   :  { %v2859_v27 = vpop.f32.mrf.mxu0 }
 0x2ca   :  { %v2860_v3 = vadd.f32 %v4728_v31, %v2859_v27 }
 0x2d1   :  { %v2861_v33 = vpop.f32.mrf.mxu0 }
 0x2d2   :  { %v2862_v57 = vadd.f32 %v4728_v31, %v2861_v33 }
 0x2d9   :  { %v2873_v29 = vpop.f32.mrf.mxu1 }
 0x2da   :  { %v2874_v9 = vadd.f32 %v2873_v29, %v2860_v3 }
 0x2dc   :  { %v2878_v37 = vmax.f32 %v2874_v9, 0.0 }
 0x2e1   :  { %v2875_v34 = vpop.f32.mrf.mxu1 }
 0x2e2   :  { %v2876_v35 = vadd.f32 %v2875_v34, %v2862_v57 }
 0x2e4   :  { %v2879_v40 = vmax.f32 %v2876_v35, 0.0 }
 0x2e6   :  { %v2880_v41 = vpack.c.bf16 %v2879_v40, %v2878_v37 }
 0x2e8   :  { %2957 = vmatmul.bf16.vlgmr.msra.gmra.mxu2 %v2880_v41 }
 0x36b   :  { %v2958_v38 = vpop.f32.mrf.mxu2 }
 0x36c   :  { %v2959_v42 = vadd.f32 %v4729_v45, %v2958_v38 }
 0x373   :  { %v2960_v49 = vpop.f32.mrf.mxu2 }
 0x374   :  { %v2961_v11 = vadd.f32 %v4729_v45, %v2960_v49 }
 0x376   :  { %v4712_v46 = vpack.c.bf16 %v2961_v11, %v2959_v42 }
 0x378   :  { %4713 = vst [vmem:[#allocation14] sm:$0xff] %v4712_v46  }
 0x379   :  { %2979 = dma.vmem_to_hbm [thread:$0]  %s2972_s24, 128, %s2974_s26, [#allocation5], %s4916_s30, %s4916_s30, %s4919_s18  }
 0x37a   :  { %4906 = dma.done.wait [#allocation5], 128  }
 0x37b   :  { %4907 = vsyncadd [#allocation5], 4294967168 }
 0x37c   :  { %2984 = vsyncpa [#allocation4], 1 }
 0x37d   :  { %2985 = vsyncpa [#allocation7], 1 }
 0x37e   :  { %2986 = vsyncpa [#allocation10], 1 }
 0x37f   :  { %2987 = vsyncpa [#allocation13], 1 }
 0x380   :  { %2988 = vsyncpa [#allocation5], 1 }

</bundles_post_ra>
